<compile_context>
chip_gen: v7x
topology: tpu7x:2x2x1
jax: 0.10.0
libtpu: 0.0.40
codegen_flags: <defaults>
</compile_context>

<pallas_src>
import functools

import jax
import jax.numpy as jnp
from jax.experimental import pallas as pl
from jax.experimental.pallas import tpu as pltpu

EPS = 1e-5  # nn.LayerNorm default eps (CLIP layer_norm_eps)


# --------------------------- in-kernel helpers ------------------------------

def _ln2d(x, g, b):
    """LayerNorm of a (S, D) f32 slab; g/b are (1, D)."""
    mean = jnp.mean(x, axis=-1, keepdims=True)
    var = jnp.mean(jnp.square(x - mean), axis=-1, keepdims=True)
    return (x - mean) * jax.lax.rsqrt(var + EPS) * g + b


def _mm_bias(x, w, b):
    """bf16 MXU matmul with f32 accumulation, bias fused."""
    return jnp.dot(x.astype(jnp.bfloat16), w.astype(jnp.bfloat16),
                   preferred_element_type=jnp.float32) + b


def _mha_2d(x, qw_ref, qb_ref, kw_ref, kb_ref, vw_ref, vb_ref, ow_ref, ob_ref,
            num_heads):
    """Multi-head attention on a single (S, D) slab (CLIPAttention, no mask).

    Per-head weights are (H, D, Dh) / (H, 1, Dh) / (H, Dh, D) refs indexed
    with static head ids -> no in-kernel transposes or lane slicing.
    """
    S, D = x.shape
    Dh = D // num_heads
    scale = Dh ** -0.5
    xb = x.astype(jnp.bfloat16)
    acc = None
    for hd in range(num_heads):
        qh = (jnp.dot(xb, qw_ref[hd].astype(jnp.bfloat16),
                      preferred_element_type=jnp.float32) + qb_ref[hd]) * scale
        kh = jnp.dot(xb, kw_ref[hd].astype(jnp.bfloat16),
                     preferred_element_type=jnp.float32) + kb_ref[hd]
        vh = jnp.dot(xb, vw_ref[hd].astype(jnp.bfloat16),
                     preferred_element_type=jnp.float32) + vb_ref[hd]
        # scores (S, S): contract head dim of q and k (== q @ k^T)
        s = jax.lax.dot_general(
            qh.astype(jnp.bfloat16), kh.astype(jnp.bfloat16),
            dimension_numbers=(((1,), (1,)), ((), ())),
            preferred_element_type=jnp.float32)
        s = s - jnp.max(s, axis=-1, keepdims=True)      # stable softmax (f32)
        p = jnp.exp(s)
        p = p * pl.reciprocal(jnp.sum(p, axis=-1, keepdims=True), approx=True)
        oh = jnp.dot(p.astype(jnp.bfloat16), vh.astype(jnp.bfloat16),
                     preferred_element_type=jnp.float32)            # (S, Dh)
        contrib = jnp.dot(oh.astype(jnp.bfloat16),
                          ow_ref[hd].astype(jnp.bfloat16),
                          preferred_element_type=jnp.float32)        # (S, D)
        acc = contrib if acc is None else acc + contrib
    return acc + ob_ref[...]


# ------------------------------ Pallas kernels ------------------------------

def _embed_kernel(xp_ref, pw_ref, addend_ref, g_ref, b_ref, o_ref):
    """patch projection + (class/pos embedding) + pre-LayerNorm, fused.

    xp row 0 is all-zeros (class-token slot), addend row 0 holds
    class_embedding + pos_embed[0]; rows >=1 hold pos_embed[1:].
    """
    x = xp_ref[...].astype(jnp.float32)                         # (L, 3*P*P)
    emb = _mm_bias(x, pw_ref[...], addend_ref[...])             # (L, D)
    o_ref[...] = _ln2d(emb, g_ref[...], b_ref[...]).astype(o_ref.dtype)


def _clip_layer_kernel(h_ref, ln1g, ln1b, qw, qb, kw, kb, vw, vb, ow, ob,
                       ln2g, ln2b, f1w, f1b, f2w, f2b, o_ref, *, num_heads):
    """Entire CLIPEncoderLayer for one batch element, fully in VMEM."""
    h = h_ref[...].astype(jnp.float32)                          # (S, D)
    x = _ln2d(h, ln1g[...], ln1b[...])
    h = h + _mha_2d(x, qw, qb, kw, kb, vw, vb, ow, ob, num_heads)
    y = _ln2d(h, ln2g[...], ln2b[...])
    y = _mm_bias(y, f1w[...], f1b[...])
    y = y * jax.nn.sigmoid(1.702 * y)                           # QuickGELU
    o_ref[...] = (h + _mm_bias(y, f2w[...], f2b[...])).astype(o_ref.dtype)


def _bt_T_kernel(h_ref, ln1g, ln1b, qw, qb, kw, kb, vw, vb, ow, ob, tfw, tfb,
                 o_ref, *, num_heads):
    """CLIPLayer_AttnTime core for one temporal group: h + tfc(attn(LN(h)))."""
    h = h_ref[...].astype(jnp.float32)                          # (t, D)
    x = _ln2d(h, ln1g[...], ln1b[...])
    attn = _mha_2d(x, qw, qb, kw, kb, vw, vb, ow, ob, num_heads)
    o_ref[...] = (h + _mm_bias(attn, tfw[...], tfb[...])).astype(o_ref.dtype)


def _bt_S_attn_kernel(h_ref, ln1g, ln1b, qw, qb, kw, kb, vw, vb, ow, ob,
                      o_ref, *, num_heads):
    """CLIPLayer_Spatial attention half for one spatial group."""
    x = _ln2d(h_ref[...].astype(jnp.float32), ln1g[...], ln1b[...])
    o_ref[...] = _mha_2d(x, qw, qb, kw, kb, vw, vb, ow, ob,
                         num_heads).astype(o_ref.dtype)


def _mlp_res_kernel(h_ref, ln2g, ln2b, f1w, f1b, f2w, f2b, o_ref):
    """h + fc2(QuickGELU(fc1(LN2(h)))) for one batch element."""
    h = h_ref[...].astype(jnp.float32)                          # (L, D)
    y = _ln2d(h, ln2g[...], ln2b[...])
    y = _mm_bias(y, f1w[...], f1b[...])
    y = y * jax.nn.sigmoid(1.702 * y)
    o_ref[...] = (h + _mm_bias(y, f2w[...], f2b[...])).astype(o_ref.dtype)


def _layernorm_kernel(x_ref, g_ref, b_ref, o_ref):
    o_ref[...] = _ln2d(x_ref[...].astype(jnp.float32),
                       g_ref[...], b_ref[...]).astype(o_ref.dtype)


# --------------------------- pallas_call wrappers ---------------------------

def _batched_fused(kernel, x, consts, out_block):
    """Run `kernel` over the leading (batch) axis of x.

    Each grid step sees one batch element (leading dim squeezed) plus the
    full weight/constant arrays (constant index_maps -> DMA'd once), and
    writes one (S_out, D_out) block.  The batch axis is a pipelined grid
    axis marked "parallel" (megacore-shardable on v7x).
    """
    B = x.shape[0]
    s_in = tuple(x.shape[1:])
    in_specs = [pl.BlockSpec((None,) + s_in, lambda i: (i, 0, 0))]
    for c in consts:
        in_specs.append(pl.BlockSpec(c.shape, lambda i, _n=c.ndim: (0,) * _n))
    return pl.pallas_call(
        kernel,
        out_shape=jax.ShapeDtypeStruct((B,) + tuple(out_block), jnp.float32),
        grid=(B,),
        in_specs=in_specs,
        out_specs=pl.BlockSpec((None,) + tuple(out_block), lambda i: (i, 0, 0)),
        compiler_params=pltpu.CompilerParams(
            dimension_semantics=("parallel",)),
    )(x, *consts)


def layernorm(x, g, b):
    """Standalone LayerNorm for the final cls tokens (single tiny tile)."""
    M, D = x.shape
    return pl.pallas_call(
        _layernorm_kernel,
        out_shape=jax.ShapeDtypeStruct((M, D), jnp.float32),
        grid=(1,),
        in_specs=[pl.BlockSpec((M, D), lambda i: (0, 0)),
                  pl.BlockSpec((1, D), lambda i: (0, 0)),
                  pl.BlockSpec((1, D), lambda i: (0, 0))],
        out_specs=pl.BlockSpec((M, D), lambda i: (0, 0)),
        compiler_params=pltpu.CompilerParams(
            dimension_semantics=("arbitrary",)),
    )(x, g.reshape(1, D), b.reshape(1, D))


def _attn_consts(p, num_heads):
    """Pack attention params as per-head slabs (no in-kernel lane slicing)."""
    D = p["q_w"].shape[0]
    Dh = D // num_heads

    def split_w(w):                      # (D, H*Dh) -> (H, D, Dh)
        return w.reshape(D, num_heads, Dh).transpose(1, 0, 2)

    def split_b(b):                      # (H*Dh,) -> (H, 1, Dh)
        return b.reshape(num_heads, Dh)[:, None, :]

    return [p["ln1_g"].reshape(1, D), p["ln1_b"].reshape(1, D),
            split_w(p["q_w"]), split_b(p["q_b"]),
            split_w(p["k_w"]), split_b(p["k_b"]),
            split_w(p["v_w"]), split_b(p["v_b"]),
            p["o_w"].reshape(num_heads, Dh, D), p["o_b"].reshape(1, D)]


def _mlp_consts(p):
    D = p["fc1_w"].shape[0]
    inter = p["fc1_w"].shape[1]
    return [p["ln2_g"].reshape(1, D), p["ln2_b"].reshape(1, D),
            p["fc1_w"], p["fc1_b"].reshape(1, inter),
            p["fc2_w"], p["fc2_b"].reshape(1, D)]


# ----------------------------- model building blocks ------------------------

def clip_encoder_layer(h, p, num_heads):
    """Fused CLIPEncoderLayer: one pallas_call, grid over the batch axis."""
    S, D = h.shape[1], h.shape[2]
    consts = _attn_consts(p, num_heads) + _mlp_consts(p)
    return _batched_fused(
        functools.partial(_clip_layer_kernel, num_heads=num_heads),
        h, consts, (S, D))


def btadapter_T_layer(h, p, t, num_heads, num_cls=1):
    """CLIPLayer_AttnTime (dropout p=0, DropPath identity at inference)."""
    b, L, m = h.shape
    pt = L - num_cls
    pdim = pt // t
    init_cls = h[:, :num_cls, :]
    # residual == the input of the temporal attention in the same layout.
    query_t = h[:, num_cls:, :].reshape(b * pdim, t, m)
    consts = _attn_consts(p, num_heads) + [p["tfc_w"], p["tfc_b"].reshape(1, m)]
    out = _batched_fused(
        functools.partial(_bt_T_kernel, num_heads=num_heads),
        query_t, consts, (t, m))
    out = out.reshape(b, pt, m)
    return jnp.concatenate([init_cls, out], axis=1)


def btadapter_S_layer(h, p, t, num_heads, num_cls=1):
    """CLIPLayer_Spatial."""
    b, L, m = h.shape
    pt = L - num_cls
    pdim = pt // t
    init_cls = h[:, :num_cls, :]
    query_s = h[:, num_cls:, :]
    cls_tok = jnp.tile(init_cls[:, None], (1, t, 1, 1)).reshape(b * t, num_cls, m)
    # rearrange 'b (p t) m -> (b t) p m'
    qs = query_s.reshape(b, pdim, t, m).transpose(0, 2, 1, 3).reshape(b * t, pdim, m)
    hs = jnp.concatenate([cls_tok, qs], axis=1)                  # (b*t, 1+p, m)

    res_spatial = _batched_fused(
        functools.partial(_bt_S_attn_kernel, num_heads=num_heads),
        hs, _attn_consts(p, num_heads), (num_cls + pdim, m))

    cls_new = res_spatial[:, :num_cls, :].reshape(b, t, num_cls, m).mean(axis=1)
    # rearrange '(b t) p m -> b (p t) m'
    rs = res_spatial[:, num_cls:, :].reshape(b, t, pdim, m).transpose(0, 2, 1, 3)
    rs = rs.reshape(b, pt, m)
    hs2 = h + jnp.concatenate([cls_new, rs], axis=1)             # residual add

    return _batched_fused(_mlp_res_kernel, hs2, _mlp_consts(p), (L, m))


def input_ini(params, x, cfg):
    """x: (b, t, l, d) -> (b, 1 + (l-1)*t, d)."""
    D = cfg["embed_dim"]
    cls_old = x[:, :, 0, :].mean(axis=1)[:, None, :]
    xp = x[:, :, 1:, :]
    B, T, L, _ = xp.shape
    xp = xp.reshape(B * T, L, D)
    cls_tokens = jnp.broadcast_to(params["btadapter_cls_token"], (B * T, 1, D))
    xp = jnp.concatenate([cls_tokens, xp], axis=1)               # (B*T, L+1, D)
    xp = xp + params["pos_embed"][: L + 1][None]
    cls = xp[:B, 0, :][:, None, :]
    xq = xp[:, 1:, :]
    # '(b t) l d -> (b l) t d'
    xq = xq.reshape(B, T, L, D).transpose(0, 2, 1, 3).reshape(B * L, T, D)
    xq = xq + params["time_embed"][:T][None]
    # '(b l) t d -> b (l t) d'
    xq = xq.reshape(B, L, T, D).reshape(B, L * T, D)
    cls = (cls_old + cls) / 2.0
    return jnp.concatenate([cls, xq], axis=1)


def forward_BTAdapter(params, x1, x2, num_layer, T, cfg):
    bt, l, d = x1.shape
    b = bt // T
    x1 = x1.reshape(b, T, l, d)
    if T > params["time_embed"].shape[0]:
        x1 = x1.reshape(b, T // 2, 2, l, d).mean(axis=2)
    t_layer = T // 2                      # matches the (unconditional) T = T // 2
    if x2 is not None:
        t_eff = x1.shape[1]
        cls_token = x1[:, :, 0, :].mean(axis=1)[:, None, :]
        x1p = x1[:, :, 1:, :]
        # 'b t l d -> b (l t) d'
        x1p = x1p.transpose(0, 2, 1, 3).reshape(b, (l - 1) * t_eff, d)
        x1c = jnp.concatenate([cls_token, x1p], axis=1)
        x = x2 + x1c                      # middle_norm is None
    else:
        x = x1
    if num_layer == 0:
        x = input_ini(params, x, cfg)
    x = btadapter_T_layer(x, params["T_layers"][num_layer], t_layer, cfg["num_heads"])
    x = btadapter_S_layer(x, params["S_layers"][num_layer], t_layer, cfg["num_heads"])
    return x


def get_combined_embedding(x, x2, T):
    bt, L, D = x.shape
    b = bt // T
    x_patch = x[:, 1:]
    x2_patch = x2[:, 1:]
    x_cls = x[:, :1].reshape(b, T, 1, D).mean(axis=1)            # (b, 1, D)
    x2_cls = x2[:, :1]
    x_patch = x_patch.reshape(b, T, L - 1, D).mean(axis=1)       # (b, L-1, D)
    p = x_patch.shape[1]
    t2 = x2_patch.shape[1] // p
    # 'b (p t) m -> b t p m' then mean over t
    x2_patch = x2_patch.reshape(x2.shape[0], p, t2, D).mean(axis=2)
    return jnp.concatenate([(x_patch + x2_patch) / 2.0,
                            (x_cls + x2_cls) / 2.0], axis=1)


def forward_embedding(params, x, cfg):
    """x: (BT, 3, H, W) -> pre-layernormed embeddings (BT, num_patches+1, D)."""
    BT = x.shape[0]
    P = cfg["patch_size"]
    Him = cfg["image_size"]
    D = cfg["embed_dim"]
    ns = Him // P
    npatch = ns * ns
    # non-overlapping patch extraction (== Conv2d stride=kernel, bias=False)
    xp = x.reshape(BT, 3, ns, P, ns, P).transpose(0, 2, 4, 1, 3, 5)
    xp = xp.reshape(BT, npatch, 3 * P * P)
    # zero "pixel row" in front so the class-token slot comes out of the same
    # matmul (its addend row already holds class_embedding + pos_embed[0]).
    xp = jnp.concatenate([jnp.zeros((BT, 1, 3 * P * P), jnp.float32), xp], axis=1)
    addend = params["pos_embed"].at[0].add(params["class_embedding"])  # (L, D)
    consts = [params["patch_w"], addend,
              params["pre_ln_g"].reshape(1, D), params["pre_ln_b"].reshape(1, D)]
    return _batched_fused(_embed_kernel, xp, consts, (npatch + 1, D))


def forward_patch(params, x, T, cfg):
    """x: already pre-layernormed embeddings (pre_layrnorm fused upstream)."""
    total = len(params["clip_layers"])
    depth = cfg["depth"]
    x2 = None
    encoder_states = ()
    for idx in range(total):
        if x2 is None:
            encoder_states = encoder_states + (x,)
        else:
            encoder_states = encoder_states + (get_combined_embedding(x, x2, T),)
        x = clip_encoder_layer(x, params["clip_layers"][idx], cfg["num_heads"])
        if idx >= total - depth:
            num_layer = idx + depth - total
            x2 = forward_BTAdapter(params, x, x2, num_layer, T, cfg)
    encoder_states = encoder_states + ((x, x2),)
    # out_norm is None branch: cls = x[:,0] + x2[:,0].repeat(1,T).view(b*T,-1)
    b2, D = x2.shape[0], x2.shape[2]
    cls_rep = jnp.tile(x2[:, 0], (1, T)).reshape(b2 * T, D)
    cls_token = x[:, 0] + cls_rep
    cls_token = layernorm(cls_token, params["post_ln_g"], params["post_ln_b"])
    return encoder_states, cls_token


def model_forward(params, x, cfg):
    """x: (B, T, 3, H, W) -> (pooler_output, hidden_states tuple)."""
    B, T = x.shape[0], x.shape[1]
    x = x.reshape((-1,) + x.shape[2:])        # (B*T, 3, H, W)
    emb = forward_embedding(params, x, cfg)
    encoder_states, cls = forward_patch(params, emb, T, cfg)
    # TODO(synk): returned as a plain tuple instead of BaseModelOutputWithPooling.
    return cls, encoder_states


# ----------------------------- parameter init -------------------------------

def init_params(key, cfg):
    D, I, P = cfg["embed_dim"], cfg["inter_dim"], cfg["patch_size"]
    keys = [key]

    def nxt():
        keys[0], sub = jax.random.split(keys[0])
        return sub

    def w(shape, scale=0.02):
        return jax.random.normal(nxt(), shape, jnp.float32) * scale

    def lin(din, dout):
        return w((din, dout)), jnp.zeros((dout,), jnp.float32)

    def clip_layer():
        p = {"ln1_g": jnp.ones((D,), jnp.float32), "ln1_b": jnp.zeros((D,), jnp.float32),
             "ln2_g": jnp.ones((D,), jnp.float32), "ln2_b": jnp.zeros((D,), jnp.float32)}
        p["q_w"], p["q_b"] = lin(D, D)
        p["k_w"], p["k_b"] = lin(D, D)
        p["v_w"], p["v_b"] = lin(D, D)
        p["o_w"], p["o_b"] = lin(D, D)
        p["fc1_w"], p["fc1_b"] = lin(D, I)
        p["fc2_w"], p["fc2_b"] = lin(I, D)
        return p

    params = {
        "patch_w": w((3 * P * P, D)),
        "class_embedding": w((D,)),
        "pos_embed": w((cfg["num_patches"] + 1, D)),
        "pre_ln_g": jnp.ones((D,), jnp.float32), "pre_ln_b": jnp.zeros((D,), jnp.float32),
        "post_ln_g": jnp.ones((D,), jnp.float32), "post_ln_b": jnp.zeros((D,), jnp.float32),
        "clip_layers": [clip_layer() for _ in range(cfg["num_layers"])],
        "time_embed": w((64, D)),
        "btadapter_cls_token": jnp.zeros((1, 1, D), jnp.float32),
    }
    # init_weights(): spatial BTAdapter layers copy the last `depth` CLIP layers.
    start = cfg["num_layers"] - cfg["depth"]
    params["S_layers"] = [dict(params["clip_layers"][start + i]) for i in range(cfg["depth"])]

    def t_layer():
        p = {"ln1_g": jnp.ones((D,), jnp.float32), "ln1_b": jnp.zeros((D,), jnp.float32)}
        p["q_w"], p["q_b"] = lin(D, D)
        p["k_w"], p["k_b"] = lin(D, D)
        p["v_w"], p["v_b"] = lin(D, D)
        p["o_w"], p["o_b"] = lin(D, D)
        # constant_init(temporal_fc, val=0, bias=0)
        p["tfc_w"] = jnp.zeros((D, D), jnp.float32)
        p["tfc_b"] = jnp.zeros((D,), jnp.float32)
        return p

    params["T_layers"] = [t_layer() for _ in range(cfg["depth"])]
    return params


# ----------------------------------- main -----------------------------------

if __name__ == "__main__":
    cfg = dict(embed_dim=32, num_heads=4, inter_dim=64,
               image_size=16, patch_size=8, num_layers=6, depth=4)
    cfg["num_patches"] = (cfg["image_size"] // cfg["patch_size"]) ** 2

    key = jax.random.PRNGKey(0)
    pkey, xkey = jax.random.split(key)
    params = init_params(pkey, cfg)

    B, T = 1, 8
    x = jax.random.normal(
        xkey, (B, T, 3, cfg["image_size"], cfg["image_size"]), jnp.float32)

    fwd = jax.jit(functools.partial(model_forward, params, cfg=cfg))
    pooler, hidden_states = fwd(x)
    pooler = jax.block_until_ready(pooler)

    assert pooler.shape == (B * T, cfg["embed_dim"])
    assert len(hidden_states) == cfg["num_layers"] + 1
    print("KERNEL_OK")
</pallas_src>

<mosaic_0001>
module attributes {stable_mosaic.version = 11 : i64} {
  func.func @_embed_kernel(%arg0: i32, %arg1: memref<1x5x192xf32, #tpu.memory_space<vmem>>, %arg2: memref<192x32xf32, #tpu.memory_space<vmem>>, %arg3: memref<5x32xf32, #tpu.memory_space<vmem>>, %arg4: memref<1x32xf32, #tpu.memory_space<vmem>>, %arg5: memref<1x32xf32, #tpu.memory_space<vmem>>, %arg6: memref<1x5x32xf32, #tpu.memory_space<vmem>>) attributes {dimension_semantics = [#tpu.dimension_semantics<parallel>], iteration_bounds = array<i64: 8>, scalar_prefetch = 0 : i64, scratch_operands = 0 : i64, tpu.core_type = #tpu.core_type<tc>, window_params = [{transform_indices = @transform_0, window_bounds = array<i64: 1, 5, 192>}, {pipeline_mode = #tpu.pipeline_mode<synchronous>, transform_indices = @transform_1, window_bounds = array<i64: 192, 32>}, {pipeline_mode = #tpu.pipeline_mode<synchronous>, transform_indices = @transform_2, window_bounds = array<i64: 5, 32>}, {pipeline_mode = #tpu.pipeline_mode<synchronous>, transform_indices = @transform_3, window_bounds = array<i64: 1, 32>}, {pipeline_mode = #tpu.pipeline_mode<synchronous>, transform_indices = @transform_4, window_bounds = array<i64: 1, 32>}, {transform_indices = @transform_5, window_bounds = array<i64: 1, 5, 32>}]} {
    %c0 = arith.constant 0 : index
    %c0_0 = arith.constant 0 : index
    %c0_1 = arith.constant 0 : index
    %0 = vector.load %arg1[%c0, %c0_0, %c0_1] : memref<1x5x192xf32, #tpu.memory_space<vmem>>, vector<1x5x192xf32>
    %1 = vector.shape_cast %0 : vector<1x5x192xf32> to vector<5x192xf32>
    %c0_2 = arith.constant 0 : index
    %c0_3 = arith.constant 0 : index
    %2 = vector.load %arg2[%c0_2, %c0_3] : memref<192x32xf32, #tpu.memory_space<vmem>>, vector<192x32xf32>
    %c0_4 = arith.constant 0 : index
    %c0_5 = arith.constant 0 : index
    %3 = vector.load %arg3[%c0_4, %c0_5] : memref<5x32xf32, #tpu.memory_space<vmem>>, vector<5x32xf32>
    %4 = arith.truncf %1 : vector<5x192xf32> to vector<5x192xbf16>
    %5 = arith.truncf %2 : vector<192x32xf32> to vector<192x32xbf16>
    %cst = arith.constant dense<0.000000e+00> : vector<5x32xf32>
    %6 = tpu.matmul %4, %5, %cst {dimension_numbers = #tpu.dot_dimension_numbers<[1], [0], [0], [1], [0, 0, 1, 1], [], []>} : vector<5x192xbf16>, vector<192x32xbf16>, vector<5x32xf32> -> vector<5x32xf32>
    %7 = arith.addf %6, %3 : vector<5x32xf32>
    %c0_6 = arith.constant 0 : index
    %c0_7 = arith.constant 0 : index
    %8 = vector.load %arg4[%c0_6, %c0_7] : memref<1x32xf32, #tpu.memory_space<vmem>>, vector<1x32xf32>
    %c0_8 = arith.constant 0 : index
    %c0_9 = arith.constant 0 : index
    %9 = vector.load %arg5[%c0_8, %c0_9] : memref<1x32xf32, #tpu.memory_space<vmem>>, vector<1x32xf32>
    %cst_10 = arith.constant dense<0.000000e+00> : vector<5xf32>
    %10 = vector.multi_reduction <add>, %7, %cst_10 [1] : vector<5x32xf32> to vector<5xf32>
    %11 = vector.shape_cast %10 : vector<5xf32> to vector<5x1xf32>
    %cst_11 = arith.constant 3.200000e+01 : f32
    %12 = vector.broadcast %cst_11 : f32 to vector<5x1xf32>
    %13 = arith.divf %11, %12 : vector<5x1xf32>
    %14 = vector.broadcast %13 : vector<5x1xf32> to vector<5x32xf32>
    %15 = arith.subf %7, %14 : vector<5x32xf32>
    %16 = arith.mulf %15, %15 : vector<5x32xf32>
    %cst_12 = arith.constant dense<0.000000e+00> : vector<5xf32>
    %17 = vector.multi_reduction <add>, %16, %cst_12 [1] : vector<5x32xf32> to vector<5xf32>
    %18 = vector.shape_cast %17 : vector<5xf32> to vector<5x1xf32>
    %cst_13 = arith.constant 3.200000e+01 : f32
    %19 = vector.broadcast %cst_13 : f32 to vector<5x1xf32>
    %20 = arith.divf %18, %19 : vector<5x1xf32>
    %21 = vector.broadcast %13 : vector<5x1xf32> to vector<5x32xf32>
    %22 = arith.subf %7, %21 : vector<5x32xf32>
    %cst_14 = arith.constant 9.99999974E-6 : f32
    %23 = vector.broadcast %cst_14 : f32 to vector<5x1xf32>
    %24 = arith.addf %20, %23 : vector<5x1xf32>
    %25 = math.rsqrt %24 : vector<5x1xf32>
    %26 = vector.broadcast %25 : vector<5x1xf32> to vector<5x32xf32>
    %27 = arith.mulf %22, %26 : vector<5x32xf32>
    %28 = vector.broadcast %8 : vector<1x32xf32> to vector<5x32xf32>
    %29 = arith.mulf %27, %28 : vector<5x32xf32>
    %30 = vector.broadcast %9 : vector<1x32xf32> to vector<5x32xf32>
    %31 = arith.addf %29, %30 : vector<5x32xf32>
    %c0_15 = arith.constant 0 : index
    %c0_16 = arith.constant 0 : index
    %c0_17 = arith.constant 0 : index
    %32 = vector.load %arg6[%c0_15, %c0_16, %c0_17] : memref<1x5x32xf32, #tpu.memory_space<vmem>>, vector<1x5x32xf32>
    %33 = vector.shape_cast %32 : vector<1x5x32xf32> to vector<5x32xf32>
    %34 = vector.shape_cast %31 : vector<5x32xf32> to vector<1x5x32xf32>
    tpu.vector_store %arg6[%c0_15, %c0_16, %c0_17], %34 {strides = array<i32>} : memref<1x5x32xf32, #tpu.memory_space<vmem>>, vector<1x5x32xf32>,
    return
  }
  func.func @transform_0(%arg0: i32) -> (i32, i32, i32) {
    %c0_i32 = arith.constant 0 : i32
    %c0_i32_0 = arith.constant 0 : i32
    %c0_i32_1 = arith.constant 0 : i32
    return %arg0, %c0_i32, %c0_i32_0 : i32, i32, i32
  }
  func.func @transform_1(%arg0: i32) -> (i32, i32) {
    %c0_i32 = arith.constant 0 : i32
    %c0_i32_0 = arith.constant 0 : i32
    %c0_i32_1 = arith.constant 0 : i32
    return %c0_i32, %c0_i32_0 : i32, i32
  }
  func.func @transform_2(%arg0: i32) -> (i32, i32) {
    %c0_i32 = arith.constant 0 : i32
    %c0_i32_0 = arith.constant 0 : i32
    %c0_i32_1 = arith.constant 0 : i32
    return %c0_i32, %c0_i32_0 : i32, i32
  }
  func.func @transform_3(%arg0: i32) -> (i32, i32) {
    %c0_i32 = arith.constant 0 : i32
    %c0_i32_0 = arith.constant 0 : i32
    %c0_i32_1 = arith.constant 0 : i32
    return %c0_i32, %c0_i32_0 : i32, i32
  }
  func.func @transform_4(%arg0: i32) -> (i32, i32) {
    %c0_i32 = arith.constant 0 : i32
    %c0_i32_0 = arith.constant 0 : i32
    %c0_i32_1 = arith.constant 0 : i32
    return %c0_i32, %c0_i32_0 : i32, i32
  }
  func.func @transform_5(%arg0: i32) -> (i32, i32, i32) {
    %c0_i32 = arith.constant 0 : i32
    %c0_i32_0 = arith.constant 0 : i32
    %c0_i32_1 = arith.constant 0 : i32
    return %arg0, %c0_i32, %c0_i32_0 : i32, i32, i32
  }
}

module attributes {stable_mosaic.version = 11 : i64} {
  func.func @_clip_layer_kernel(%arg0: i32, %arg1: memref<1x5x32xf32, #tpu.memory_space<vmem>>, %arg2: memref<1x32xf32, #tpu.memory_space<vmem>>, %arg3: memref<1x32xf32, #tpu.memory_space<vmem>>, %arg4: memref<4x32x8xf32, #tpu.memory_space<vmem>>, %arg5: memref<4x1x8xf32, #tpu.memory_space<vmem>>, %arg6: memref<4x32x8xf32, #tpu.memory_space<vmem>>, %arg7: memref<4x1x8xf32, #tpu.memory_space<vmem>>, %arg8: memref<4x32x8xf32, #tpu.memory_space<vmem>>, %arg9: memref<4x1x8xf32, #tpu.memory_space<vmem>>, %arg10: memref<4x8x32xf32, #tpu.memory_space<vmem>>, %arg11: memref<1x32xf32, #tpu.memory_space<vmem>>, %arg12: memref<1x32xf32, #tpu.memory_space<vmem>>, %arg13: memref<1x32xf32, #tpu.memory_space<vmem>>, %arg14: memref<32x64xf32, #tpu.memory_space<vmem>>, %arg15: memref<1x64xf32, #tpu.memory_space<vmem>>, %arg16: memref<64x32xf32, #tpu.memory_space<vmem>>, %arg17: memref<1x32xf32, #tpu.memory_space<vmem>>, %arg18: memref<1x5x32xf32, #tpu.memory_space<vmem>>) attributes {dimension_semantics = [#tpu.dimension_semantics<parallel>], iteration_bounds = array<i64: 8>, scalar_prefetch = 0 : i64, scratch_operands = 0 : i64, tpu.core_type = #tpu.core_type<tc>, window_params = [{transform_indices = @transform_0, window_bounds = array<i64: 1, 5, 32>}, {pipeline_mode = #tpu.pipeline_mode<synchronous>, transform_indices = @transform_1, window_bounds = array<i64: 1, 32>}, {pipeline_mode = #tpu.pipeline_mode<synchronous>, transform_indices = @transform_2, window_bounds = array<i64: 1, 32>}, {pipeline_mode = #tpu.pipeline_mode<synchronous>, transform_indices = @transform_3, window_bounds = array<i64: 4, 32, 8>}, {pipeline_mode = #tpu.pipeline_mode<synchronous>, transform_indices = @transform_4, window_bounds = array<i64: 4, 1, 8>}, {pipeline_mode = #tpu.pipeline_mode<synchronous>, transform_indices = @transform_5, window_bounds = array<i64: 4, 32, 8>}, {pipeline_mode = #tpu.pipeline_mode<synchronous>, transform_indices = @transform_6, window_bounds = array<i64: 4, 1, 8>}, {pipeline_mode = #tpu.pipeline_mode<synchronous>, transform_indices = @transform_7, window_bounds = array<i64: 4, 32, 8>}, {pipeline_mode = #tpu.pipeline_mode<synchronous>, transform_indices = @transform_8, window_bounds = array<i64: 4, 1, 8>}, {pipeline_mode = #tpu.pipeline_mode<synchronous>, transform_indices = @transform_9, window_bounds = array<i64: 4, 8, 32>}, {pipeline_mode = #tpu.pipeline_mode<synchronous>, transform_indices = @transform_10, window_bounds = array<i64: 1, 32>}, {pipeline_mode = #tpu.pipeline_mode<synchronous>, transform_indices = @transform_11, window_bounds = array<i64: 1, 32>}, {pipeline_mode = #tpu.pipeline_mode<synchronous>, transform_indices = @transform_12, window_bounds = array<i64: 1, 32>}, {pipeline_mode = #tpu.pipeline_mode<synchronous>, transform_indices = @transform_13, window_bounds = array<i64: 32, 64>}, {pipeline_mode = #tpu.pipeline_mode<synchronous>, transform_indices = @transform_14, window_bounds = array<i64: 1, 64>}, {pipeline_mode = #tpu.pipeline_mode<synchronous>, transform_indices = @transform_15, window_bounds = array<i64: 64, 32>}, {pipeline_mode = #tpu.pipeline_mode<synchronous>, transform_indices = @transform_16, window_bounds = array<i64: 1, 32>}, {transform_indices = @transform_17, window_bounds = array<i64: 1, 5, 32>}]} {
    %c0 = arith.constant 0 : index
    %c0_0 = arith.constant 0 : index
    %c0_1 = arith.constant 0 : index
    %0 = vector.load %arg1[%c0, %c0_0, %c0_1] : memref<1x5x32xf32, #tpu.memory_space<vmem>>, vector<1x5x32xf32>
    %1 = vector.shape_cast %0 : vector<1x5x32xf32> to vector<5x32xf32>
    %c0_2 = arith.constant 0 : index
    %c0_3 = arith.constant 0 : index
    %2 = vector.load %arg2[%c0_2, %c0_3] : memref<1x32xf32, #tpu.memory_space<vmem>>, vector<1x32xf32>
    %c0_4 = arith.constant 0 : index
    %c0_5 = arith.constant 0 : index
    %3 = vector.load %arg3[%c0_4, %c0_5] : memref<1x32xf32, #tpu.memory_space<vmem>>, vector<1x32xf32>
    %cst = arith.constant dense<0.000000e+00> : vector<5xf32>
    %4 = vector.multi_reduction <add>, %1, %cst [1] : vector<5x32xf32> to vector<5xf32>
    %5 = vector.shape_cast %4 : vector<5xf32> to vector<5x1xf32>
    %cst_6 = arith.constant 3.200000e+01 : f32
    %6 = vector.broadcast %cst_6 : f32 to vector<5x1xf32>
    %7 = arith.divf %5, %6 : vector<5x1xf32>
    %8 = vector.broadcast %7 : vector<5x1xf32> to vector<5x32xf32>
    %9 = arith.subf %1, %8 : vector<5x32xf32>
    %10 = arith.mulf %9, %9 : vector<5x32xf32>
    %cst_7 = arith.constant dense<0.000000e+00> : vector<5xf32>
    %11 = vector.multi_reduction <add>, %10, %cst_7 [1] : vector<5x32xf32> to vector<5xf32>
    %12 = vector.shape_cast %11 : vector<5xf32> to vector<5x1xf32>
    %cst_8 = arith.constant 3.200000e+01 : f32
    %13 = vector.broadcast %cst_8 : f32 to vector<5x1xf32>
    %14 = arith.divf %12, %13 : vector<5x1xf32>
    %15 = vector.broadcast %7 : vector<5x1xf32> to vector<5x32xf32>
    %16 = arith.subf %1, %15 : vector<5x32xf32>
    %cst_9 = arith.constant 9.99999974E-6 : f32
    %17 = vector.broadcast %cst_9 : f32 to vector<5x1xf32>
    %18 = arith.addf %14, %17 : vector<5x1xf32>
    %19 = math.rsqrt %18 : vector<5x1xf32>
    %20 = vector.broadcast %19 : vector<5x1xf32> to vector<5x32xf32>
    %21 = arith.mulf %16, %20 : vector<5x32xf32>
    %22 = vector.broadcast %2 : vector<1x32xf32> to vector<5x32xf32>
    %23 = arith.mulf %21, %22 : vector<5x32xf32>
    %24 = vector.broadcast %3 : vector<1x32xf32> to vector<5x32xf32>
    %25 = arith.addf %23, %24 : vector<5x32xf32>
    %26 = arith.truncf %25 : vector<5x32xf32> to vector<5x32xbf16>
    %c0_10 = arith.constant 0 : index
    %c0_11 = arith.constant 0 : index
    %c0_12 = arith.constant 0 : index
    %27 = vector.load %arg4[%c0_10, %c0_11, %c0_12] : memref<4x32x8xf32, #tpu.memory_space<vmem>>, vector<1x32x8xf32>
    %28 = vector.shape_cast %27 : vector<1x32x8xf32> to vector<32x8xf32>
    %29 = arith.truncf %28 : vector<32x8xf32> to vector<32x8xbf16>
    %cst_13 = arith.constant dense<0.000000e+00> : vector<5x8xf32>
    %30 = tpu.matmul %26, %29, %cst_13 {dimension_numbers = #tpu.dot_dimension_numbers<[1], [0], [0], [1], [0, 0, 1, 1], [], []>} : vector<5x32xbf16>, vector<32x8xbf16>, vector<5x8xf32> -> vector<5x8xf32>
    %c0_14 = arith.constant 0 : index
    %c0_15 = arith.constant 0 : index
    %c0_16 = arith.constant 0 : index
    %31 = vector.load %arg5[%c0_14, %c0_15, %c0_16] : memref<4x1x8xf32, #tpu.memory_space<vmem>>, vector<1x1x8xf32>
    %32 = vector.shape_cast %31 : vector<1x1x8xf32> to vector<1x8xf32>
    %33 = vector.broadcast %32 : vector<1x8xf32> to vector<5x8xf32>
    %34 = arith.addf %30, %33 : vector<5x8xf32>
    %cst_17 = arith.constant 0.353553385 : f32
    %35 = vector.broadcast %cst_17 : f32 to vector<5x8xf32>
    %36 = arith.mulf %34, %35 : vector<5x8xf32>
    %c0_18 = arith.constant 0 : index
    %c0_19 = arith.constant 0 : index
    %c0_20 = arith.constant 0 : index
    %37 = vector.load %arg6[%c0_18, %c0_19, %c0_20] : memref<4x32x8xf32, #tpu.memory_space<vmem>>, vector<1x32x8xf32>
    %38 = vector.shape_cast %37 : vector<1x32x8xf32> to vector<32x8xf32>
    %39 = arith.truncf %38 : vector<32x8xf32> to vector<32x8xbf16>
    %cst_21 = arith.constant dense<0.000000e+00> : vector<5x8xf32>
    %40 = tpu.matmul %26, %39, %cst_21 {dimension_numbers = #tpu.dot_dimension_numbers<[1], [0], [0], [1], [0, 0, 1, 1], [], []>} : vector<5x32xbf16>, vector<32x8xbf16>, vector<5x8xf32> -> vector<5x8xf32>
    %c0_22 = arith.constant 0 : index
    %c0_23 = arith.constant 0 : index
    %c0_24 = arith.constant 0 : index
    %41 = vector.load %arg7[%c0_22, %c0_23, %c0_24] : memref<4x1x8xf32, #tpu.memory_space<vmem>>, vector<1x1x8xf32>
    %42 = vector.shape_cast %41 : vector<1x1x8xf32> to vector<1x8xf32>
    %43 = vector.broadcast %42 : vector<1x8xf32> to vector<5x8xf32>
    %44 = arith.addf %40, %43 : vector<5x8xf32>
    %c0_25 = arith.constant 0 : index
    %c0_26 = arith.constant 0 : index
    %c0_27 = arith.constant 0 : index
    %45 = vector.load %arg8[%c0_25, %c0_26, %c0_27] : memref<4x32x8xf32, #tpu.memory_space<vmem>>, vector<1x32x8xf32>
    %46 = vector.shape_cast %45 : vector<1x32x8xf32> to vector<32x8xf32>
    %47 = arith.truncf %46 : vector<32x8xf32> to vector<32x8xbf16>
    %cst_28 = arith.constant dense<0.000000e+00> : vector<5x8xf32>
    %48 = tpu.matmul %26, %47, %cst_28 {dimension_numbers = #tpu.dot_dimension_numbers<[1], [0], [0], [1], [0, 0, 1, 1], [], []>} : vector<5x32xbf16>, vector<32x8xbf16>, vector<5x8xf32> -> vector<5x8xf32>
    %c0_29 = arith.constant 0 : index
    %c0_30 = arith.constant 0 : index
    %c0_31 = arith.constant 0 : index
    %49 = vector.load %arg9[%c0_29, %c0_30, %c0_31] : memref<4x1x8xf32, #tpu.memory_space<vmem>>, vector<1x1x8xf32>
    %50 = vector.shape_cast %49 : vector<1x1x8xf32> to vector<1x8xf32>
    %51 = vector.broadcast %50 : vector<1x8xf32> to vector<5x8xf32>
    %52 = arith.addf %48, %51 : vector<5x8xf32>
    %53 = arith.truncf %36 : vector<5x8xf32> to vector<5x8xbf16>
    %54 = arith.truncf %44 : vector<5x8xf32> to vector<5x8xbf16>
    %cst_32 = arith.constant dense<0.000000e+00> : vector<5x5xf32>
    %55 = tpu.matmul %53, %54, %cst_32 {dimension_numbers = #tpu.dot_dimension_numbers<[1], [1], [0], [0], [0, 0, 1, 0], [], []>} : vector<5x8xbf16>, vector<5x8xbf16>, vector<5x5xf32> -> vector<5x5xf32>
    %cst_33 = arith.constant dense<0xFF800000> : vector<5xf32>
    %56 = vector.multi_reduction <maximumf>, %55, %cst_33 [1] : vector<5x5xf32> to vector<5xf32>
    %57 = vector.shape_cast %56 : vector<5xf32> to vector<5x1xf32>
    %58 = vector.broadcast %57 : vector<5x1xf32> to vector<5x5xf32>
    %59 = arith.subf %55, %58 : vector<5x5xf32>
    %60 = math.exp %59 : vector<5x5xf32>
    %cst_34 = arith.constant dense<0.000000e+00> : vector<5xf32>
    %61 = vector.multi_reduction <add>, %60, %cst_34 [1] : vector<5x5xf32> to vector<5xf32>
    %62 = vector.shape_cast %61 : vector<5xf32> to vector<5x1xf32>
    %63 = tpu.reciprocal %62 {approx = true} : vector<5x1xf32> -> vector<5x1xf32>
    %64 = vector.broadcast %63 : vector<5x1xf32> to vector<5x5xf32>
    %65 = arith.mulf %60, %64 : vector<5x5xf32>
    %66 = arith.truncf %65 : vector<5x5xf32> to vector<5x5xbf16>
    %67 = arith.truncf %52 : vector<5x8xf32> to vector<5x8xbf16>
    %cst_35 = arith.constant dense<0.000000e+00> : vector<5x8xf32>
    %68 = tpu.matmul %66, %67, %cst_35 {dimension_numbers = #tpu.dot_dimension_numbers<[1], [0], [0], [1], [0, 0, 1, 1], [], []>} : vector<5x5xbf16>, vector<5x8xbf16>, vector<5x8xf32> -> vector<5x8xf32>
    %69 = arith.truncf %68 : vector<5x8xf32> to vector<5x8xbf16>
    %c0_36 = arith.constant 0 : index
    %c0_37 = arith.constant 0 : index
    %c0_38 = arith.constant 0 : index
    %70 = vector.load %arg10[%c0_36, %c0_37, %c0_38] : memref<4x8x32xf32, #tpu.memory_space<vmem>>, vector<1x8x32xf32>
    %71 = vector.shape_cast %70 : vector<1x8x32xf32> to vector<8x32xf32>
    %72 = arith.truncf %71 : vector<8x32xf32> to vector<8x32xbf16>
    %cst_39 = arith.constant dense<0.000000e+00> : vector<5x32xf32>
    %73 = tpu.matmul %69, %72, %cst_39 {dimension_numbers = #tpu.dot_dimension_numbers<[1], [0], [0], [1], [0, 0, 1, 1], [], []>} : vector<5x8xbf16>, vector<8x32xbf16>, vector<5x32xf32> -> vector<5x32xf32>
    %c1 = arith.constant 1 : index
    %c0_40 = arith.constant 0 : index
    %c0_41 = arith.constant 0 : index
    %74 = vector.load %arg4[%c1, %c0_40, %c0_41] : memref<4x32x8xf32, #tpu.memory_space<vmem>>, vector<1x32x8xf32>
    %75 = vector.shape_cast %74 : vector<1x32x8xf32> to vector<32x8xf32>
    %76 = arith.truncf %75 : vector<32x8xf32> to vector<32x8xbf16>
    %cst_42 = arith.constant dense<0.000000e+00> : vector<5x8xf32>
    %77 = tpu.matmul %26, %76, %cst_42 {dimension_numbers = #tpu.dot_dimension_numbers<[1], [0], [0], [1], [0, 0, 1, 1], [], []>} : vector<5x32xbf16>, vector<32x8xbf16>, vector<5x8xf32> -> vector<5x8xf32>
    %c1_43 = arith.constant 1 : index
    %c0_44 = arith.constant 0 : index
    %c0_45 = arith.constant 0 : index
    %78 = vector.load %arg5[%c1_43, %c0_44, %c0_45] : memref<4x1x8xf32, #tpu.memory_space<vmem>>, vector<1x1x8xf32>
    %79 = vector.shape_cast %78 : vector<1x1x8xf32> to vector<1x8xf32>
    %80 = vector.broadcast %79 : vector<1x8xf32> to vector<5x8xf32>
    %81 = arith.addf %77, %80 : vector<5x8xf32>
    %cst_46 = arith.constant 0.353553385 : f32
    %82 = vector.broadcast %cst_46 : f32 to vector<5x8xf32>
    %83 = arith.mulf %81, %82 : vector<5x8xf32>
    %c1_47 = arith.constant 1 : index
    %c0_48 = arith.constant 0 : index
    %c0_49 = arith.constant 0 : index
    %84 = vector.load %arg6[%c1_47, %c0_48, %c0_49] : memref<4x32x8xf32, #tpu.memory_space<vmem>>, vector<1x32x8xf32>
    %85 = vector.shape_cast %84 : vector<1x32x8xf32> to vector<32x8xf32>
    %86 = arith.truncf %85 : vector<32x8xf32> to vector<32x8xbf16>
    %cst_50 = arith.constant dense<0.000000e+00> : vector<5x8xf32>
    %87 = tpu.matmul %26, %86, %cst_50 {dimension_numbers = #tpu.dot_dimension_numbers<[1], [0], [0], [1], [0, 0, 1, 1], [], []>} : vector<5x32xbf16>, vector<32x8xbf16>, vector<5x8xf32> -> vector<5x8xf32>
    %c1_51 = arith.constant 1 : index
    %c0_52 = arith.constant 0 : index
    %c0_53 = arith.constant 0 : index
    %88 = vector.load %arg7[%c1_51, %c0_52, %c0_53] : memref<4x1x8xf32, #tpu.memory_space<vmem>>, vector<1x1x8xf32>
    %89 = vector.shape_cast %88 : vector<1x1x8xf32> to vector<1x8xf32>
    %90 = vector.broadcast %89 : vector<1x8xf32> to vector<5x8xf32>
    %91 = arith.addf %87, %90 : vector<5x8xf32>
    %c1_54 = arith.constant 1 : index
    %c0_55 = arith.constant 0 : index
    %c0_56 = arith.constant 0 : index
    %92 = vector.load %arg8[%c1_54, %c0_55, %c0_56] : memref<4x32x8xf32, #tpu.memory_space<vmem>>, vector<1x32x8xf32>
    %93 = vector.shape_cast %92 : vector<1x32x8xf32> to vector<32x8xf32>
    %94 = arith.truncf %93 : vector<32x8xf32> to vector<32x8xbf16>
    %cst_57 = arith.constant dense<0.000000e+00> : vector<5x8xf32>
    %95 = tpu.matmul %26, %94, %cst_57 {dimension_numbers = #tpu.dot_dimension_numbers<[1], [0], [0], [1], [0, 0, 1, 1], [], []>} : vector<5x32xbf16>, vector<32x8xbf16>, vector<5x8xf32> -> vector<5x8xf32>
    %c1_58 = arith.constant 1 : index
    %c0_59 = arith.constant 0 : index
    %c0_60 = arith.constant 0 : index
    %96 = vector.load %arg9[%c1_58, %c0_59, %c0_60] : memref<4x1x8xf32, #tpu.memory_space<vmem>>, vector<1x1x8xf32>
    %97 = vector.shape_cast %96 : vector<1x1x8xf32> to vector<1x8xf32>
    %98 = vector.broadcast %97 : vector<1x8xf32> to vector<5x8xf32>
    %99 = arith.addf %95, %98 : vector<5x8xf32>
    %100 = arith.truncf %83 : vector<5x8xf32> to vector<5x8xbf16>
    %101 = arith.truncf %91 : vector<5x8xf32> to vector<5x8xbf16>
    %cst_61 = arith.constant dense<0.000000e+00> : vector<5x5xf32>
    %102 = tpu.matmul %100, %101, %cst_61 {dimension_numbers = #tpu.dot_dimension_numbers<[1], [1], [0], [0], [0, 0, 1, 0], [], []>} : vector<5x8xbf16>, vector<5x8xbf16>, vector<5x5xf32> -> vector<5x5xf32>
    %cst_62 = arith.constant dense<0xFF800000> : vector<5xf32>
    %103 = vector.multi_reduction <maximumf>, %102, %cst_62 [1] : vector<5x5xf32> to vector<5xf32>
    %104 = vector.shape_cast %103 : vector<5xf32> to vector<5x1xf32>
    %105 = vector.broadcast %104 : vector<5x1xf32> to vector<5x5xf32>
    %106 = arith.subf %102, %105 : vector<5x5xf32>
    %107 = math.exp %106 : vector<5x5xf32>
    %cst_63 = arith.constant dense<0.000000e+00> : vector<5xf32>
    %108 = vector.multi_reduction <add>, %107, %cst_63 [1] : vector<5x5xf32> to vector<5xf32>
    %109 = vector.shape_cast %108 : vector<5xf32> to vector<5x1xf32>
    %110 = tpu.reciprocal %109 {approx = true} : vector<5x1xf32> -> vector<5x1xf32>
    %111 = vector.broadcast %110 : vector<5x1xf32> to vector<5x5xf32>
    %112 = arith.mulf %107, %111 : vector<5x5xf32>
    %113 = arith.truncf %112 : vector<5x5xf32> to vector<5x5xbf16>
    %114 = arith.truncf %99 : vector<5x8xf32> to vector<5x8xbf16>
    %cst_64 = arith.constant dense<0.000000e+00> : vector<5x8xf32>
    %115 = tpu.matmul %113, %114, %cst_64 {dimension_numbers = #tpu.dot_dimension_numbers<[1], [0], [0], [1], [0, 0, 1, 1], [], []>} : vector<5x5xbf16>, vector<5x8xbf16>, vector<5x8xf32> -> vector<5x8xf32>
    %116 = arith.truncf %115 : vector<5x8xf32> to vector<5x8xbf16>
    %c1_65 = arith.constant 1 : index
    %c0_66 = arith.constant 0 : index
    %c0_67 = arith.constant 0 : index
    %117 = vector.load %arg10[%c1_65, %c0_66, %c0_67] : memref<4x8x32xf32, #tpu.memory_space<vmem>>, vector<1x8x32xf32>
    %118 = vector.shape_cast %117 : vector<1x8x32xf32> to vector<8x32xf32>
    %119 = arith.truncf %118 : vector<8x32xf32> to vector<8x32xbf16>
    %cst_68 = arith.constant dense<0.000000e+00> : vector<5x32xf32>
    %120 = tpu.matmul %116, %119, %cst_68 {dimension_numbers = #tpu.dot_dimension_numbers<[1], [0], [0], [1], [0, 0, 1, 1], [], []>} : vector<5x8xbf16>, vector<8x32xbf16>, vector<5x32xf32> -> vector<5x32xf32>
    %121 = arith.addf %73, %120 : vector<5x32xf32>
    %c2 = arith.constant 2 : index
    %c0_69 = arith.constant 0 : index
    %c0_70 = arith.constant 0 : index
    %122 = vector.load %arg4[%c2, %c0_69, %c0_70] : memref<4x32x8xf32, #tpu.memory_space<vmem>>, vector<1x32x8xf32>
    %123 = vector.shape_cast %122 : vector<1x32x8xf32> to vector<32x8xf32>
    %124 = arith.truncf %123 : vector<32x8xf32> to vector<32x8xbf16>
    %cst_71 = arith.constant dense<0.000000e+00> : vector<5x8xf32>
    %125 = tpu.matmul %26, %124, %cst_71 {dimension_numbers = #tpu.dot_dimension_numbers<[1], [0], [0], [1], [0, 0, 1, 1], [], []>} : vector<5x32xbf16>, vector<32x8xbf16>, vector<5x8xf32> -> vector<5x8xf32>
    %c2_72 = arith.constant 2 : index
    %c0_73 = arith.constant 0 : index
    %c0_74 = arith.constant 0 : index
    %126 = vector.load %arg5[%c2_72, %c0_73, %c0_74] : memref<4x1x8xf32, #tpu.memory_space<vmem>>, vector<1x1x8xf32>
    %127 = vector.shape_cast %126 : vector<1x1x8xf32> to vector<1x8xf32>
    %128 = vector.broadcast %127 : vector<1x8xf32> to vector<5x8xf32>
    %129 = arith.addf %125, %128 : vector<5x8xf32>
    %cst_75 = arith.constant 0.353553385 : f32
    %130 = vector.broadcast %cst_75 : f32 to vector<5x8xf32>
    %131 = arith.mulf %129, %130 : vector<5x8xf32>
    %c2_76 = arith.constant 2 : index
    %c0_77 = arith.constant 0 : index
    %c0_78 = arith.constant 0 : index
    %132 = vector.load %arg6[%c2_76, %c0_77, %c0_78] : memref<4x32x8xf32, #tpu.memory_space<vmem>>, vector<1x32x8xf32>
    %133 = vector.shape_cast %132 : vector<1x32x8xf32> to vector<32x8xf32>
    %134 = arith.truncf %133 : vector<32x8xf32> to vector<32x8xbf16>
    %cst_79 = arith.constant dense<0.000000e+00> : vector<5x8xf32>
    %135 = tpu.matmul %26, %134, %cst_79 {dimension_numbers = #tpu.dot_dimension_numbers<[1], [0], [0], [1], [0, 0, 1, 1], [], []>} : vector<5x32xbf16>, vector<32x8xbf16>, vector<5x8xf32> -> vector<5x8xf32>
    %c2_80 = arith.constant 2 : index
    %c0_81 = arith.constant 0 : index
    %c0_82 = arith.constant 0 : index
    %136 = vector.load %arg7[%c2_80, %c0_81, %c0_82] : memref<4x1x8xf32, #tpu.memory_space<vmem>>, vector<1x1x8xf32>
    %137 = vector.shape_cast %136 : vector<1x1x8xf32> to vector<1x8xf32>
    %138 = vector.broadcast %137 : vector<1x8xf32> to vector<5x8xf32>
    %139 = arith.addf %135, %138 : vector<5x8xf32>
    %c2_83 = arith.constant 2 : index
    %c0_84 = arith.constant 0 : index
    %c0_85 = arith.constant 0 : index
    %140 = vector.load %arg8[%c2_83, %c0_84, %c0_85] : memref<4x32x8xf32, #tpu.memory_space<vmem>>, vector<1x32x8xf32>
    %141 = vector.shape_cast %140 : vector<1x32x8xf32> to vector<32x8xf32>
    %142 = arith.truncf %141 : vector<32x8xf32> to vector<32x8xbf16>
    %cst_86 = arith.constant dense<0.000000e+00> : vector<5x8xf32>
    %143 = tpu.matmul %26, %142, %cst_86 {dimension_numbers = #tpu.dot_dimension_numbers<[1], [0], [0], [1], [0, 0, 1, 1], [], []>} : vector<5x32xbf16>, vector<32x8xbf16>, vector<5x8xf32> -> vector<5x8xf32>
    %c2_87 = arith.constant 2 : index
    %c0_88 = arith.constant 0 : index
    %c0_89 = arith.constant 0 : index
    %144 = vector.load %arg9[%c2_87, %c0_88, %c0_89] : memref<4x1x8xf32, #tpu.memory_space<vmem>>, vector<1x1x8xf32>
    %145 = vector.shape_cast %144 : vector<1x1x8xf32> to vector<1x8xf32>
    %146 = vector.broadcast %145 : vector<1x8xf32> to vector<5x8xf32>
    %147 = arith.addf %143, %146 : vector<5x8xf32>
    %148 = arith.truncf %131 : vector<5x8xf32> to vector<5x8xbf16>
    %149 = arith.truncf %139 : vector<5x8xf32> to vector<5x8xbf16>
    %cst_90 = arith.constant dense<0.000000e+00> : vector<5x5xf32>
    %150 = tpu.matmul %148, %149, %cst_90 {dimension_numbers = #tpu.dot_dimension_numbers<[1], [1], [0], [0], [0, 0, 1, 0], [], []>} : vector<5x8xbf16>, vector<5x8xbf16>, vector<5x5xf32> -> vector<5x5xf32>
    %cst_91 = arith.constant dense<0xFF800000> : vector<5xf32>
    %151 = vector.multi_reduction <maximumf>, %150, %cst_91 [1] : vector<5x5xf32> to vector<5xf32>
    %152 = vector.shape_cast %151 : vector<5xf32> to vector<5x1xf32>
    %153 = vector.broadcast %152 : vector<5x1xf32> to vector<5x5xf32>
    %154 = arith.subf %150, %153 : vector<5x5xf32>
    %155 = math.exp %154 : vector<5x5xf32>
    %cst_92 = arith.constant dense<0.000000e+00> : vector<5xf32>
    %156 = vector.multi_reduction <add>, %155, %cst_92 [1] : vector<5x5xf32> to vector<5xf32>
    %157 = vector.shape_cast %156 : vector<5xf32> to vector<5x1xf32>
    %158 = tpu.reciprocal %157 {approx = true} : vector<5x1xf32> -> vector<5x1xf32>
    %159 = vector.broadcast %158 : vector<5x1xf32> to vector<5x5xf32>
    %160 = arith.mulf %155, %159 : vector<5x5xf32>
    %161 = arith.truncf %160 : vector<5x5xf32> to vector<5x5xbf16>
    %162 = arith.truncf %147 : vector<5x8xf32> to vector<5x8xbf16>
    %cst_93 = arith.constant dense<0.000000e+00> : vector<5x8xf32>
    %163 = tpu.matmul %161, %162, %cst_93 {dimension_numbers = #tpu.dot_dimension_numbers<[1], [0], [0], [1], [0, 0, 1, 1], [], []>} : vector<5x5xbf16>, vector<5x8xbf16>, vector<5x8xf32> -> vector<5x8xf32>
    %164 = arith.truncf %163 : vector<5x8xf32> to vector<5x8xbf16>
    %c2_94 = arith.constant 2 : index
    %c0_95 = arith.constant 0 : index
    %c0_96 = arith.constant 0 : index
    %165 = vector.load %arg10[%c2_94, %c0_95, %c0_96] : memref<4x8x32xf32, #tpu.memory_space<vmem>>, vector<1x8x32xf32>
    %166 = vector.shape_cast %165 : vector<1x8x32xf32> to vector<8x32xf32>
    %167 = arith.truncf %166 : vector<8x32xf32> to vector<8x32xbf16>
    %cst_97 = arith.constant dense<0.000000e+00> : vector<5x32xf32>
    %168 = tpu.matmul %164, %167, %cst_97 {dimension_numbers = #tpu.dot_dimension_numbers<[1], [0], [0], [1], [0, 0, 1, 1], [], []>} : vector<5x8xbf16>, vector<8x32xbf16>, vector<5x32xf32> -> vector<5x32xf32>
    %169 = arith.addf %121, %168 : vector<5x32xf32>
    %c3 = arith.constant 3 : index
    %c0_98 = arith.constant 0 : index
    %c0_99 = arith.constant 0 : index
    %170 = vector.load %arg4[%c3, %c0_98, %c0_99] : memref<4x32x8xf32, #tpu.memory_space<vmem>>, vector<1x32x8xf32>
    %171 = vector.shape_cast %170 : vector<1x32x8xf32> to vector<32x8xf32>
    %172 = arith.truncf %171 : vector<32x8xf32> to vector<32x8xbf16>
    %cst_100 = arith.constant dense<0.000000e+00> : vector<5x8xf32>
    %173 = tpu.matmul %26, %172, %cst_100 {dimension_numbers = #tpu.dot_dimension_numbers<[1], [0], [0], [1], [0, 0, 1, 1], [], []>} : vector<5x32xbf16>, vector<32x8xbf16>, vector<5x8xf32> -> vector<5x8xf32>
    %c3_101 = arith.constant 3 : index
    %c0_102 = arith.constant 0 : index
    %c0_103 = arith.constant 0 : index
    %174 = vector.load %arg5[%c3_101, %c0_102, %c0_103] : memref<4x1x8xf32, #tpu.memory_space<vmem>>, vector<1x1x8xf32>
    %175 = vector.shape_cast %174 : vector<1x1x8xf32> to vector<1x8xf32>
    %176 = vector.broadcast %175 : vector<1x8xf32> to vector<5x8xf32>
    %177 = arith.addf %173, %176 : vector<5x8xf32>
    %cst_104 = arith.constant 0.353553385 : f32
    %178 = vector.broadcast %cst_104 : f32 to vector<5x8xf32>
    %179 = arith.mulf %177, %178 : vector<5x8xf32>
    %c3_105 = arith.constant 3 : index
    %c0_106 = arith.constant 0 : index
    %c0_107 = arith.constant 0 : index
    %180 = vector.load %arg6[%c3_105, %c0_106, %c0_107] : memref<4x32x8xf32, #tpu.memory_space<vmem>>, vector<1x32x8xf32>
    %181 = vector.shape_cast %180 : vector<1x32x8xf32> to vector<32x8xf32>
    %182 = arith.truncf %181 : vector<32x8xf32> to vector<32x8xbf16>
    %cst_108 = arith.constant dense<0.000000e+00> : vector<5x8xf32>
    %183 = tpu.matmul %26, %182, %cst_108 {dimension_numbers = #tpu.dot_dimension_numbers<[1], [0], [0], [1], [0, 0, 1, 1], [], []>} : vector<5x32xbf16>, vector<32x8xbf16>, vector<5x8xf32> -> vector<5x8xf32>
    %c3_109 = arith.constant 3 : index
    %c0_110 = arith.constant 0 : index
    %c0_111 = arith.constant 0 : index
    %184 = vector.load %arg7[%c3_109, %c0_110, %c0_111] : memref<4x1x8xf32, #tpu.memory_space<vmem>>, vector<1x1x8xf32>
    %185 = vector.shape_cast %184 : vector<1x1x8xf32> to vector<1x8xf32>
    %186 = vector.broadcast %185 : vector<1x8xf32> to vector<5x8xf32>
    %187 = arith.addf %183, %186 : vector<5x8xf32>
    %c3_112 = arith.constant 3 : index
    %c0_113 = arith.constant 0 : index
    %c0_114 = arith.constant 0 : index
    %188 = vector.load %arg8[%c3_112, %c0_113, %c0_114] : memref<4x32x8xf32, #tpu.memory_space<vmem>>, vector<1x32x8xf32>
    %189 = vector.shape_cast %188 : vector<1x32x8xf32> to vector<32x8xf32>
    %190 = arith.truncf %189 : vector<32x8xf32> to vector<32x8xbf16>
    %cst_115 = arith.constant dense<0.000000e+00> : vector<5x8xf32>
    %191 = tpu.matmul %26, %190, %cst_115 {dimension_numbers = #tpu.dot_dimension_numbers<[1], [0], [0], [1], [0, 0, 1, 1], [], []>} : vector<5x32xbf16>, vector<32x8xbf16>, vector<5x8xf32> -> vector<5x8xf32>
    %c3_116 = arith.constant 3 : index
    %c0_117 = arith.constant 0 : index
    %c0_118 = arith.constant 0 : index
    %192 = vector.load %arg9[%c3_116, %c0_117, %c0_118] : memref<4x1x8xf32, #tpu.memory_space<vmem>>, vector<1x1x8xf32>
    %193 = vector.shape_cast %192 : vector<1x1x8xf32> to vector<1x8xf32>
    %194 = vector.broadcast %193 : vector<1x8xf32> to vector<5x8xf32>
    %195 = arith.addf %191, %194 : vector<5x8xf32>
    %196 = arith.truncf %179 : vector<5x8xf32> to vector<5x8xbf16>
    %197 = arith.truncf %187 : vector<5x8xf32> to vector<5x8xbf16>
    %cst_119 = arith.constant dense<0.000000e+00> : vector<5x5xf32>
    %198 = tpu.matmul %196, %197, %cst_119 {dimension_numbers = #tpu.dot_dimension_numbers<[1], [1], [0], [0], [0, 0, 1, 0], [], []>} : vector<5x8xbf16>, vector<5x8xbf16>, vector<5x5xf32> -> vector<5x5xf32>
    %cst_120 = arith.constant dense<0xFF800000> : vector<5xf32>
    %199 = vector.multi_reduction <maximumf>, %198, %cst_120 [1] : vector<5x5xf32> to vector<5xf32>
    %200 = vector.shape_cast %199 : vector<5xf32> to vector<5x1xf32>
    %201 = vector.broadcast %200 : vector<5x1xf32> to vector<5x5xf32>
    %202 = arith.subf %198, %201 : vector<5x5xf32>
    %203 = math.exp %202 : vector<5x5xf32>
    %cst_121 = arith.constant dense<0.000000e+00> : vector<5xf32>
    %204 = vector.multi_reduction <add>, %203, %cst_121 [1] : vector<5x5xf32> to vector<5xf32>
    %205 = vector.shape_cast %204 : vector<5xf32> to vector<5x1xf32>
    %206 = tpu.reciprocal %205 {approx = true} : vector<5x1xf32> -> vector<5x1xf32>
    %207 = vector.broadcast %206 : vector<5x1xf32> to vector<5x5xf32>
    %208 = arith.mulf %203, %207 : vector<5x5xf32>
    %209 = arith.truncf %208 : vector<5x5xf32> to vector<5x5xbf16>
    %210 = arith.truncf %195 : vector<5x8xf32> to vector<5x8xbf16>
    %cst_122 = arith.constant dense<0.000000e+00> : vector<5x8xf32>
    %211 = tpu.matmul %209, %210, %cst_122 {dimension_numbers = #tpu.dot_dimension_numbers<[1], [0], [0], [1], [0, 0, 1, 1], [], []>} : vector<5x5xbf16>, vector<5x8xbf16>, vector<5x8xf32> -> vector<5x8xf32>
    %212 = arith.truncf %211 : vector<5x8xf32> to vector<5x8xbf16>
    %c3_123 = arith.constant 3 : index
    %c0_124 = arith.constant 0 : index
    %c0_125 = arith.constant 0 : index
    %213 = vector.load %arg10[%c3_123, %c0_124, %c0_125] : memref<4x8x32xf32, #tpu.memory_space<vmem>>, vector<1x8x32xf32>
    %214 = vector.shape_cast %213 : vector<1x8x32xf32> to vector<8x32xf32>
    %215 = arith.truncf %214 : vector<8x32xf32> to vector<8x32xbf16>
    %cst_126 = arith.constant dense<0.000000e+00> : vector<5x32xf32>
    %216 = tpu.matmul %212, %215, %cst_126 {dimension_numbers = #tpu.dot_dimension_numbers<[1], [0], [0], [1], [0, 0, 1, 1], [], []>} : vector<5x8xbf16>, vector<8x32xbf16>, vector<5x32xf32> -> vector<5x32xf32>
    %217 = arith.addf %169, %216 : vector<5x32xf32>
    %c0_127 = arith.constant 0 : index
    %c0_128 = arith.constant 0 : index
    %218 = vector.load %arg11[%c0_127, %c0_128] : memref<1x32xf32, #tpu.memory_space<vmem>>, vector<1x32xf32>
    %219 = vector.broadcast %218 : vector<1x32xf32> to vector<5x32xf32>
    %220 = arith.addf %217, %219 : vector<5x32xf32>
    %221 = arith.addf %1, %220 : vector<5x32xf32>
    %c0_129 = arith.constant 0 : index
    %c0_130 = arith.constant 0 : index
    %222 = vector.load %arg12[%c0_129, %c0_130] : memref<1x32xf32, #tpu.memory_space<vmem>>, vector<1x32xf32>
    %c0_131 = arith.constant 0 : index
    %c0_132 = arith.constant 0 : index
    %223 = vector.load %arg13[%c0_131, %c0_132] : memref<1x32xf32, #tpu.memory_space<vmem>>, vector<1x32xf32>
    %cst_133 = arith.constant dense<0.000000e+00> : vector<5xf32>
    %224 = vector.multi_reduction <add>, %221, %cst_133 [1] : vector<5x32xf32> to vector<5xf32>
    %225 = vector.shape_cast %224 : vector<5xf32> to vector<5x1xf32>
    %cst_134 = arith.constant 3.200000e+01 : f32
    %226 = vector.broadcast %cst_134 : f32 to vector<5x1xf32>
    %227 = arith.divf %225, %226 : vector<5x1xf32>
    %228 = vector.broadcast %227 : vector<5x1xf32> to vector<5x32xf32>
    %229 = arith.subf %221, %228 : vector<5x32xf32>
    %230 = arith.mulf %229, %229 : vector<5x32xf32>
    %cst_135 = arith.constant dense<0.000000e+00> : vector<5xf32>
    %231 = vector.multi_reduction <add>, %230, %cst_135 [1] : vector<5x32xf32> to vector<5xf32>
    %232 = vector.shape_cast %231 : vector<5xf32> to vector<5x1xf32>
    %cst_136 = arith.constant 3.200000e+01 : f32
    %233 = vector.broadcast %cst_136 : f32 to vector<5x1xf32>
    %234 = arith.divf %232, %233 : vector<5x1xf32>
    %235 = vector.broadcast %227 : vector<5x1xf32> to vector<5x32xf32>
    %236 = arith.subf %221, %235 : vector<5x32xf32>
    %cst_137 = arith.constant 9.99999974E-6 : f32
    %237 = vector.broadcast %cst_137 : f32 to vector<5x1xf32>
    %238 = arith.addf %234, %237 : vector<5x1xf32>
    %239 = math.rsqrt %238 : vector<5x1xf32>
    %240 = vector.broadcast %239 : vector<5x1xf32> to vector<5x32xf32>
    %241 = arith.mulf %236, %240 : vector<5x32xf32>
    %242 = vector.broadcast %222 : vector<1x32xf32> to vector<5x32xf32>
    %243 = arith.mulf %241, %242 : vector<5x32xf32>
    %244 = vector.broadcast %223 : vector<1x32xf32> to vector<5x32xf32>
    %245 = arith.addf %243, %244 : vector<5x32xf32>
    %c0_138 = arith.constant 0 : index
    %c0_139 = arith.constant 0 : index
    %246 = vector.load %arg14[%c0_138, %c0_139] : memref<32x64xf32, #tpu.memory_space<vmem>>, vector<32x64xf32>
    %c0_140 = arith.constant 0 : index
    %c0_141 = arith.constant 0 : index
    %247 = vector.load %arg15[%c0_140, %c0_141] : memref<1x64xf32, #tpu.memory_space<vmem>>, vector<1x64xf32>
    %248 = arith.truncf %245 : vector<5x32xf32> to vector<5x32xbf16>
    %249 = arith.truncf %246 : vector<32x64xf32> to vector<32x64xbf16>
    %cst_142 = arith.constant dense<0.000000e+00> : vector<5x64xf32>
    %250 = tpu.matmul %248, %249, %cst_142 {dimension_numbers = #tpu.dot_dimension_numbers<[1], [0], [0], [1], [0, 0, 1, 1], [], []>} : vector<5x32xbf16>, vector<32x64xbf16>, vector<5x64xf32> -> vector<5x64xf32>
    %251 = vector.broadcast %247 : vector<1x64xf32> to vector<5x64xf32>
    %252 = arith.addf %250, %251 : vector<5x64xf32>
    %cst_143 = arith.constant 1.702000e+00 : f32
    %253 = vector.broadcast %cst_143 : f32 to vector<5x64xf32>
    %254 = arith.mulf %253, %252 : vector<5x64xf32>
    %255 = arith.negf %254 : vector<5x64xf32>
    %256 = math.exp %255 : vector<5x64xf32>
    %cst_144 = arith.constant 1.000000e+00 : f32
    %257 = vector.broadcast %cst_144 : f32 to vector<5x64xf32>
    %258 = arith.addf %257, %256 : vector<5x64xf32>
    %259 = arith.divf %257, %258 : vector<5x64xf32>
    %260 = arith.mulf %252, %259 : vector<5x64xf32>
    %c0_145 = arith.constant 0 : index
    %c0_146 = arith.constant 0 : index
    %261 = vector.load %arg16[%c0_145, %c0_146] : memref<64x32xf32, #tpu.memory_space<vmem>>, vector<64x32xf32>
    %c0_147 = arith.constant 0 : index
    %c0_148 = arith.constant 0 : index
    %262 = vector.load %arg17[%c0_147, %c0_148] : memref<1x32xf32, #tpu.memory_space<vmem>>, vector<1x32xf32>
    %263 = arith.truncf %260 : vector<5x64xf32> to vector<5x64xbf16>
    %264 = arith.truncf %261 : vector<64x32xf32> to vector<64x32xbf16>
    %cst_149 = arith.constant dense<0.000000e+00> : vector<5x32xf32>
    %265 = tpu.matmul %263, %264, %cst_149 {dimension_numbers = #tpu.dot_dimension_numbers<[1], [0], [0], [1], [0, 0, 1, 1], [], []>} : vector<5x64xbf16>, vector<64x32xbf16>, vector<5x32xf32> -> vector<5x32xf32>
    %266 = vector.broadcast %262 : vector<1x32xf32> to vector<5x32xf32>
    %267 = arith.addf %265, %266 : vector<5x32xf32>
    %268 = arith.addf %221, %267 : vector<5x32xf32>
    %c0_150 = arith.constant 0 : index
    %c0_151 = arith.constant 0 : index
    %c0_152 = arith.constant 0 : index
    %269 = vector.load %arg18[%c0_150, %c0_151, %c0_152] : memref<1x5x32xf32, #tpu.memory_space<vmem>>, vector<1x5x32xf32>
    %270 = vector.shape_cast %269 : vector<1x5x32xf32> to vector<5x32xf32>
    %271 = vector.shape_cast %268 : vector<5x32xf32> to vector<1x5x32xf32>
    tpu.vector_store %arg18[%c0_150, %c0_151, %c0_152], %271 {strides = array<i32>} : memref<1x5x32xf32, #tpu.memory_space<vmem>>, vector<1x5x32xf32>,
    return
  }
  func.func @transform_0(%arg0: i32) -> (i32, i32, i32) {
    %c0_i32 = arith.constant 0 : i32
    %c0_i32_0 = arith.constant 0 : i32
    %c0_i32_1 = arith.constant 0 : i32
    return %arg0, %c0_i32, %c0_i32_0 : i32, i32, i32
  }
  func.func @transform_1(%arg0: i32) -> (i32, i32) {
    %c0_i32 = arith.constant 0 : i32
    %c0_i32_0 = arith.constant 0 : i32
    %c0_i32_1 = arith.constant 0 : i32
    return %c0_i32, %c0_i32_0 : i32, i32
  }
  func.func @transform_2(%arg0: i32) -> (i32, i32) {
    %c0_i32 = arith.constant 0 : i32
    %c0_i32_0 = arith.constant 0 : i32
    %c0_i32_1 = arith.constant 0 : i32
    return %c0_i32, %c0_i32_0 : i32, i32
  }
  func.func @transform_3(%arg0: i32) -> (i32, i32, i32) {
    %c0_i32 = arith.constant 0 : i32
    %c0_i32_0 = arith.constant 0 : i32
    %c0_i32_1 = arith.constant 0 : i32
    %c0_i32_2 = arith.constant 0 : i32
    return %c0_i32, %c0_i32_0, %c0_i32_1 : i32, i32, i32
  }
  func.func @transform_4(%arg0: i32) -> (i32, i32, i32) {
    %c0_i32 = arith.constant 0 : i32
    %c0_i32_0 = arith.constant 0 : i32
    %c0_i32_1 = arith.constant 0 : i32
    %c0_i32_2 = arith.constant 0 : i32
    return %c0_i32, %c0_i32_0, %c0_i32_1 : i32, i32, i32
  }
  func.func @transform_5(%arg0: i32) -> (i32, i32, i32) {
    %c0_i32 = arith.constant 0 : i32
    %c0_i32_0 = arith.constant 0 : i32
    %c0_i32_1 = arith.constant 0 : i32
    %c0_i32_2 = arith.constant 0 : i32
    return %c0_i32, %c0_i32_0, %c0_i32_1 : i32, i32, i32
  }
  func.func @transform_6(%arg0: i32) -> (i32, i32, i32) {
    %c0_i32 = arith.constant 0 : i32
    %c0_i32_0 = arith.constant 0 : i32
    %c0_i32_1 = arith.constant 0 : i32
    %c0_i32_2 = arith.constant 0 : i32
    return %c0_i32, %c0_i32_0, %c0_i32_1 : i32, i32, i32
  }
  func.func @transform_7(%arg0: i32) -> (i32, i32, i32) {
    %c0_i32 = arith.constant 0 : i32
    %c0_i32_0 = arith.constant 0 : i32
    %c0_i32_1 = arith.constant 0 : i32
    %c0_i32_2 = arith.constant 0 : i32
    return %c0_i32, %c0_i32_0, %c0_i32_1 : i32, i32, i32
  }
  func.func @transform_8(%arg0: i32) -> (i32, i32, i32) {
    %c0_i32 = arith.constant 0 : i32
    %c0_i32_0 = arith.constant 0 : i32
    %c0_i32_1 = arith.constant 0 : i32
    %c0_i32_2 = arith.constant 0 : i32
    return %c0_i32, %c0_i32_0, %c0_i32_1 : i32, i32, i32
  }
  func.func @transform_9(%arg0: i32) -> (i32, i32, i32) {
    %c0_i32 = arith.constant 0 : i32
    %c0_i32_0 = arith.constant 0 : i32
    %c0_i32_1 = arith.constant 0 : i32
    %c0_i32_2 = arith.constant 0 : i32
    return %c0_i32, %c0_i32_0, %c0_i32_1 : i32, i32, i32
  }
  func.func @transform_10(%arg0: i32) -> (i32, i32) {
    %c0_i32 = arith.constant 0 : i32
    %c0_i32_0 = arith.constant 0 : i32
    %c0_i32_1 = arith.constant 0 : i32
    return %c0_i32, %c0_i32_0 : i32, i32
  }
  func.func @transform_11(%arg0: i32) -> (i32, i32) {
    %c0_i32 = arith.constant 0 : i32
    %c0_i32_0 = arith.constant 0 : i32
    %c0_i32_1 = arith.constant 0 : i32
    return %c0_i32, %c0_i32_0 : i32, i32
  }
  func.func @transform_12(%arg0: i32) -> (i32, i32) {
    %c0_i32 = arith.constant 0 : i32
    %c0_i32_0 = arith.constant 0 : i32
    %c0_i32_1 = arith.constant 0 : i32
    return %c0_i32, %c0_i32_0 : i32, i32
  }
  func.func @transform_13(%arg0: i32) -> (i32, i32) {
    %c0_i32 = arith.constant 0 : i32
    %c0_i32_0 = arith.constant 0 : i32
    %c0_i32_1 = arith.constant 0 : i32
    return %c0_i32, %c0_i32_0 : i32, i32
  }
  func.func @transform_14(%arg0: i32) -> (i32, i32) {
    %c0_i32 = arith.constant 0 : i32
    %c0_i32_0 = arith.constant 0 : i32
    %c0_i32_1 = arith.constant 0 : i32
    return %c0_i32, %c0_i32_0 : i32, i32
  }
  func.func @transform_15(%arg0: i32) -> (i32, i32) {
    %c0_i32 = arith.constant 0 : i32
    %c0_i32_0 = arith.constant 0 : i32
    %c0_i32_1 = arith.constant 0 : i32
    return %c0_i32, %c0_i32_0 : i32, i32
  }
  func.func @transform_16(%arg0: i32) -> (i32, i32) {
    %c0_i32 = arith.constant 0 : i32
    %c0_i32_0 = arith.constant 0 : i32
    %c0_i32_1 = arith.constant 0 : i32
    return %c0_i32, %c0_i32_0 : i32, i32
  }
  func.func @transform_17(%arg0: i32) -> (i32, i32, i32) {
    %c0_i32 = arith.constant 0 : i32
    %c0_i32_0 = arith.constant 0 : i32
    %c0_i32_1 = arith.constant 0 : i32
    return %arg0, %c0_i32, %c0_i32_0 : i32, i32, i32
  }
}

module attributes {stable_mosaic.version = 11 : i64} {
  func.func @_bt_T_kernel(%arg0: i32, %arg1: memref<1x4x32xf32, #tpu.memory_space<vmem>>, %arg2: memref<1x32xf32, #tpu.memory_space<vmem>>, %arg3: memref<1x32xf32, #tpu.memory_space<vmem>>, %arg4: memref<4x32x8xf32, #tpu.memory_space<vmem>>, %arg5: memref<4x1x8xf32, #tpu.memory_space<vmem>>, %arg6: memref<4x32x8xf32, #tpu.memory_space<vmem>>, %arg7: memref<4x1x8xf32, #tpu.memory_space<vmem>>, %arg8: memref<4x32x8xf32, #tpu.memory_space<vmem>>, %arg9: memref<4x1x8xf32, #tpu.memory_space<vmem>>, %arg10: memref<4x8x32xf32, #tpu.memory_space<vmem>>, %arg11: memref<1x32xf32, #tpu.memory_space<vmem>>, %arg12: memref<32x32xf32, #tpu.memory_space<vmem>>, %arg13: memref<1x32xf32, #tpu.memory_space<vmem>>, %arg14: memref<1x4x32xf32, #tpu.memory_space<vmem>>) attributes {dimension_semantics = [#tpu.dimension_semantics<parallel>], iteration_bounds = array<i64: 8>, scalar_prefetch = 0 : i64, scratch_operands = 0 : i64, tpu.core_type = #tpu.core_type<tc>, window_params = [{transform_indices = @transform_0, window_bounds = array<i64: 1, 4, 32>}, {pipeline_mode = #tpu.pipeline_mode<synchronous>, transform_indices = @transform_1, window_bounds = array<i64: 1, 32>}, {pipeline_mode = #tpu.pipeline_mode<synchronous>, transform_indices = @transform_2, window_bounds = array<i64: 1, 32>}, {pipeline_mode = #tpu.pipeline_mode<synchronous>, transform_indices = @transform_3, window_bounds = array<i64: 4, 32, 8>}, {pipeline_mode = #tpu.pipeline_mode<synchronous>, transform_indices = @transform_4, window_bounds = array<i64: 4, 1, 8>}, {pipeline_mode = #tpu.pipeline_mode<synchronous>, transform_indices = @transform_5, window_bounds = array<i64: 4, 32, 8>}, {pipeline_mode = #tpu.pipeline_mode<synchronous>, transform_indices = @transform_6, window_bounds = array<i64: 4, 1, 8>}, {pipeline_mode = #tpu.pipeline_mode<synchronous>, transform_indices = @transform_7, window_bounds = array<i64: 4, 32, 8>}, {pipeline_mode = #tpu.pipeline_mode<synchronous>, transform_indices = @transform_8, window_bounds = array<i64: 4, 1, 8>}, {pipeline_mode = #tpu.pipeline_mode<synchronous>, transform_indices = @transform_9, window_bounds = array<i64: 4, 8, 32>}, {pipeline_mode = #tpu.pipeline_mode<synchronous>, transform_indices = @transform_10, window_bounds = array<i64: 1, 32>}, {pipeline_mode = #tpu.pipeline_mode<synchronous>, transform_indices = @transform_11, window_bounds = array<i64: 32, 32>}, {pipeline_mode = #tpu.pipeline_mode<synchronous>, transform_indices = @transform_12, window_bounds = array<i64: 1, 32>}, {transform_indices = @transform_13, window_bounds = array<i64: 1, 4, 32>}]} {
    %c0 = arith.constant 0 : index
    %c0_0 = arith.constant 0 : index
    %c0_1 = arith.constant 0 : index
    %0 = vector.load %arg1[%c0, %c0_0, %c0_1] : memref<1x4x32xf32, #tpu.memory_space<vmem>>, vector<1x4x32xf32>
    %1 = vector.shape_cast %0 : vector<1x4x32xf32> to vector<4x32xf32>
    %c0_2 = arith.constant 0 : index
    %c0_3 = arith.constant 0 : index
    %2 = vector.load %arg2[%c0_2, %c0_3] : memref<1x32xf32, #tpu.memory_space<vmem>>, vector<1x32xf32>
    %c0_4 = arith.constant 0 : index
    %c0_5 = arith.constant 0 : index
    %3 = vector.load %arg3[%c0_4, %c0_5] : memref<1x32xf32, #tpu.memory_space<vmem>>, vector<1x32xf32>
    %cst = arith.constant dense<0.000000e+00> : vector<4xf32>
    %4 = vector.multi_reduction <add>, %1, %cst [1] : vector<4x32xf32> to vector<4xf32>
    %5 = vector.shape_cast %4 : vector<4xf32> to vector<4x1xf32>
    %cst_6 = arith.constant 3.200000e+01 : f32
    %6 = vector.broadcast %cst_6 : f32 to vector<4x1xf32>
    %7 = arith.divf %5, %6 : vector<4x1xf32>
    %8 = vector.broadcast %7 : vector<4x1xf32> to vector<4x32xf32>
    %9 = arith.subf %1, %8 : vector<4x32xf32>
    %10 = arith.mulf %9, %9 : vector<4x32xf32>
    %cst_7 = arith.constant dense<0.000000e+00> : vector<4xf32>
    %11 = vector.multi_reduction <add>, %10, %cst_7 [1] : vector<4x32xf32> to vector<4xf32>
    %12 = vector.shape_cast %11 : vector<4xf32> to vector<4x1xf32>
    %cst_8 = arith.constant 3.200000e+01 : f32
    %13 = vector.broadcast %cst_8 : f32 to vector<4x1xf32>
    %14 = arith.divf %12, %13 : vector<4x1xf32>
    %15 = vector.broadcast %7 : vector<4x1xf32> to vector<4x32xf32>
    %16 = arith.subf %1, %15 : vector<4x32xf32>
    %cst_9 = arith.constant 9.99999974E-6 : f32
    %17 = vector.broadcast %cst_9 : f32 to vector<4x1xf32>
    %18 = arith.addf %14, %17 : vector<4x1xf32>
    %19 = math.rsqrt %18 : vector<4x1xf32>
    %20 = vector.broadcast %19 : vector<4x1xf32> to vector<4x32xf32>
    %21 = arith.mulf %16, %20 : vector<4x32xf32>
    %22 = vector.broadcast %2 : vector<1x32xf32> to vector<4x32xf32>
    %23 = arith.mulf %21, %22 : vector<4x32xf32>
    %24 = vector.broadcast %3 : vector<1x32xf32> to vector<4x32xf32>
    %25 = arith.addf %23, %24 : vector<4x32xf32>
    %26 = arith.truncf %25 : vector<4x32xf32> to vector<4x32xbf16>
    %c0_10 = arith.constant 0 : index
    %c0_11 = arith.constant 0 : index
    %c0_12 = arith.constant 0 : index
    %27 = vector.load %arg4[%c0_10, %c0_11, %c0_12] : memref<4x32x8xf32, #tpu.memory_space<vmem>>, vector<1x32x8xf32>
    %28 = vector.shape_cast %27 : vector<1x32x8xf32> to vector<32x8xf32>
    %29 = arith.truncf %28 : vector<32x8xf32> to vector<32x8xbf16>
    %cst_13 = arith.constant dense<0.000000e+00> : vector<4x8xf32>
    %30 = tpu.matmul %26, %29, %cst_13 {dimension_numbers = #tpu.dot_dimension_numbers<[1], [0], [0], [1], [0, 0, 1, 1], [], []>} : vector<4x32xbf16>, vector<32x8xbf16>, vector<4x8xf32> -> vector<4x8xf32>
    %c0_14 = arith.constant 0 : index
    %c0_15 = arith.constant 0 : index
    %c0_16 = arith.constant 0 : index
    %31 = vector.load %arg5[%c0_14, %c0_15, %c0_16] : memref<4x1x8xf32, #tpu.memory_space<vmem>>, vector<1x1x8xf32>
    %32 = vector.shape_cast %31 : vector<1x1x8xf32> to vector<1x8xf32>
    %33 = vector.broadcast %32 : vector<1x8xf32> to vector<4x8xf32>
    %34 = arith.addf %30, %33 : vector<4x8xf32>
    %cst_17 = arith.constant 0.353553385 : f32
    %35 = vector.broadcast %cst_17 : f32 to vector<4x8xf32>
    %36 = arith.mulf %34, %35 : vector<4x8xf32>
    %c0_18 = arith.constant 0 : index
    %c0_19 = arith.constant 0 : index
    %c0_20 = arith.constant 0 : index
    %37 = vector.load %arg6[%c0_18, %c0_19, %c0_20] : memref<4x32x8xf32, #tpu.memory_space<vmem>>, vector<1x32x8xf32>
    %38 = vector.shape_cast %37 : vector<1x32x8xf32> to vector<32x8xf32>
    %39 = arith.truncf %38 : vector<32x8xf32> to vector<32x8xbf16>
    %cst_21 = arith.constant dense<0.000000e+00> : vector<4x8xf32>
    %40 = tpu.matmul %26, %39, %cst_21 {dimension_numbers = #tpu.dot_dimension_numbers<[1], [0], [0], [1], [0, 0, 1, 1], [], []>} : vector<4x32xbf16>, vector<32x8xbf16>, vector<4x8xf32> -> vector<4x8xf32>
    %c0_22 = arith.constant 0 : index
    %c0_23 = arith.constant 0 : index
    %c0_24 = arith.constant 0 : index
    %41 = vector.load %arg7[%c0_22, %c0_23, %c0_24] : memref<4x1x8xf32, #tpu.memory_space<vmem>>, vector<1x1x8xf32>
    %42 = vector.shape_cast %41 : vector<1x1x8xf32> to vector<1x8xf32>
    %43 = vector.broadcast %42 : vector<1x8xf32> to vector<4x8xf32>
    %44 = arith.addf %40, %43 : vector<4x8xf32>
    %c0_25 = arith.constant 0 : index
    %c0_26 = arith.constant 0 : index
    %c0_27 = arith.constant 0 : index
    %45 = vector.load %arg8[%c0_25, %c0_26, %c0_27] : memref<4x32x8xf32, #tpu.memory_space<vmem>>, vector<1x32x8xf32>
    %46 = vector.shape_cast %45 : vector<1x32x8xf32> to vector<32x8xf32>
    %47 = arith.truncf %46 : vector<32x8xf32> to vector<32x8xbf16>
    %cst_28 = arith.constant dense<0.000000e+00> : vector<4x8xf32>
    %48 = tpu.matmul %26, %47, %cst_28 {dimension_numbers = #tpu.dot_dimension_numbers<[1], [0], [0], [1], [0, 0, 1, 1], [], []>} : vector<4x32xbf16>, vector<32x8xbf16>, vector<4x8xf32> -> vector<4x8xf32>
    %c0_29 = arith.constant 0 : index
    %c0_30 = arith.constant 0 : index
    %c0_31 = arith.constant 0 : index
    %49 = vector.load %arg9[%c0_29, %c0_30, %c0_31] : memref<4x1x8xf32, #tpu.memory_space<vmem>>, vector<1x1x8xf32>
    %50 = vector.shape_cast %49 : vector<1x1x8xf32> to vector<1x8xf32>
    %51 = vector.broadcast %50 : vector<1x8xf32> to vector<4x8xf32>
    %52 = arith.addf %48, %51 : vector<4x8xf32>
    %53 = arith.truncf %36 : vector<4x8xf32> to vector<4x8xbf16>
    %54 = arith.truncf %44 : vector<4x8xf32> to vector<4x8xbf16>
    %cst_32 = arith.constant dense<0.000000e+00> : vector<4x4xf32>
    %55 = tpu.matmul %53, %54, %cst_32 {dimension_numbers = #tpu.dot_dimension_numbers<[1], [1], [0], [0], [0, 0, 1, 0], [], []>} : vector<4x8xbf16>, vector<4x8xbf16>, vector<4x4xf32> -> vector<4x4xf32>
    %cst_33 = arith.constant dense<0xFF800000> : vector<4xf32>
    %56 = vector.multi_reduction <maximumf>, %55, %cst_33 [1] : vector<4x4xf32> to vector<4xf32>
    %57 = vector.shape_cast %56 : vector<4xf32> to vector<4x1xf32>
    %58 = vector.broadcast %57 : vector<4x1xf32> to vector<4x4xf32>
    %59 = arith.subf %55, %58 : vector<4x4xf32>
    %60 = math.exp %59 : vector<4x4xf32>
    %cst_34 = arith.constant dense<0.000000e+00> : vector<4xf32>
    %61 = vector.multi_reduction <add>, %60, %cst_34 [1] : vector<4x4xf32> to vector<4xf32>
    %62 = vector.shape_cast %61 : vector<4xf32> to vector<4x1xf32>
    %63 = tpu.reciprocal %62 {approx = true} : vector<4x1xf32> -> vector<4x1xf32>
    %64 = vector.broadcast %63 : vector<4x1xf32> to vector<4x4xf32>
    %65 = arith.mulf %60, %64 : vector<4x4xf32>
    %66 = arith.truncf %65 : vector<4x4xf32> to vector<4x4xbf16>
    %67 = arith.truncf %52 : vector<4x8xf32> to vector<4x8xbf16>
    %cst_35 = arith.constant dense<0.000000e+00> : vector<4x8xf32>
    %68 = tpu.matmul %66, %67, %cst_35 {dimension_numbers = #tpu.dot_dimension_numbers<[1], [0], [0], [1], [0, 0, 1, 1], [], []>} : vector<4x4xbf16>, vector<4x8xbf16>, vector<4x8xf32> -> vector<4x8xf32>
    %69 = arith.truncf %68 : vector<4x8xf32> to vector<4x8xbf16>
    %c0_36 = arith.constant 0 : index
    %c0_37 = arith.constant 0 : index
    %c0_38 = arith.constant 0 : index
    %70 = vector.load %arg10[%c0_36, %c0_37, %c0_38] : memref<4x8x32xf32, #tpu.memory_space<vmem>>, vector<1x8x32xf32>
    %71 = vector.shape_cast %70 : vector<1x8x32xf32> to vector<8x32xf32>
    %72 = arith.truncf %71 : vector<8x32xf32> to vector<8x32xbf16>
    %cst_39 = arith.constant dense<0.000000e+00> : vector<4x32xf32>
    %73 = tpu.matmul %69, %72, %cst_39 {dimension_numbers = #tpu.dot_dimension_numbers<[1], [0], [0], [1], [0, 0, 1, 1], [], []>} : vector<4x8xbf16>, vector<8x32xbf16>, vector<4x32xf32> -> vector<4x32xf32>
    %c1 = arith.constant 1 : index
    %c0_40 = arith.constant 0 : index
    %c0_41 = arith.constant 0 : index
    %74 = vector.load %arg4[%c1, %c0_40, %c0_41] : memref<4x32x8xf32, #tpu.memory_space<vmem>>, vector<1x32x8xf32>
    %75 = vector.shape_cast %74 : vector<1x32x8xf32> to vector<32x8xf32>
    %76 = arith.truncf %75 : vector<32x8xf32> to vector<32x8xbf16>
    %cst_42 = arith.constant dense<0.000000e+00> : vector<4x8xf32>
    %77 = tpu.matmul %26, %76, %cst_42 {dimension_numbers = #tpu.dot_dimension_numbers<[1], [0], [0], [1], [0, 0, 1, 1], [], []>} : vector<4x32xbf16>, vector<32x8xbf16>, vector<4x8xf32> -> vector<4x8xf32>
    %c1_43 = arith.constant 1 : index
    %c0_44 = arith.constant 0 : index
    %c0_45 = arith.constant 0 : index
    %78 = vector.load %arg5[%c1_43, %c0_44, %c0_45] : memref<4x1x8xf32, #tpu.memory_space<vmem>>, vector<1x1x8xf32>
    %79 = vector.shape_cast %78 : vector<1x1x8xf32> to vector<1x8xf32>
    %80 = vector.broadcast %79 : vector<1x8xf32> to vector<4x8xf32>
    %81 = arith.addf %77, %80 : vector<4x8xf32>
    %cst_46 = arith.constant 0.353553385 : f32
    %82 = vector.broadcast %cst_46 : f32 to vector<4x8xf32>
    %83 = arith.mulf %81, %82 : vector<4x8xf32>
    %c1_47 = arith.constant 1 : index
    %c0_48 = arith.constant 0 : index
    %c0_49 = arith.constant 0 : index
    %84 = vector.load %arg6[%c1_47, %c0_48, %c0_49] : memref<4x32x8xf32, #tpu.memory_space<vmem>>, vector<1x32x8xf32>
    %85 = vector.shape_cast %84 : vector<1x32x8xf32> to vector<32x8xf32>
    %86 = arith.truncf %85 : vector<32x8xf32> to vector<32x8xbf16>
    %cst_50 = arith.constant dense<0.000000e+00> : vector<4x8xf32>
    %87 = tpu.matmul %26, %86, %cst_50 {dimension_numbers = #tpu.dot_dimension_numbers<[1], [0], [0], [1], [0, 0, 1, 1], [], []>} : vector<4x32xbf16>, vector<32x8xbf16>, vector<4x8xf32> -> vector<4x8xf32>
    %c1_51 = arith.constant 1 : index
    %c0_52 = arith.constant 0 : index
    %c0_53 = arith.constant 0 : index
    %88 = vector.load %arg7[%c1_51, %c0_52, %c0_53] : memref<4x1x8xf32, #tpu.memory_space<vmem>>, vector<1x1x8xf32>
    %89 = vector.shape_cast %88 : vector<1x1x8xf32> to vector<1x8xf32>
    %90 = vector.broadcast %89 : vector<1x8xf32> to vector<4x8xf32>
    %91 = arith.addf %87, %90 : vector<4x8xf32>
    %c1_54 = arith.constant 1 : index
    %c0_55 = arith.constant 0 : index
    %c0_56 = arith.constant 0 : index
    %92 = vector.load %arg8[%c1_54, %c0_55, %c0_56] : memref<4x32x8xf32, #tpu.memory_space<vmem>>, vector<1x32x8xf32>
    %93 = vector.shape_cast %92 : vector<1x32x8xf32> to vector<32x8xf32>
    %94 = arith.truncf %93 : vector<32x8xf32> to vector<32x8xbf16>
    %cst_57 = arith.constant dense<0.000000e+00> : vector<4x8xf32>
    %95 = tpu.matmul %26, %94, %cst_57 {dimension_numbers = #tpu.dot_dimension_numbers<[1], [0], [0], [1], [0, 0, 1, 1], [], []>} : vector<4x32xbf16>, vector<32x8xbf16>, vector<4x8xf32> -> vector<4x8xf32>
    %c1_58 = arith.constant 1 : index
    %c0_59 = arith.constant 0 : index
    %c0_60 = arith.constant 0 : index
    %96 = vector.load %arg9[%c1_58, %c0_59, %c0_60] : memref<4x1x8xf32, #tpu.memory_space<vmem>>, vector<1x1x8xf32>
    %97 = vector.shape_cast %96 : vector<1x1x8xf32> to vector<1x8xf32>
    %98 = vector.broadcast %97 : vector<1x8xf32> to vector<4x8xf32>
    %99 = arith.addf %95, %98 : vector<4x8xf32>
    %100 = arith.truncf %83 : vector<4x8xf32> to vector<4x8xbf16>
    %101 = arith.truncf %91 : vector<4x8xf32> to vector<4x8xbf16>
    %cst_61 = arith.constant dense<0.000000e+00> : vector<4x4xf32>
    %102 = tpu.matmul %100, %101, %cst_61 {dimension_numbers = #tpu.dot_dimension_numbers<[1], [1], [0], [0], [0, 0, 1, 0], [], []>} : vector<4x8xbf16>, vector<4x8xbf16>, vector<4x4xf32> -> vector<4x4xf32>
    %cst_62 = arith.constant dense<0xFF800000> : vector<4xf32>
    %103 = vector.multi_reduction <maximumf>, %102, %cst_62 [1] : vector<4x4xf32> to vector<4xf32>
    %104 = vector.shape_cast %103 : vector<4xf32> to vector<4x1xf32>
    %105 = vector.broadcast %104 : vector<4x1xf32> to vector<4x4xf32>
    %106 = arith.subf %102, %105 : vector<4x4xf32>
    %107 = math.exp %106 : vector<4x4xf32>
    %cst_63 = arith.constant dense<0.000000e+00> : vector<4xf32>
    %108 = vector.multi_reduction <add>, %107, %cst_63 [1] : vector<4x4xf32> to vector<4xf32>
    %109 = vector.shape_cast %108 : vector<4xf32> to vector<4x1xf32>
    %110 = tpu.reciprocal %109 {approx = true} : vector<4x1xf32> -> vector<4x1xf32>
    %111 = vector.broadcast %110 : vector<4x1xf32> to vector<4x4xf32>
    %112 = arith.mulf %107, %111 : vector<4x4xf32>
    %113 = arith.truncf %112 : vector<4x4xf32> to vector<4x4xbf16>
    %114 = arith.truncf %99 : vector<4x8xf32> to vector<4x8xbf16>
    %cst_64 = arith.constant dense<0.000000e+00> : vector<4x8xf32>
    %115 = tpu.matmul %113, %114, %cst_64 {dimension_numbers = #tpu.dot_dimension_numbers<[1], [0], [0], [1], [0, 0, 1, 1], [], []>} : vector<4x4xbf16>, vector<4x8xbf16>, vector<4x8xf32> -> vector<4x8xf32>
    %116 = arith.truncf %115 : vector<4x8xf32> to vector<4x8xbf16>
    %c1_65 = arith.constant 1 : index
    %c0_66 = arith.constant 0 : index
    %c0_67 = arith.constant 0 : index
    %117 = vector.load %arg10[%c1_65, %c0_66, %c0_67] : memref<4x8x32xf32, #tpu.memory_space<vmem>>, vector<1x8x32xf32>
    %118 = vector.shape_cast %117 : vector<1x8x32xf32> to vector<8x32xf32>
    %119 = arith.truncf %118 : vector<8x32xf32> to vector<8x32xbf16>
    %cst_68 = arith.constant dense<0.000000e+00> : vector<4x32xf32>
    %120 = tpu.matmul %116, %119, %cst_68 {dimension_numbers = #tpu.dot_dimension_numbers<[1], [0], [0], [1], [0, 0, 1, 1], [], []>} : vector<4x8xbf16>, vector<8x32xbf16>, vector<4x32xf32> -> vector<4x32xf32>
    %121 = arith.addf %73, %120 : vector<4x32xf32>
    %c2 = arith.constant 2 : index
    %c0_69 = arith.constant 0 : index
    %c0_70 = arith.constant 0 : index
    %122 = vector.load %arg4[%c2, %c0_69, %c0_70] : memref<4x32x8xf32, #tpu.memory_space<vmem>>, vector<1x32x8xf32>
    %123 = vector.shape_cast %122 : vector<1x32x8xf32> to vector<32x8xf32>
    %124 = arith.truncf %123 : vector<32x8xf32> to vector<32x8xbf16>
    %cst_71 = arith.constant dense<0.000000e+00> : vector<4x8xf32>
    %125 = tpu.matmul %26, %124, %cst_71 {dimension_numbers = #tpu.dot_dimension_numbers<[1], [0], [0], [1], [0, 0, 1, 1], [], []>} : vector<4x32xbf16>, vector<32x8xbf16>, vector<4x8xf32> -> vector<4x8xf32>
    %c2_72 = arith.constant 2 : index
    %c0_73 = arith.constant 0 : index
    %c0_74 = arith.constant 0 : index
    %126 = vector.load %arg5[%c2_72, %c0_73, %c0_74] : memref<4x1x8xf32, #tpu.memory_space<vmem>>, vector<1x1x8xf32>
    %127 = vector.shape_cast %126 : vector<1x1x8xf32> to vector<1x8xf32>
    %128 = vector.broadcast %127 : vector<1x8xf32> to vector<4x8xf32>
    %129 = arith.addf %125, %128 : vector<4x8xf32>
    %cst_75 = arith.constant 0.353553385 : f32
    %130 = vector.broadcast %cst_75 : f32 to vector<4x8xf32>
    %131 = arith.mulf %129, %130 : vector<4x8xf32>
    %c2_76 = arith.constant 2 : index
    %c0_77 = arith.constant 0 : index
    %c0_78 = arith.constant 0 : index
    %132 = vector.load %arg6[%c2_76, %c0_77, %c0_78] : memref<4x32x8xf32, #tpu.memory_space<vmem>>, vector<1x32x8xf32>
    %133 = vector.shape_cast %132 : vector<1x32x8xf32> to vector<32x8xf32>
    %134 = arith.truncf %133 : vector<32x8xf32> to vector<32x8xbf16>
    %cst_79 = arith.constant dense<0.000000e+00> : vector<4x8xf32>
    %135 = tpu.matmul %26, %134, %cst_79 {dimension_numbers = #tpu.dot_dimension_numbers<[1], [0], [0], [1], [0, 0, 1, 1], [], []>} : vector<4x32xbf16>, vector<32x8xbf16>, vector<4x8xf32> -> vector<4x8xf32>
    %c2_80 = arith.constant 2 : index
    %c0_81 = arith.constant 0 : index
    %c0_82 = arith.constant 0 : index
    %136 = vector.load %arg7[%c2_80, %c0_81, %c0_82] : memref<4x1x8xf32, #tpu.memory_space<vmem>>, vector<1x1x8xf32>
    %137 = vector.shape_cast %136 : vector<1x1x8xf32> to vector<1x8xf32>
    %138 = vector.broadcast %137 : vector<1x8xf32> to vector<4x8xf32>
    %139 = arith.addf %135, %138 : vector<4x8xf32>
    %c2_83 = arith.constant 2 : index
    %c0_84 = arith.constant 0 : index
    %c0_85 = arith.constant 0 : index
    %140 = vector.load %arg8[%c2_83, %c0_84, %c0_85] : memref<4x32x8xf32, #tpu.memory_space<vmem>>, vector<1x32x8xf32>
    %141 = vector.shape_cast %140 : vector<1x32x8xf32> to vector<32x8xf32>
    %142 = arith.truncf %141 : vector<32x8xf32> to vector<32x8xbf16>
    %cst_86 = arith.constant dense<0.000000e+00> : vector<4x8xf32>
    %143 = tpu.matmul %26, %142, %cst_86 {dimension_numbers = #tpu.dot_dimension_numbers<[1], [0], [0], [1], [0, 0, 1, 1], [], []>} : vector<4x32xbf16>, vector<32x8xbf16>, vector<4x8xf32> -> vector<4x8xf32>
    %c2_87 = arith.constant 2 : index
    %c0_88 = arith.constant 0 : index
    %c0_89 = arith.constant 0 : index
    %144 = vector.load %arg9[%c2_87, %c0_88, %c0_89] : memref<4x1x8xf32, #tpu.memory_space<vmem>>, vector<1x1x8xf32>
    %145 = vector.shape_cast %144 : vector<1x1x8xf32> to vector<1x8xf32>
    %146 = vector.broadcast %145 : vector<1x8xf32> to vector<4x8xf32>
    %147 = arith.addf %143, %146 : vector<4x8xf32>
    %148 = arith.truncf %131 : vector<4x8xf32> to vector<4x8xbf16>
    %149 = arith.truncf %139 : vector<4x8xf32> to vector<4x8xbf16>
    %cst_90 = arith.constant dense<0.000000e+00> : vector<4x4xf32>
    %150 = tpu.matmul %148, %149, %cst_90 {dimension_numbers = #tpu.dot_dimension_numbers<[1], [1], [0], [0], [0, 0, 1, 0], [], []>} : vector<4x8xbf16>, vector<4x8xbf16>, vector<4x4xf32> -> vector<4x4xf32>
    %cst_91 = arith.constant dense<0xFF800000> : vector<4xf32>
    %151 = vector.multi_reduction <maximumf>, %150, %cst_91 [1] : vector<4x4xf32> to vector<4xf32>
    %152 = vector.shape_cast %151 : vector<4xf32> to vector<4x1xf32>
    %153 = vector.broadcast %152 : vector<4x1xf32> to vector<4x4xf32>
    %154 = arith.subf %150, %153 : vector<4x4xf32>
    %155 = math.exp %154 : vector<4x4xf32>
    %cst_92 = arith.constant dense<0.000000e+00> : vector<4xf32>
    %156 = vector.multi_reduction <add>, %155, %cst_92 [1] : vector<4x4xf32> to vector<4xf32>
    %157 = vector.shape_cast %156 : vector<4xf32> to vector<4x1xf32>
    %158 = tpu.reciprocal %157 {approx = true} : vector<4x1xf32> -> vector<4x1xf32>
    %159 = vector.broadcast %158 : vector<4x1xf32> to vector<4x4xf32>
    %160 = arith.mulf %155, %159 : vector<4x4xf32>
    %161 = arith.truncf %160 : vector<4x4xf32> to vector<4x4xbf16>
    %162 = arith.truncf %147 : vector<4x8xf32> to vector<4x8xbf16>
    %cst_93 = arith.constant dense<0.000000e+00> : vector<4x8xf32>
    %163 = tpu.matmul %161, %162, %cst_93 {dimension_numbers = #tpu.dot_dimension_numbers<[1], [0], [0], [1], [0, 0, 1, 1], [], []>} : vector<4x4xbf16>, vector<4x8xbf16>, vector<4x8xf32> -> vector<4x8xf32>
    %164 = arith.truncf %163 : vector<4x8xf32> to vector<4x8xbf16>
    %c2_94 = arith.constant 2 : index
    %c0_95 = arith.constant 0 : index
    %c0_96 = arith.constant 0 : index
    %165 = vector.load %arg10[%c2_94, %c0_95, %c0_96] : memref<4x8x32xf32, #tpu.memory_space<vmem>>, vector<1x8x32xf32>
    %166 = vector.shape_cast %165 : vector<1x8x32xf32> to vector<8x32xf32>
    %167 = arith.truncf %166 : vector<8x32xf32> to vector<8x32xbf16>
    %cst_97 = arith.constant dense<0.000000e+00> : vector<4x32xf32>
    %168 = tpu.matmul %164, %167, %cst_97 {dimension_numbers = #tpu.dot_dimension_numbers<[1], [0], [0], [1], [0, 0, 1, 1], [], []>} : vector<4x8xbf16>, vector<8x32xbf16>, vector<4x32xf32> -> vector<4x32xf32>
    %169 = arith.addf %121, %168 : vector<4x32xf32>
    %c3 = arith.constant 3 : index
    %c0_98 = arith.constant 0 : index
    %c0_99 = arith.constant 0 : index
    %170 = vector.load %arg4[%c3, %c0_98, %c0_99] : memref<4x32x8xf32, #tpu.memory_space<vmem>>, vector<1x32x8xf32>
    %171 = vector.shape_cast %170 : vector<1x32x8xf32> to vector<32x8xf32>
    %172 = arith.truncf %171 : vector<32x8xf32> to vector<32x8xbf16>
    %cst_100 = arith.constant dense<0.000000e+00> : vector<4x8xf32>
    %173 = tpu.matmul %26, %172, %cst_100 {dimension_numbers = #tpu.dot_dimension_numbers<[1], [0], [0], [1], [0, 0, 1, 1], [], []>} : vector<4x32xbf16>, vector<32x8xbf16>, vector<4x8xf32> -> vector<4x8xf32>
    %c3_101 = arith.constant 3 : index
    %c0_102 = arith.constant 0 : index
    %c0_103 = arith.constant 0 : index
    %174 = vector.load %arg5[%c3_101, %c0_102, %c0_103] : memref<4x1x8xf32, #tpu.memory_space<vmem>>, vector<1x1x8xf32>
    %175 = vector.shape_cast %174 : vector<1x1x8xf32> to vector<1x8xf32>
    %176 = vector.broadcast %175 : vector<1x8xf32> to vector<4x8xf32>
    %177 = arith.addf %173, %176 : vector<4x8xf32>
    %cst_104 = arith.constant 0.353553385 : f32
    %178 = vector.broadcast %cst_104 : f32 to vector<4x8xf32>
    %179 = arith.mulf %177, %178 : vector<4x8xf32>
    %c3_105 = arith.constant 3 : index
    %c0_106 = arith.constant 0 : index
    %c0_107 = arith.constant 0 : index
    %180 = vector.load %arg6[%c3_105, %c0_106, %c0_107] : memref<4x32x8xf32, #tpu.memory_space<vmem>>, vector<1x32x8xf32>
    %181 = vector.shape_cast %180 : vector<1x32x8xf32> to vector<32x8xf32>
    %182 = arith.truncf %181 : vector<32x8xf32> to vector<32x8xbf16>
    %cst_108 = arith.constant dense<0.000000e+00> : vector<4x8xf32>
    %183 = tpu.matmul %26, %182, %cst_108 {dimension_numbers = #tpu.dot_dimension_numbers<[1], [0], [0], [1], [0, 0, 1, 1], [], []>} : vector<4x32xbf16>, vector<32x8xbf16>, vector<4x8xf32> -> vector<4x8xf32>
    %c3_109 = arith.constant 3 : index
    %c0_110 = arith.constant 0 : index
    %c0_111 = arith.constant 0 : index
    %184 = vector.load %arg7[%c3_109, %c0_110, %c0_111] : memref<4x1x8xf32, #tpu.memory_space<vmem>>, vector<1x1x8xf32>
    %185 = vector.shape_cast %184 : vector<1x1x8xf32> to vector<1x8xf32>
    %186 = vector.broadcast %185 : vector<1x8xf32> to vector<4x8xf32>
    %187 = arith.addf %183, %186 : vector<4x8xf32>
    %c3_112 = arith.constant 3 : index
    %c0_113 = arith.constant 0 : index
    %c0_114 = arith.constant 0 : index
    %188 = vector.load %arg8[%c3_112, %c0_113, %c0_114] : memref<4x32x8xf32, #tpu.memory_space<vmem>>, vector<1x32x8xf32>
    %189 = vector.shape_cast %188 : vector<1x32x8xf32> to vector<32x8xf32>
    %190 = arith.truncf %189 : vector<32x8xf32> to vector<32x8xbf16>
    %cst_115 = arith.constant dense<0.000000e+00> : vector<4x8xf32>
    %191 = tpu.matmul %26, %190, %cst_115 {dimension_numbers = #tpu.dot_dimension_numbers<[1], [0], [0], [1], [0, 0, 1, 1], [], []>} : vector<4x32xbf16>, vector<32x8xbf16>, vector<4x8xf32> -> vector<4x8xf32>
    %c3_116 = arith.constant 3 : index
    %c0_117 = arith.constant 0 : index
    %c0_118 = arith.constant 0 : index
    %192 = vector.load %arg9[%c3_116, %c0_117, %c0_118] : memref<4x1x8xf32, #tpu.memory_space<vmem>>, vector<1x1x8xf32>
    %193 = vector.shape_cast %192 : vector<1x1x8xf32> to vector<1x8xf32>
    %194 = vector.broadcast %193 : vector<1x8xf32> to vector<4x8xf32>
    %195 = arith.addf %191, %194 : vector<4x8xf32>
    %196 = arith.truncf %179 : vector<4x8xf32> to vector<4x8xbf16>
    %197 = arith.truncf %187 : vector<4x8xf32> to vector<4x8xbf16>
    %cst_119 = arith.constant dense<0.000000e+00> : vector<4x4xf32>
    %198 = tpu.matmul %196, %197, %cst_119 {dimension_numbers = #tpu.dot_dimension_numbers<[1], [1], [0], [0], [0, 0, 1, 0], [], []>} : vector<4x8xbf16>, vector<4x8xbf16>, vector<4x4xf32> -> vector<4x4xf32>
    %cst_120 = arith.constant dense<0xFF800000> : vector<4xf32>
    %199 = vector.multi_reduction <maximumf>, %198, %cst_120 [1] : vector<4x4xf32> to vector<4xf32>
    %200 = vector.shape_cast %199 : vector<4xf32> to vector<4x1xf32>
    %201 = vector.broadcast %200 : vector<4x1xf32> to vector<4x4xf32>
    %202 = arith.subf %198, %201 : vector<4x4xf32>
    %203 = math.exp %202 : vector<4x4xf32>
    %cst_121 = arith.constant dense<0.000000e+00> : vector<4xf32>
    %204 = vector.multi_reduction <add>, %203, %cst_121 [1] : vector<4x4xf32> to vector<4xf32>
    %205 = vector.shape_cast %204 : vector<4xf32> to vector<4x1xf32>
    %206 = tpu.reciprocal %205 {approx = true} : vector<4x1xf32> -> vector<4x1xf32>
    %207 = vector.broadcast %206 : vector<4x1xf32> to vector<4x4xf32>
    %208 = arith.mulf %203, %207 : vector<4x4xf32>
    %209 = arith.truncf %208 : vector<4x4xf32> to vector<4x4xbf16>
    %210 = arith.truncf %195 : vector<4x8xf32> to vector<4x8xbf16>
    %cst_122 = arith.constant dense<0.000000e+00> : vector<4x8xf32>
    %211 = tpu.matmul %209, %210, %cst_122 {dimension_numbers = #tpu.dot_dimension_numbers<[1], [0], [0], [1], [0, 0, 1, 1], [], []>} : vector<4x4xbf16>, vector<4x8xbf16>, vector<4x8xf32> -> vector<4x8xf32>
    %212 = arith.truncf %211 : vector<4x8xf32> to vector<4x8xbf16>
    %c3_123 = arith.constant 3 : index
    %c0_124 = arith.constant 0 : index
    %c0_125 = arith.constant 0 : index
    %213 = vector.load %arg10[%c3_123, %c0_124, %c0_125] : memref<4x8x32xf32, #tpu.memory_space<vmem>>, vector<1x8x32xf32>
    %214 = vector.shape_cast %213 : vector<1x8x32xf32> to vector<8x32xf32>
    %215 = arith.truncf %214 : vector<8x32xf32> to vector<8x32xbf16>
    %cst_126 = arith.constant dense<0.000000e+00> : vector<4x32xf32>
    %216 = tpu.matmul %212, %215, %cst_126 {dimension_numbers = #tpu.dot_dimension_numbers<[1], [0], [0], [1], [0, 0, 1, 1], [], []>} : vector<4x8xbf16>, vector<8x32xbf16>, vector<4x32xf32> -> vector<4x32xf32>
    %217 = arith.addf %169, %216 : vector<4x32xf32>
    %c0_127 = arith.constant 0 : index
    %c0_128 = arith.constant 0 : index
    %218 = vector.load %arg11[%c0_127, %c0_128] : memref<1x32xf32, #tpu.memory_space<vmem>>, vector<1x32xf32>
    %219 = vector.broadcast %218 : vector<1x32xf32> to vector<4x32xf32>
    %220 = arith.addf %217, %219 : vector<4x32xf32>
    %c0_129 = arith.constant 0 : index
    %c0_130 = arith.constant 0 : index
    %221 = vector.load %arg12[%c0_129, %c0_130] : memref<32x32xf32, #tpu.memory_space<vmem>>, vector<32x32xf32>
    %c0_131 = arith.constant 0 : index
    %c0_132 = arith.constant 0 : index
    %222 = vector.load %arg13[%c0_131, %c0_132] : memref<1x32xf32, #tpu.memory_space<vmem>>, vector<1x32xf32>
    %223 = arith.truncf %220 : vector<4x32xf32> to vector<4x32xbf16>
    %224 = arith.truncf %221 : vector<32x32xf32> to vector<32x32xbf16>
    %cst_133 = arith.constant dense<0.000000e+00> : vector<4x32xf32>
    %225 = tpu.matmul %223, %224, %cst_133 {dimension_numbers = #tpu.dot_dimension_numbers<[1], [0], [0], [1], [0, 0, 1, 1], [], []>} : vector<4x32xbf16>, vector<32x32xbf16>, vector<4x32xf32> -> vector<4x32xf32>
    %226 = vector.broadcast %222 : vector<1x32xf32> to vector<4x32xf32>
    %227 = arith.addf %225, %226 : vector<4x32xf32>
    %228 = arith.addf %1, %227 : vector<4x32xf32>
    %c0_134 = arith.constant 0 : index
    %c0_135 = arith.constant 0 : index
    %c0_136 = arith.constant 0 : index
    %229 = vector.load %arg14[%c0_134, %c0_135, %c0_136] : memref<1x4x32xf32, #tpu.memory_space<vmem>>, vector<1x4x32xf32>
    %230 = vector.shape_cast %229 : vector<1x4x32xf32> to vector<4x32xf32>
    %231 = vector.shape_cast %228 : vector<4x32xf32> to vector<1x4x32xf32>
    tpu.vector_store %arg14[%c0_134, %c0_135, %c0_136], %231 {strides = array<i32>} : memref<1x4x32xf32, #tpu.memory_space<vmem>>, vector<1x4x32xf32>,
    return
  }
  func.func @transform_0(%arg0: i32) -> (i32, i32, i32) {
    %c0_i32 = arith.constant 0 : i32
    %c0_i32_0 = arith.constant 0 : i32
    %c0_i32_1 = arith.constant 0 : i32
    return %arg0, %c0_i32, %c0_i32_0 : i32, i32, i32
  }
  func.func @transform_1(%arg0: i32) -> (i32, i32) {
    %c0_i32 = arith.constant 0 : i32
    %c0_i32_0 = arith.constant 0 : i32
    %c0_i32_1 = arith.constant 0 : i32
    return %c0_i32, %c0_i32_0 : i32, i32
  }
  func.func @transform_2(%arg0: i32) -> (i32, i32) {
    %c0_i32 = arith.constant 0 : i32
    %c0_i32_0 = arith.constant 0 : i32
    %c0_i32_1 = arith.constant 0 : i32
    return %c0_i32, %c0_i32_0 : i32, i32
  }
  func.func @transform_3(%arg0: i32) -> (i32, i32, i32) {
    %c0_i32 = arith.constant 0 : i32
    %c0_i32_0 = arith.constant 0 : i32
    %c0_i32_1 = arith.constant 0 : i32
    %c0_i32_2 = arith.constant 0 : i32
    return %c0_i32, %c0_i32_0, %c0_i32_1 : i32, i32, i32
  }
  func.func @transform_4(%arg0: i32) -> (i32, i32, i32) {
    %c0_i32 = arith.constant 0 : i32
    %c0_i32_0 = arith.constant 0 : i32
    %c0_i32_1 = arith.constant 0 : i32
    %c0_i32_2 = arith.constant 0 : i32
    return %c0_i32, %c0_i32_0, %c0_i32_1 : i32, i32, i32
  }
  func.func @transform_5(%arg0: i32) -> (i32, i32, i32) {
    %c0_i32 = arith.constant 0 : i32
    %c0_i32_0 = arith.constant 0 : i32
    %c0_i32_1 = arith.constant 0 : i32
    %c0_i32_2 = arith.constant 0 : i32
    return %c0_i32, %c0_i32_0, %c0_i32_1 : i32, i32, i32
  }
  func.func @transform_6(%arg0: i32) -> (i32, i32, i32) {
    %c0_i32 = arith.constant 0 : i32
    %c0_i32_0 = arith.constant 0 : i32
    %c0_i32_1 = arith.constant 0 : i32
    %c0_i32_2 = arith.constant 0 : i32
    return %c0_i32, %c0_i32_0, %c0_i32_1 : i32, i32, i32
  }
  func.func @transform_7(%arg0: i32) -> (i32, i32, i32) {
    %c0_i32 = arith.constant 0 : i32
    %c0_i32_0 = arith.constant 0 : i32
    %c0_i32_1 = arith.constant 0 : i32
    %c0_i32_2 = arith.constant 0 : i32
    return %c0_i32, %c0_i32_0, %c0_i32_1 : i32, i32, i32
  }
  func.func @transform_8(%arg0: i32) -> (i32, i32, i32) {
    %c0_i32 = arith.constant 0 : i32
    %c0_i32_0 = arith.constant 0 : i32
    %c0_i32_1 = arith.constant 0 : i32
    %c0_i32_2 = arith.constant 0 : i32
    return %c0_i32, %c0_i32_0, %c0_i32_1 : i32, i32, i32
  }
  func.func @transform_9(%arg0: i32) -> (i32, i32, i32) {
    %c0_i32 = arith.constant 0 : i32
    %c0_i32_0 = arith.constant 0 : i32
    %c0_i32_1 = arith.constant 0 : i32
    %c0_i32_2 = arith.constant 0 : i32
    return %c0_i32, %c0_i32_0, %c0_i32_1 : i32, i32, i32
  }
  func.func @transform_10(%arg0: i32) -> (i32, i32) {
    %c0_i32 = arith.constant 0 : i32
    %c0_i32_0 = arith.constant 0 : i32
    %c0_i32_1 = arith.constant 0 : i32
    return %c0_i32, %c0_i32_0 : i32, i32
  }
  func.func @transform_11(%arg0: i32) -> (i32, i32) {
    %c0_i32 = arith.constant 0 : i32
    %c0_i32_0 = arith.constant 0 : i32
    %c0_i32_1 = arith.constant 0 : i32
    return %c0_i32, %c0_i32_0 : i32, i32
  }
  func.func @transform_12(%arg0: i32) -> (i32, i32) {
    %c0_i32 = arith.constant 0 : i32
    %c0_i32_0 = arith.constant 0 : i32
    %c0_i32_1 = arith.constant 0 : i32
    return %c0_i32, %c0_i32_0 : i32, i32
  }
  func.func @transform_13(%arg0: i32) -> (i32, i32, i32) {
    %c0_i32 = arith.constant 0 : i32
    %c0_i32_0 = arith.constant 0 : i32
    %c0_i32_1 = arith.constant 0 : i32
    return %arg0, %c0_i32, %c0_i32_0 : i32, i32, i32
  }
}

module attributes {stable_mosaic.version = 11 : i64} {
  func.func @_bt_S_attn_kernel(%arg0: i32, %arg1: memref<1x9x32xf32, #tpu.memory_space<vmem>>, %arg2: memref<1x32xf32, #tpu.memory_space<vmem>>, %arg3: memref<1x32xf32, #tpu.memory_space<vmem>>, %arg4: memref<4x32x8xf32, #tpu.memory_space<vmem>>, %arg5: memref<4x1x8xf32, #tpu.memory_space<vmem>>, %arg6: memref<4x32x8xf32, #tpu.memory_space<vmem>>, %arg7: memref<4x1x8xf32, #tpu.memory_space<vmem>>, %arg8: memref<4x32x8xf32, #tpu.memory_space<vmem>>, %arg9: memref<4x1x8xf32, #tpu.memory_space<vmem>>, %arg10: memref<4x8x32xf32, #tpu.memory_space<vmem>>, %arg11: memref<1x32xf32, #tpu.memory_space<vmem>>, %arg12: memref<1x9x32xf32, #tpu.memory_space<vmem>>) attributes {dimension_semantics = [#tpu.dimension_semantics<parallel>], iteration_bounds = array<i64: 4>, scalar_prefetch = 0 : i64, scratch_operands = 0 : i64, tpu.core_type = #tpu.core_type<tc>, window_params = [{transform_indices = @transform_0, window_bounds = array<i64: 1, 9, 32>}, {pipeline_mode = #tpu.pipeline_mode<synchronous>, transform_indices = @transform_1, window_bounds = array<i64: 1, 32>}, {pipeline_mode = #tpu.pipeline_mode<synchronous>, transform_indices = @transform_2, window_bounds = array<i64: 1, 32>}, {pipeline_mode = #tpu.pipeline_mode<synchronous>, transform_indices = @transform_3, window_bounds = array<i64: 4, 32, 8>}, {pipeline_mode = #tpu.pipeline_mode<synchronous>, transform_indices = @transform_4, window_bounds = array<i64: 4, 1, 8>}, {pipeline_mode = #tpu.pipeline_mode<synchronous>, transform_indices = @transform_5, window_bounds = array<i64: 4, 32, 8>}, {pipeline_mode = #tpu.pipeline_mode<synchronous>, transform_indices = @transform_6, window_bounds = array<i64: 4, 1, 8>}, {pipeline_mode = #tpu.pipeline_mode<synchronous>, transform_indices = @transform_7, window_bounds = array<i64: 4, 32, 8>}, {pipeline_mode = #tpu.pipeline_mode<synchronous>, transform_indices = @transform_8, window_bounds = array<i64: 4, 1, 8>}, {pipeline_mode = #tpu.pipeline_mode<synchronous>, transform_indices = @transform_9, window_bounds = array<i64: 4, 8, 32>}, {pipeline_mode = #tpu.pipeline_mode<synchronous>, transform_indices = @transform_10, window_bounds = array<i64: 1, 32>}, {transform_indices = @transform_11, window_bounds = array<i64: 1, 9, 32>}]} {
    %c0 = arith.constant 0 : index
    %c0_0 = arith.constant 0 : index
    %c0_1 = arith.constant 0 : index
    %0 = vector.load %arg1[%c0, %c0_0, %c0_1] : memref<1x9x32xf32, #tpu.memory_space<vmem>>, vector<1x9x32xf32>
    %1 = vector.shape_cast %0 : vector<1x9x32xf32> to vector<9x32xf32>
    %c0_2 = arith.constant 0 : index
    %c0_3 = arith.constant 0 : index
    %2 = vector.load %arg2[%c0_2, %c0_3] : memref<1x32xf32, #tpu.memory_space<vmem>>, vector<1x32xf32>
    %c0_4 = arith.constant 0 : index
    %c0_5 = arith.constant 0 : index
    %3 = vector.load %arg3[%c0_4, %c0_5] : memref<1x32xf32, #tpu.memory_space<vmem>>, vector<1x32xf32>
    %cst = arith.constant dense<0.000000e+00> : vector<9xf32>
    %4 = vector.multi_reduction <add>, %1, %cst [1] : vector<9x32xf32> to vector<9xf32>
    %5 = vector.shape_cast %4 : vector<9xf32> to vector<9x1xf32>
    %cst_6 = arith.constant 3.200000e+01 : f32
    %6 = vector.broadcast %cst_6 : f32 to vector<9x1xf32>
    %7 = arith.divf %5, %6 : vector<9x1xf32>
    %8 = vector.broadcast %7 : vector<9x1xf32> to vector<9x32xf32>
    %9 = arith.subf %1, %8 : vector<9x32xf32>
    %10 = arith.mulf %9, %9 : vector<9x32xf32>
    %cst_7 = arith.constant dense<0.000000e+00> : vector<9xf32>
    %11 = vector.multi_reduction <add>, %10, %cst_7 [1] : vector<9x32xf32> to vector<9xf32>
    %12 = vector.shape_cast %11 : vector<9xf32> to vector<9x1xf32>
    %cst_8 = arith.constant 3.200000e+01 : f32
    %13 = vector.broadcast %cst_8 : f32 to vector<9x1xf32>
    %14 = arith.divf %12, %13 : vector<9x1xf32>
    %15 = vector.broadcast %7 : vector<9x1xf32> to vector<9x32xf32>
    %16 = arith.subf %1, %15 : vector<9x32xf32>
    %cst_9 = arith.constant 9.99999974E-6 : f32
    %17 = vector.broadcast %cst_9 : f32 to vector<9x1xf32>
    %18 = arith.addf %14, %17 : vector<9x1xf32>
    %19 = math.rsqrt %18 : vector<9x1xf32>
    %20 = vector.broadcast %19 : vector<9x1xf32> to vector<9x32xf32>
    %21 = arith.mulf %16, %20 : vector<9x32xf32>
    %22 = vector.broadcast %2 : vector<1x32xf32> to vector<9x32xf32>
    %23 = arith.mulf %21, %22 : vector<9x32xf32>
    %24 = vector.broadcast %3 : vector<1x32xf32> to vector<9x32xf32>
    %25 = arith.addf %23, %24 : vector<9x32xf32>
    %26 = arith.truncf %25 : vector<9x32xf32> to vector<9x32xbf16>
    %c0_10 = arith.constant 0 : index
    %c0_11 = arith.constant 0 : index
    %c0_12 = arith.constant 0 : index
    %27 = vector.load %arg4[%c0_10, %c0_11, %c0_12] : memref<4x32x8xf32, #tpu.memory_space<vmem>>, vector<1x32x8xf32>
    %28 = vector.shape_cast %27 : vector<1x32x8xf32> to vector<32x8xf32>
    %29 = arith.truncf %28 : vector<32x8xf32> to vector<32x8xbf16>
    %cst_13 = arith.constant dense<0.000000e+00> : vector<9x8xf32>
    %30 = tpu.matmul %26, %29, %cst_13 {dimension_numbers = #tpu.dot_dimension_numbers<[1], [0], [0], [1], [0, 0, 1, 1], [], []>} : vector<9x32xbf16>, vector<32x8xbf16>, vector<9x8xf32> -> vector<9x8xf32>
    %c0_14 = arith.constant 0 : index
    %c0_15 = arith.constant 0 : index
    %c0_16 = arith.constant 0 : index
    %31 = vector.load %arg5[%c0_14, %c0_15, %c0_16] : memref<4x1x8xf32, #tpu.memory_space<vmem>>, vector<1x1x8xf32>
    %32 = vector.shape_cast %31 : vector<1x1x8xf32> to vector<1x8xf32>
    %33 = vector.broadcast %32 : vector<1x8xf32> to vector<9x8xf32>
    %34 = arith.addf %30, %33 : vector<9x8xf32>
    %cst_17 = arith.constant 0.353553385 : f32
    %35 = vector.broadcast %cst_17 : f32 to vector<9x8xf32>
    %36 = arith.mulf %34, %35 : vector<9x8xf32>
    %c0_18 = arith.constant 0 : index
    %c0_19 = arith.constant 0 : index
    %c0_20 = arith.constant 0 : index
    %37 = vector.load %arg6[%c0_18, %c0_19, %c0_20] : memref<4x32x8xf32, #tpu.memory_space<vmem>>, vector<1x32x8xf32>
    %38 = vector.shape_cast %37 : vector<1x32x8xf32> to vector<32x8xf32>
    %39 = arith.truncf %38 : vector<32x8xf32> to vector<32x8xbf16>
    %cst_21 = arith.constant dense<0.000000e+00> : vector<9x8xf32>
    %40 = tpu.matmul %26, %39, %cst_21 {dimension_numbers = #tpu.dot_dimension_numbers<[1], [0], [0], [1], [0, 0, 1, 1], [], []>} : vector<9x32xbf16>, vector<32x8xbf16>, vector<9x8xf32> -> vector<9x8xf32>
    %c0_22 = arith.constant 0 : index
    %c0_23 = arith.constant 0 : index
    %c0_24 = arith.constant 0 : index
    %41 = vector.load %arg7[%c0_22, %c0_23, %c0_24] : memref<4x1x8xf32, #tpu.memory_space<vmem>>, vector<1x1x8xf32>
    %42 = vector.shape_cast %41 : vector<1x1x8xf32> to vector<1x8xf32>
    %43 = vector.broadcast %42 : vector<1x8xf32> to vector<9x8xf32>
    %44 = arith.addf %40, %43 : vector<9x8xf32>
    %c0_25 = arith.constant 0 : index
    %c0_26 = arith.constant 0 : index
    %c0_27 = arith.constant 0 : index
    %45 = vector.load %arg8[%c0_25, %c0_26, %c0_27] : memref<4x32x8xf32, #tpu.memory_space<vmem>>, vector<1x32x8xf32>
    %46 = vector.shape_cast %45 : vector<1x32x8xf32> to vector<32x8xf32>
    %47 = arith.truncf %46 : vector<32x8xf32> to vector<32x8xbf16>
    %cst_28 = arith.constant dense<0.000000e+00> : vector<9x8xf32>
    %48 = tpu.matmul %26, %47, %cst_28 {dimension_numbers = #tpu.dot_dimension_numbers<[1], [0], [0], [1], [0, 0, 1, 1], [], []>} : vector<9x32xbf16>, vector<32x8xbf16>, vector<9x8xf32> -> vector<9x8xf32>
    %c0_29 = arith.constant 0 : index
    %c0_30 = arith.constant 0 : index
    %c0_31 = arith.constant 0 : index
    %49 = vector.load %arg9[%c0_29, %c0_30, %c0_31] : memref<4x1x8xf32, #tpu.memory_space<vmem>>, vector<1x1x8xf32>
    %50 = vector.shape_cast %49 : vector<1x1x8xf32> to vector<1x8xf32>
    %51 = vector.broadcast %50 : vector<1x8xf32> to vector<9x8xf32>
    %52 = arith.addf %48, %51 : vector<9x8xf32>
    %53 = arith.truncf %36 : vector<9x8xf32> to vector<9x8xbf16>
    %54 = arith.truncf %44 : vector<9x8xf32> to vector<9x8xbf16>
    %cst_32 = arith.constant dense<0.000000e+00> : vector<9x9xf32>
    %55 = tpu.matmul %53, %54, %cst_32 {dimension_numbers = #tpu.dot_dimension_numbers<[1], [1], [0], [0], [0, 0, 1, 0], [], []>} : vector<9x8xbf16>, vector<9x8xbf16>, vector<9x9xf32> -> vector<9x9xf32>
    %cst_33 = arith.constant dense<0xFF800000> : vector<9xf32>
    %56 = vector.multi_reduction <maximumf>, %55, %cst_33 [1] : vector<9x9xf32> to vector<9xf32>
    %57 = vector.shape_cast %56 : vector<9xf32> to vector<9x1xf32>
    %58 = vector.broadcast %57 : vector<9x1xf32> to vector<9x9xf32>
    %59 = arith.subf %55, %58 : vector<9x9xf32>
    %60 = math.exp %59 : vector<9x9xf32>
    %cst_34 = arith.constant dense<0.000000e+00> : vector<9xf32>
    %61 = vector.multi_reduction <add>, %60, %cst_34 [1] : vector<9x9xf32> to vector<9xf32>
    %62 = vector.shape_cast %61 : vector<9xf32> to vector<9x1xf32>
    %63 = tpu.reciprocal %62 {approx = true} : vector<9x1xf32> -> vector<9x1xf32>
    %64 = vector.broadcast %63 : vector<9x1xf32> to vector<9x9xf32>
    %65 = arith.mulf %60, %64 : vector<9x9xf32>
    %66 = arith.truncf %65 : vector<9x9xf32> to vector<9x9xbf16>
    %67 = arith.truncf %52 : vector<9x8xf32> to vector<9x8xbf16>
    %cst_35 = arith.constant dense<0.000000e+00> : vector<9x8xf32>
    %68 = tpu.matmul %66, %67, %cst_35 {dimension_numbers = #tpu.dot_dimension_numbers<[1], [0], [0], [1], [0, 0, 1, 1], [], []>} : vector<9x9xbf16>, vector<9x8xbf16>, vector<9x8xf32> -> vector<9x8xf32>
    %69 = arith.truncf %68 : vector<9x8xf32> to vector<9x8xbf16>
    %c0_36 = arith.constant 0 : index
    %c0_37 = arith.constant 0 : index
    %c0_38 = arith.constant 0 : index
    %70 = vector.load %arg10[%c0_36, %c0_37, %c0_38] : memref<4x8x32xf32, #tpu.memory_space<vmem>>, vector<1x8x32xf32>
    %71 = vector.shape_cast %70 : vector<1x8x32xf32> to vector<8x32xf32>
    %72 = arith.truncf %71 : vector<8x32xf32> to vector<8x32xbf16>
    %cst_39 = arith.constant dense<0.000000e+00> : vector<9x32xf32>
    %73 = tpu.matmul %69, %72, %cst_39 {dimension_numbers = #tpu.dot_dimension_numbers<[1], [0], [0], [1], [0, 0, 1, 1], [], []>} : vector<9x8xbf16>, vector<8x32xbf16>, vector<9x32xf32> -> vector<9x32xf32>
    %c1 = arith.constant 1 : index
    %c0_40 = arith.constant 0 : index
    %c0_41 = arith.constant 0 : index
    %74 = vector.load %arg4[%c1, %c0_40, %c0_41] : memref<4x32x8xf32, #tpu.memory_space<vmem>>, vector<1x32x8xf32>
    %75 = vector.shape_cast %74 : vector<1x32x8xf32> to vector<32x8xf32>
    %76 = arith.truncf %75 : vector<32x8xf32> to vector<32x8xbf16>
    %cst_42 = arith.constant dense<0.000000e+00> : vector<9x8xf32>
    %77 = tpu.matmul %26, %76, %cst_42 {dimension_numbers = #tpu.dot_dimension_numbers<[1], [0], [0], [1], [0, 0, 1, 1], [], []>} : vector<9x32xbf16>, vector<32x8xbf16>, vector<9x8xf32> -> vector<9x8xf32>
    %c1_43 = arith.constant 1 : index
    %c0_44 = arith.constant 0 : index
    %c0_45 = arith.constant 0 : index
    %78 = vector.load %arg5[%c1_43, %c0_44, %c0_45] : memref<4x1x8xf32, #tpu.memory_space<vmem>>, vector<1x1x8xf32>
    %79 = vector.shape_cast %78 : vector<1x1x8xf32> to vector<1x8xf32>
    %80 = vector.broadcast %79 : vector<1x8xf32> to vector<9x8xf32>
    %81 = arith.addf %77, %80 : vector<9x8xf32>
    %cst_46 = arith.constant 0.353553385 : f32
    %82 = vector.broadcast %cst_46 : f32 to vector<9x8xf32>
    %83 = arith.mulf %81, %82 : vector<9x8xf32>
    %c1_47 = arith.constant 1 : index
    %c0_48 = arith.constant 0 : index
    %c0_49 = arith.constant 0 : index
    %84 = vector.load %arg6[%c1_47, %c0_48, %c0_49] : memref<4x32x8xf32, #tpu.memory_space<vmem>>, vector<1x32x8xf32>
    %85 = vector.shape_cast %84 : vector<1x32x8xf32> to vector<32x8xf32>
    %86 = arith.truncf %85 : vector<32x8xf32> to vector<32x8xbf16>
    %cst_50 = arith.constant dense<0.000000e+00> : vector<9x8xf32>
    %87 = tpu.matmul %26, %86, %cst_50 {dimension_numbers = #tpu.dot_dimension_numbers<[1], [0], [0], [1], [0, 0, 1, 1], [], []>} : vector<9x32xbf16>, vector<32x8xbf16>, vector<9x8xf32> -> vector<9x8xf32>
    %c1_51 = arith.constant 1 : index
    %c0_52 = arith.constant 0 : index
    %c0_53 = arith.constant 0 : index
    %88 = vector.load %arg7[%c1_51, %c0_52, %c0_53] : memref<4x1x8xf32, #tpu.memory_space<vmem>>, vector<1x1x8xf32>
    %89 = vector.shape_cast %88 : vector<1x1x8xf32> to vector<1x8xf32>
    %90 = vector.broadcast %89 : vector<1x8xf32> to vector<9x8xf32>
    %91 = arith.addf %87, %90 : vector<9x8xf32>
    %c1_54 = arith.constant 1 : index
    %c0_55 = arith.constant 0 : index
    %c0_56 = arith.constant 0 : index
    %92 = vector.load %arg8[%c1_54, %c0_55, %c0_56] : memref<4x32x8xf32, #tpu.memory_space<vmem>>, vector<1x32x8xf32>
    %93 = vector.shape_cast %92 : vector<1x32x8xf32> to vector<32x8xf32>
    %94 = arith.truncf %93 : vector<32x8xf32> to vector<32x8xbf16>
    %cst_57 = arith.constant dense<0.000000e+00> : vector<9x8xf32>
    %95 = tpu.matmul %26, %94, %cst_57 {dimension_numbers = #tpu.dot_dimension_numbers<[1], [0], [0], [1], [0, 0, 1, 1], [], []>} : vector<9x32xbf16>, vector<32x8xbf16>, vector<9x8xf32> -> vector<9x8xf32>
    %c1_58 = arith.constant 1 : index
    %c0_59 = arith.constant 0 : index
    %c0_60 = arith.constant 0 : index
    %96 = vector.load %arg9[%c1_58, %c0_59, %c0_60] : memref<4x1x8xf32, #tpu.memory_space<vmem>>, vector<1x1x8xf32>
    %97 = vector.shape_cast %96 : vector<1x1x8xf32> to vector<1x8xf32>
    %98 = vector.broadcast %97 : vector<1x8xf32> to vector<9x8xf32>
    %99 = arith.addf %95, %98 : vector<9x8xf32>
    %100 = arith.truncf %83 : vector<9x8xf32> to vector<9x8xbf16>
    %101 = arith.truncf %91 : vector<9x8xf32> to vector<9x8xbf16>
    %cst_61 = arith.constant dense<0.000000e+00> : vector<9x9xf32>
    %102 = tpu.matmul %100, %101, %cst_61 {dimension_numbers = #tpu.dot_dimension_numbers<[1], [1], [0], [0], [0, 0, 1, 0], [], []>} : vector<9x8xbf16>, vector<9x8xbf16>, vector<9x9xf32> -> vector<9x9xf32>
    %cst_62 = arith.constant dense<0xFF800000> : vector<9xf32>
    %103 = vector.multi_reduction <maximumf>, %102, %cst_62 [1] : vector<9x9xf32> to vector<9xf32>
    %104 = vector.shape_cast %103 : vector<9xf32> to vector<9x1xf32>
    %105 = vector.broadcast %104 : vector<9x1xf32> to vector<9x9xf32>
    %106 = arith.subf %102, %105 : vector<9x9xf32>
    %107 = math.exp %106 : vector<9x9xf32>
    %cst_63 = arith.constant dense<0.000000e+00> : vector<9xf32>
    %108 = vector.multi_reduction <add>, %107, %cst_63 [1] : vector<9x9xf32> to vector<9xf32>
    %109 = vector.shape_cast %108 : vector<9xf32> to vector<9x1xf32>
    %110 = tpu.reciprocal %109 {approx = true} : vector<9x1xf32> -> vector<9x1xf32>
    %111 = vector.broadcast %110 : vector<9x1xf32> to vector<9x9xf32>
    %112 = arith.mulf %107, %111 : vector<9x9xf32>
    %113 = arith.truncf %112 : vector<9x9xf32> to vector<9x9xbf16>
    %114 = arith.truncf %99 : vector<9x8xf32> to vector<9x8xbf16>
    %cst_64 = arith.constant dense<0.000000e+00> : vector<9x8xf32>
    %115 = tpu.matmul %113, %114, %cst_64 {dimension_numbers = #tpu.dot_dimension_numbers<[1], [0], [0], [1], [0, 0, 1, 1], [], []>} : vector<9x9xbf16>, vector<9x8xbf16>, vector<9x8xf32> -> vector<9x8xf32>
    %116 = arith.truncf %115 : vector<9x8xf32> to vector<9x8xbf16>
    %c1_65 = arith.constant 1 : index
    %c0_66 = arith.constant 0 : index
    %c0_67 = arith.constant 0 : index
    %117 = vector.load %arg10[%c1_65, %c0_66, %c0_67] : memref<4x8x32xf32, #tpu.memory_space<vmem>>, vector<1x8x32xf32>
    %118 = vector.shape_cast %117 : vector<1x8x32xf32> to vector<8x32xf32>
    %119 = arith.truncf %118 : vector<8x32xf32> to vector<8x32xbf16>
    %cst_68 = arith.constant dense<0.000000e+00> : vector<9x32xf32>
    %120 = tpu.matmul %116, %119, %cst_68 {dimension_numbers = #tpu.dot_dimension_numbers<[1], [0], [0], [1], [0, 0, 1, 1], [], []>} : vector<9x8xbf16>, vector<8x32xbf16>, vector<9x32xf32> -> vector<9x32xf32>
    %121 = arith.addf %73, %120 : vector<9x32xf32>
    %c2 = arith.constant 2 : index
    %c0_69 = arith.constant 0 : index
    %c0_70 = arith.constant 0 : index
    %122 = vector.load %arg4[%c2, %c0_69, %c0_70] : memref<4x32x8xf32, #tpu.memory_space<vmem>>, vector<1x32x8xf32>
    %123 = vector.shape_cast %122 : vector<1x32x8xf32> to vector<32x8xf32>
    %124 = arith.truncf %123 : vector<32x8xf32> to vector<32x8xbf16>
    %cst_71 = arith.constant dense<0.000000e+00> : vector<9x8xf32>
    %125 = tpu.matmul %26, %124, %cst_71 {dimension_numbers = #tpu.dot_dimension_numbers<[1], [0], [0], [1], [0, 0, 1, 1], [], []>} : vector<9x32xbf16>, vector<32x8xbf16>, vector<9x8xf32> -> vector<9x8xf32>
    %c2_72 = arith.constant 2 : index
    %c0_73 = arith.constant 0 : index
    %c0_74 = arith.constant 0 : index
    %126 = vector.load %arg5[%c2_72, %c0_73, %c0_74] : memref<4x1x8xf32, #tpu.memory_space<vmem>>, vector<1x1x8xf32>
    %127 = vector.shape_cast %126 : vector<1x1x8xf32> to vector<1x8xf32>
    %128 = vector.broadcast %127 : vector<1x8xf32> to vector<9x8xf32>
    %129 = arith.addf %125, %128 : vector<9x8xf32>
    %cst_75 = arith.constant 0.353553385 : f32
    %130 = vector.broadcast %cst_75 : f32 to vector<9x8xf32>
    %131 = arith.mulf %129, %130 : vector<9x8xf32>
    %c2_76 = arith.constant 2 : index
    %c0_77 = arith.constant 0 : index
    %c0_78 = arith.constant 0 : index
    %132 = vector.load %arg6[%c2_76, %c0_77, %c0_78] : memref<4x32x8xf32, #tpu.memory_space<vmem>>, vector<1x32x8xf32>
    %133 = vector.shape_cast %132 : vector<1x32x8xf32> to vector<32x8xf32>
    %134 = arith.truncf %133 : vector<32x8xf32> to vector<32x8xbf16>
    %cst_79 = arith.constant dense<0.000000e+00> : vector<9x8xf32>
    %135 = tpu.matmul %26, %134, %cst_79 {dimension_numbers = #tpu.dot_dimension_numbers<[1], [0], [0], [1], [0, 0, 1, 1], [], []>} : vector<9x32xbf16>, vector<32x8xbf16>, vector<9x8xf32> -> vector<9x8xf32>
    %c2_80 = arith.constant 2 : index
    %c0_81 = arith.constant 0 : index
    %c0_82 = arith.constant 0 : index
    %136 = vector.load %arg7[%c2_80, %c0_81, %c0_82] : memref<4x1x8xf32, #tpu.memory_space<vmem>>, vector<1x1x8xf32>
    %137 = vector.shape_cast %136 : vector<1x1x8xf32> to vector<1x8xf32>
    %138 = vector.broadcast %137 : vector<1x8xf32> to vector<9x8xf32>
    %139 = arith.addf %135, %138 : vector<9x8xf32>
    %c2_83 = arith.constant 2 : index
    %c0_84 = arith.constant 0 : index
    %c0_85 = arith.constant 0 : index
    %140 = vector.load %arg8[%c2_83, %c0_84, %c0_85] : memref<4x32x8xf32, #tpu.memory_space<vmem>>, vector<1x32x8xf32>
    %141 = vector.shape_cast %140 : vector<1x32x8xf32> to vector<32x8xf32>
    %142 = arith.truncf %141 : vector<32x8xf32> to vector<32x8xbf16>
    %cst_86 = arith.constant dense<0.000000e+00> : vector<9x8xf32>
    %143 = tpu.matmul %26, %142, %cst_86 {dimension_numbers = #tpu.dot_dimension_numbers<[1], [0], [0], [1], [0, 0, 1, 1], [], []>} : vector<9x32xbf16>, vector<32x8xbf16>, vector<9x8xf32> -> vector<9x8xf32>
    %c2_87 = arith.constant 2 : index
    %c0_88 = arith.constant 0 : index
    %c0_89 = arith.constant 0 : index
    %144 = vector.load %arg9[%c2_87, %c0_88, %c0_89] : memref<4x1x8xf32, #tpu.memory_space<vmem>>, vector<1x1x8xf32>
    %145 = vector.shape_cast %144 : vector<1x1x8xf32> to vector<1x8xf32>
    %146 = vector.broadcast %145 : vector<1x8xf32> to vector<9x8xf32>
    %147 = arith.addf %143, %146 : vector<9x8xf32>
    %148 = arith.truncf %131 : vector<9x8xf32> to vector<9x8xbf16>
    %149 = arith.truncf %139 : vector<9x8xf32> to vector<9x8xbf16>
    %cst_90 = arith.constant dense<0.000000e+00> : vector<9x9xf32>
    %150 = tpu.matmul %148, %149, %cst_90 {dimension_numbers = #tpu.dot_dimension_numbers<[1], [1], [0], [0], [0, 0, 1, 0], [], []>} : vector<9x8xbf16>, vector<9x8xbf16>, vector<9x9xf32> -> vector<9x9xf32>
    %cst_91 = arith.constant dense<0xFF800000> : vector<9xf32>
    %151 = vector.multi_reduction <maximumf>, %150, %cst_91 [1] : vector<9x9xf32> to vector<9xf32>
    %152 = vector.shape_cast %151 : vector<9xf32> to vector<9x1xf32>
    %153 = vector.broadcast %152 : vector<9x1xf32> to vector<9x9xf32>
    %154 = arith.subf %150, %153 : vector<9x9xf32>
    %155 = math.exp %154 : vector<9x9xf32>
    %cst_92 = arith.constant dense<0.000000e+00> : vector<9xf32>
    %156 = vector.multi_reduction <add>, %155, %cst_92 [1] : vector<9x9xf32> to vector<9xf32>
    %157 = vector.shape_cast %156 : vector<9xf32> to vector<9x1xf32>
    %158 = tpu.reciprocal %157 {approx = true} : vector<9x1xf32> -> vector<9x1xf32>
    %159 = vector.broadcast %158 : vector<9x1xf32> to vector<9x9xf32>
    %160 = arith.mulf %155, %159 : vector<9x9xf32>
    %161 = arith.truncf %160 : vector<9x9xf32> to vector<9x9xbf16>
    %162 = arith.truncf %147 : vector<9x8xf32> to vector<9x8xbf16>
    %cst_93 = arith.constant dense<0.000000e+00> : vector<9x8xf32>
    %163 = tpu.matmul %161, %162, %cst_93 {dimension_numbers = #tpu.dot_dimension_numbers<[1], [0], [0], [1], [0, 0, 1, 1], [], []>} : vector<9x9xbf16>, vector<9x8xbf16>, vector<9x8xf32> -> vector<9x8xf32>
    %164 = arith.truncf %163 : vector<9x8xf32> to vector<9x8xbf16>
    %c2_94 = arith.constant 2 : index
    %c0_95 = arith.constant 0 : index
    %c0_96 = arith.constant 0 : index
    %165 = vector.load %arg10[%c2_94, %c0_95, %c0_96] : memref<4x8x32xf32, #tpu.memory_space<vmem>>, vector<1x8x32xf32>
    %166 = vector.shape_cast %165 : vector<1x8x32xf32> to vector<8x32xf32>
    %167 = arith.truncf %166 : vector<8x32xf32> to vector<8x32xbf16>
    %cst_97 = arith.constant dense<0.000000e+00> : vector<9x32xf32>
    %168 = tpu.matmul %164, %167, %cst_97 {dimension_numbers = #tpu.dot_dimension_numbers<[1], [0], [0], [1], [0, 0, 1, 1], [], []>} : vector<9x8xbf16>, vector<8x32xbf16>, vector<9x32xf32> -> vector<9x32xf32>
    %169 = arith.addf %121, %168 : vector<9x32xf32>
    %c3 = arith.constant 3 : index
    %c0_98 = arith.constant 0 : index
    %c0_99 = arith.constant 0 : index
    %170 = vector.load %arg4[%c3, %c0_98, %c0_99] : memref<4x32x8xf32, #tpu.memory_space<vmem>>, vector<1x32x8xf32>
    %171 = vector.shape_cast %170 : vector<1x32x8xf32> to vector<32x8xf32>
    %172 = arith.truncf %171 : vector<32x8xf32> to vector<32x8xbf16>
    %cst_100 = arith.constant dense<0.000000e+00> : vector<9x8xf32>
    %173 = tpu.matmul %26, %172, %cst_100 {dimension_numbers = #tpu.dot_dimension_numbers<[1], [0], [0], [1], [0, 0, 1, 1], [], []>} : vector<9x32xbf16>, vector<32x8xbf16>, vector<9x8xf32> -> vector<9x8xf32>
    %c3_101 = arith.constant 3 : index
    %c0_102 = arith.constant 0 : index
    %c0_103 = arith.constant 0 : index
    %174 = vector.load %arg5[%c3_101, %c0_102, %c0_103] : memref<4x1x8xf32, #tpu.memory_space<vmem>>, vector<1x1x8xf32>
    %175 = vector.shape_cast %174 : vector<1x1x8xf32> to vector<1x8xf32>
    %176 = vector.broadcast %175 : vector<1x8xf32> to vector<9x8xf32>
    %177 = arith.addf %173, %176 : vector<9x8xf32>
    %cst_104 = arith.constant 0.353553385 : f32
    %178 = vector.broadcast %cst_104 : f32 to vector<9x8xf32>
    %179 = arith.mulf %177, %178 : vector<9x8xf32>
    %c3_105 = arith.constant 3 : index
    %c0_106 = arith.constant 0 : index
    %c0_107 = arith.constant 0 : index
    %180 = vector.load %arg6[%c3_105, %c0_106, %c0_107] : memref<4x32x8xf32, #tpu.memory_space<vmem>>, vector<1x32x8xf32>
    %181 = vector.shape_cast %180 : vector<1x32x8xf32> to vector<32x8xf32>
    %182 = arith.truncf %181 : vector<32x8xf32> to vector<32x8xbf16>
    %cst_108 = arith.constant dense<0.000000e+00> : vector<9x8xf32>
    %183 = tpu.matmul %26, %182, %cst_108 {dimension_numbers = #tpu.dot_dimension_numbers<[1], [0], [0], [1], [0, 0, 1, 1], [], []>} : vector<9x32xbf16>, vector<32x8xbf16>, vector<9x8xf32> -> vector<9x8xf32>
    %c3_109 = arith.constant 3 : index
    %c0_110 = arith.constant 0 : index
    %c0_111 = arith.constant 0 : index
    %184 = vector.load %arg7[%c3_109, %c0_110, %c0_111] : memref<4x1x8xf32, #tpu.memory_space<vmem>>, vector<1x1x8xf32>
    %185 = vector.shape_cast %184 : vector<1x1x8xf32> to vector<1x8xf32>
    %186 = vector.broadcast %185 : vector<1x8xf32> to vector<9x8xf32>
    %187 = arith.addf %183, %186 : vector<9x8xf32>
    %c3_112 = arith.constant 3 : index
    %c0_113 = arith.constant 0 : index
    %c0_114 = arith.constant 0 : index
    %188 = vector.load %arg8[%c3_112, %c0_113, %c0_114] : memref<4x32x8xf32, #tpu.memory_space<vmem>>, vector<1x32x8xf32>
    %189 = vector.shape_cast %188 : vector<1x32x8xf32> to vector<32x8xf32>
    %190 = arith.truncf %189 : vector<32x8xf32> to vector<32x8xbf16>
    %cst_115 = arith.constant dense<0.000000e+00> : vector<9x8xf32>
    %191 = tpu.matmul %26, %190, %cst_115 {dimension_numbers = #tpu.dot_dimension_numbers<[1], [0], [0], [1], [0, 0, 1, 1], [], []>} : vector<9x32xbf16>, vector<32x8xbf16>, vector<9x8xf32> -> vector<9x8xf32>
    %c3_116 = arith.constant 3 : index
    %c0_117 = arith.constant 0 : index
    %c0_118 = arith.constant 0 : index
    %192 = vector.load %arg9[%c3_116, %c0_117, %c0_118] : memref<4x1x8xf32, #tpu.memory_space<vmem>>, vector<1x1x8xf32>
    %193 = vector.shape_cast %192 : vector<1x1x8xf32> to vector<1x8xf32>
    %194 = vector.broadcast %193 : vector<1x8xf32> to vector<9x8xf32>
    %195 = arith.addf %191, %194 : vector<9x8xf32>
    %196 = arith.truncf %179 : vector<9x8xf32> to vector<9x8xbf16>
    %197 = arith.truncf %187 : vector<9x8xf32> to vector<9x8xbf16>
    %cst_119 = arith.constant dense<0.000000e+00> : vector<9x9xf32>
    %198 = tpu.matmul %196, %197, %cst_119 {dimension_numbers = #tpu.dot_dimension_numbers<[1], [1], [0], [0], [0, 0, 1, 0], [], []>} : vector<9x8xbf16>, vector<9x8xbf16>, vector<9x9xf32> -> vector<9x9xf32>
    %cst_120 = arith.constant dense<0xFF800000> : vector<9xf32>
    %199 = vector.multi_reduction <maximumf>, %198, %cst_120 [1] : vector<9x9xf32> to vector<9xf32>
    %200 = vector.shape_cast %199 : vector<9xf32> to vector<9x1xf32>
    %201 = vector.broadcast %200 : vector<9x1xf32> to vector<9x9xf32>
    %202 = arith.subf %198, %201 : vector<9x9xf32>
    %203 = math.exp %202 : vector<9x9xf32>
    %cst_121 = arith.constant dense<0.000000e+00> : vector<9xf32>
    %204 = vector.multi_reduction <add>, %203, %cst_121 [1] : vector<9x9xf32> to vector<9xf32>
    %205 = vector.shape_cast %204 : vector<9xf32> to vector<9x1xf32>
    %206 = tpu.reciprocal %205 {approx = true} : vector<9x1xf32> -> vector<9x1xf32>
    %207 = vector.broadcast %206 : vector<9x1xf32> to vector<9x9xf32>
    %208 = arith.mulf %203, %207 : vector<9x9xf32>
    %209 = arith.truncf %208 : vector<9x9xf32> to vector<9x9xbf16>
    %210 = arith.truncf %195 : vector<9x8xf32> to vector<9x8xbf16>
    %cst_122 = arith.constant dense<0.000000e+00> : vector<9x8xf32>
    %211 = tpu.matmul %209, %210, %cst_122 {dimension_numbers = #tpu.dot_dimension_numbers<[1], [0], [0], [1], [0, 0, 1, 1], [], []>} : vector<9x9xbf16>, vector<9x8xbf16>, vector<9x8xf32> -> vector<9x8xf32>
    %212 = arith.truncf %211 : vector<9x8xf32> to vector<9x8xbf16>
    %c3_123 = arith.constant 3 : index
    %c0_124 = arith.constant 0 : index
    %c0_125 = arith.constant 0 : index
    %213 = vector.load %arg10[%c3_123, %c0_124, %c0_125] : memref<4x8x32xf32, #tpu.memory_space<vmem>>, vector<1x8x32xf32>
    %214 = vector.shape_cast %213 : vector<1x8x32xf32> to vector<8x32xf32>
    %215 = arith.truncf %214 : vector<8x32xf32> to vector<8x32xbf16>
    %cst_126 = arith.constant dense<0.000000e+00> : vector<9x32xf32>
    %216 = tpu.matmul %212, %215, %cst_126 {dimension_numbers = #tpu.dot_dimension_numbers<[1], [0], [0], [1], [0, 0, 1, 1], [], []>} : vector<9x8xbf16>, vector<8x32xbf16>, vector<9x32xf32> -> vector<9x32xf32>
    %217 = arith.addf %169, %216 : vector<9x32xf32>
    %c0_127 = arith.constant 0 : index
    %c0_128 = arith.constant 0 : index
    %218 = vector.load %arg11[%c0_127, %c0_128] : memref<1x32xf32, #tpu.memory_space<vmem>>, vector<1x32xf32>
    %219 = vector.broadcast %218 : vector<1x32xf32> to vector<9x32xf32>
    %220 = arith.addf %217, %219 : vector<9x32xf32>
    %c0_129 = arith.constant 0 : index
    %c0_130 = arith.constant 0 : index
    %c0_131 = arith.constant 0 : index
    %221 = vector.load %arg12[%c0_129, %c0_130, %c0_131] : memref<1x9x32xf32, #tpu.memory_space<vmem>>, vector<1x9x32xf32>
    %222 = vector.shape_cast %221 : vector<1x9x32xf32> to vector<9x32xf32>
    %223 = vector.shape_cast %220 : vector<9x32xf32> to vector<1x9x32xf32>
    tpu.vector_store %arg12[%c0_129, %c0_130, %c0_131], %223 {strides = array<i32>} : memref<1x9x32xf32, #tpu.memory_space<vmem>>, vector<1x9x32xf32>,
    return
  }
  func.func @transform_0(%arg0: i32) -> (i32, i32, i32) {
    %c0_i32 = arith.constant 0 : i32
    %c0_i32_0 = arith.constant 0 : i32
    %c0_i32_1 = arith.constant 0 : i32
    return %arg0, %c0_i32, %c0_i32_0 : i32, i32, i32
  }
  func.func @transform_1(%arg0: i32) -> (i32, i32) {
    %c0_i32 = arith.constant 0 : i32
    %c0_i32_0 = arith.constant 0 : i32
    %c0_i32_1 = arith.constant 0 : i32
    return %c0_i32, %c0_i32_0 : i32, i32
  }
  func.func @transform_2(%arg0: i32) -> (i32, i32) {
    %c0_i32 = arith.constant 0 : i32
    %c0_i32_0 = arith.constant 0 : i32
    %c0_i32_1 = arith.constant 0 : i32
    return %c0_i32, %c0_i32_0 : i32, i32
  }
  func.func @transform_3(%arg0: i32) -> (i32, i32, i32) {
    %c0_i32 = arith.constant 0 : i32
    %c0_i32_0 = arith.constant 0 : i32
    %c0_i32_1 = arith.constant 0 : i32
    %c0_i32_2 = arith.constant 0 : i32
    return %c0_i32, %c0_i32_0, %c0_i32_1 : i32, i32, i32
  }
  func.func @transform_4(%arg0: i32) -> (i32, i32, i32) {
    %c0_i32 = arith.constant 0 : i32
    %c0_i32_0 = arith.constant 0 : i32
    %c0_i32_1 = arith.constant 0 : i32
    %c0_i32_2 = arith.constant 0 : i32
    return %c0_i32, %c0_i32_0, %c0_i32_1 : i32, i32, i32
  }
  func.func @transform_5(%arg0: i32) -> (i32, i32, i32) {
    %c0_i32 = arith.constant 0 : i32
    %c0_i32_0 = arith.constant 0 : i32
    %c0_i32_1 = arith.constant 0 : i32
    %c0_i32_2 = arith.constant 0 : i32
    return %c0_i32, %c0_i32_0, %c0_i32_1 : i32, i32, i32
  }
  func.func @transform_6(%arg0: i32) -> (i32, i32, i32) {
    %c0_i32 = arith.constant 0 : i32
    %c0_i32_0 = arith.constant 0 : i32
    %c0_i32_1 = arith.constant 0 : i32
    %c0_i32_2 = arith.constant 0 : i32
    return %c0_i32, %c0_i32_0, %c0_i32_1 : i32, i32, i32
  }
  func.func @transform_7(%arg0: i32) -> (i32, i32, i32) {
    %c0_i32 = arith.constant 0 : i32
    %c0_i32_0 = arith.constant 0 : i32
    %c0_i32_1 = arith.constant 0 : i32
    %c0_i32_2 = arith.constant 0 : i32
    return %c0_i32, %c0_i32_0, %c0_i32_1 : i32, i32, i32
  }
  func.func @transform_8(%arg0: i32) -> (i32, i32, i32) {
    %c0_i32 = arith.constant 0 : i32
    %c0_i32_0 = arith.constant 0 : i32
    %c0_i32_1 = arith.constant 0 : i32
    %c0_i32_2 = arith.constant 0 : i32
    return %c0_i32, %c0_i32_0, %c0_i32_1 : i32, i32, i32
  }
  func.func @transform_9(%arg0: i32) -> (i32, i32, i32) {
    %c0_i32 = arith.constant 0 : i32
    %c0_i32_0 = arith.constant 0 : i32
    %c0_i32_1 = arith.constant 0 : i32
    %c0_i32_2 = arith.constant 0 : i32
    return %c0_i32, %c0_i32_0, %c0_i32_1 : i32, i32, i32
  }
  func.func @transform_10(%arg0: i32) -> (i32, i32) {
    %c0_i32 = arith.constant 0 : i32
    %c0_i32_0 = arith.constant 0 : i32
    %c0_i32_1 = arith.constant 0 : i32
    return %c0_i32, %c0_i32_0 : i32, i32
  }
  func.func @transform_11(%arg0: i32) -> (i32, i32, i32) {
    %c0_i32 = arith.constant 0 : i32
    %c0_i32_0 = arith.constant 0 : i32
    %c0_i32_1 = arith.constant 0 : i32
    return %arg0, %c0_i32, %c0_i32_0 : i32, i32, i32
  }
}

module attributes {stable_mosaic.version = 11 : i64} {
  func.func @_mlp_res_kernel(%arg0: i32, %arg1: memref<1x33x32xf32, #tpu.memory_space<vmem>>, %arg2: memref<1x32xf32, #tpu.memory_space<vmem>>, %arg3: memref<1x32xf32, #tpu.memory_space<vmem>>, %arg4: memref<32x64xf32, #tpu.memory_space<vmem>>, %arg5: memref<1x64xf32, #tpu.memory_space<vmem>>, %arg6: memref<64x32xf32, #tpu.memory_space<vmem>>, %arg7: memref<1x32xf32, #tpu.memory_space<vmem>>, %arg8: memref<1x33x32xf32, #tpu.memory_space<vmem>>) attributes {dimension_semantics = [#tpu.dimension_semantics<parallel>], iteration_bounds = array<i64: 1>, scalar_prefetch = 0 : i64, scratch_operands = 0 : i64, tpu.core_type = #tpu.core_type<tc>, window_params = [{transform_indices = @transform_0, window_bounds = array<i64: 1, 33, 32>}, {pipeline_mode = #tpu.pipeline_mode<synchronous>, transform_indices = @transform_1, window_bounds = array<i64: 1, 32>}, {pipeline_mode = #tpu.pipeline_mode<synchronous>, transform_indices = @transform_2, window_bounds = array<i64: 1, 32>}, {pipeline_mode = #tpu.pipeline_mode<synchronous>, transform_indices = @transform_3, window_bounds = array<i64: 32, 64>}, {pipeline_mode = #tpu.pipeline_mode<synchronous>, transform_indices = @transform_4, window_bounds = array<i64: 1, 64>}, {pipeline_mode = #tpu.pipeline_mode<synchronous>, transform_indices = @transform_5, window_bounds = array<i64: 64, 32>}, {pipeline_mode = #tpu.pipeline_mode<synchronous>, transform_indices = @transform_6, window_bounds = array<i64: 1, 32>}, {transform_indices = @transform_7, window_bounds = array<i64: 1, 33, 32>}]} {
    %c0 = arith.constant 0 : index
    %c0_0 = arith.constant 0 : index
    %c0_1 = arith.constant 0 : index
    %0 = vector.load %arg1[%c0, %c0_0, %c0_1] : memref<1x33x32xf32, #tpu.memory_space<vmem>>, vector<1x33x32xf32>
    %1 = vector.shape_cast %0 : vector<1x33x32xf32> to vector<33x32xf32>
    %c0_2 = arith.constant 0 : index
    %c0_3 = arith.constant 0 : index
    %2 = vector.load %arg2[%c0_2, %c0_3] : memref<1x32xf32, #tpu.memory_space<vmem>>, vector<1x32xf32>
    %c0_4 = arith.constant 0 : index
    %c0_5 = arith.constant 0 : index
    %3 = vector.load %arg3[%c0_4, %c0_5] : memref<1x32xf32, #tpu.memory_space<vmem>>, vector<1x32xf32>
    %cst = arith.constant dense<0.000000e+00> : vector<33xf32>
    %4 = vector.multi_reduction <add>, %1, %cst [1] : vector<33x32xf32> to vector<33xf32>
    %5 = vector.shape_cast %4 : vector<33xf32> to vector<33x1xf32>
    %cst_6 = arith.constant 3.200000e+01 : f32
    %6 = vector.broadcast %cst_6 : f32 to vector<33x1xf32>
    %7 = arith.divf %5, %6 : vector<33x1xf32>
    %8 = vector.broadcast %7 : vector<33x1xf32> to vector<33x32xf32>
    %9 = arith.subf %1, %8 : vector<33x32xf32>
    %10 = arith.mulf %9, %9 : vector<33x32xf32>
    %cst_7 = arith.constant dense<0.000000e+00> : vector<33xf32>
    %11 = vector.multi_reduction <add>, %10, %cst_7 [1] : vector<33x32xf32> to vector<33xf32>
    %12 = vector.shape_cast %11 : vector<33xf32> to vector<33x1xf32>
    %cst_8 = arith.constant 3.200000e+01 : f32
    %13 = vector.broadcast %cst_8 : f32 to vector<33x1xf32>
    %14 = arith.divf %12, %13 : vector<33x1xf32>
    %15 = vector.broadcast %7 : vector<33x1xf32> to vector<33x32xf32>
    %16 = arith.subf %1, %15 : vector<33x32xf32>
    %cst_9 = arith.constant 9.99999974E-6 : f32
    %17 = vector.broadcast %cst_9 : f32 to vector<33x1xf32>
    %18 = arith.addf %14, %17 : vector<33x1xf32>
    %19 = math.rsqrt %18 : vector<33x1xf32>
    %20 = vector.broadcast %19 : vector<33x1xf32> to vector<33x32xf32>
    %21 = arith.mulf %16, %20 : vector<33x32xf32>
    %22 = vector.broadcast %2 : vector<1x32xf32> to vector<33x32xf32>
    %23 = arith.mulf %21, %22 : vector<33x32xf32>
    %24 = vector.broadcast %3 : vector<1x32xf32> to vector<33x32xf32>
    %25 = arith.addf %23, %24 : vector<33x32xf32>
    %c0_10 = arith.constant 0 : index
    %c0_11 = arith.constant 0 : index
    %26 = vector.load %arg4[%c0_10, %c0_11] : memref<32x64xf32, #tpu.memory_space<vmem>>, vector<32x64xf32>
    %c0_12 = arith.constant 0 : index
    %c0_13 = arith.constant 0 : index
    %27 = vector.load %arg5[%c0_12, %c0_13] : memref<1x64xf32, #tpu.memory_space<vmem>>, vector<1x64xf32>
    %28 = arith.truncf %25 : vector<33x32xf32> to vector<33x32xbf16>
    %29 = arith.truncf %26 : vector<32x64xf32> to vector<32x64xbf16>
    %cst_14 = arith.constant dense<0.000000e+00> : vector<33x64xf32>
    %30 = tpu.matmul %28, %29, %cst_14 {dimension_numbers = #tpu.dot_dimension_numbers<[1], [0], [0], [1], [0, 0, 1, 1], [], []>} : vector<33x32xbf16>, vector<32x64xbf16>, vector<33x64xf32> -> vector<33x64xf32>
    %31 = vector.broadcast %27 : vector<1x64xf32> to vector<33x64xf32>
    %32 = arith.addf %30, %31 : vector<33x64xf32>
    %cst_15 = arith.constant 1.702000e+00 : f32
    %33 = vector.broadcast %cst_15 : f32 to vector<33x64xf32>
    %34 = arith.mulf %33, %32 : vector<33x64xf32>
    %35 = arith.negf %34 : vector<33x64xf32>
    %36 = math.exp %35 : vector<33x64xf32>
    %cst_16 = arith.constant 1.000000e+00 : f32
    %37 = vector.broadcast %cst_16 : f32 to vector<33x64xf32>
    %38 = arith.addf %37, %36 : vector<33x64xf32>
    %39 = arith.divf %37, %38 : vector<33x64xf32>
    %40 = arith.mulf %32, %39 : vector<33x64xf32>
    %c0_17 = arith.constant 0 : index
    %c0_18 = arith.constant 0 : index
    %41 = vector.load %arg6[%c0_17, %c0_18] : memref<64x32xf32, #tpu.memory_space<vmem>>, vector<64x32xf32>
    %c0_19 = arith.constant 0 : index
    %c0_20 = arith.constant 0 : index
    %42 = vector.load %arg7[%c0_19, %c0_20] : memref<1x32xf32, #tpu.memory_space<vmem>>, vector<1x32xf32>
    %43 = arith.truncf %40 : vector<33x64xf32> to vector<33x64xbf16>
    %44 = arith.truncf %41 : vector<64x32xf32> to vector<64x32xbf16>
    %cst_21 = arith.constant dense<0.000000e+00> : vector<33x32xf32>
    %45 = tpu.matmul %43, %44, %cst_21 {dimension_numbers = #tpu.dot_dimension_numbers<[1], [0], [0], [1], [0, 0, 1, 1], [], []>} : vector<33x64xbf16>, vector<64x32xbf16>, vector<33x32xf32> -> vector<33x32xf32>
    %46 = vector.broadcast %42 : vector<1x32xf32> to vector<33x32xf32>
    %47 = arith.addf %45, %46 : vector<33x32xf32>
    %48 = arith.addf %1, %47 : vector<33x32xf32>
    %c0_22 = arith.constant 0 : index
    %c0_23 = arith.constant 0 : index
    %c0_24 = arith.constant 0 : index
    %49 = vector.load %arg8[%c0_22, %c0_23, %c0_24] : memref<1x33x32xf32, #tpu.memory_space<vmem>>, vector<1x33x32xf32>
    %50 = vector.shape_cast %49 : vector<1x33x32xf32> to vector<33x32xf32>
    %51 = vector.shape_cast %48 : vector<33x32xf32> to vector<1x33x32xf32>
    tpu.vector_store %arg8[%c0_22, %c0_23, %c0_24], %51 {strides = array<i32>} : memref<1x33x32xf32, #tpu.memory_space<vmem>>, vector<1x33x32xf32>,
    return
  }
  func.func @transform_0(%arg0: i32) -> (i32, i32, i32) {
    %c0_i32 = arith.constant 0 : i32
    %c0_i32_0 = arith.constant 0 : i32
    %c0_i32_1 = arith.constant 0 : i32
    return %arg0, %c0_i32, %c0_i32_0 : i32, i32, i32
  }
  func.func @transform_1(%arg0: i32) -> (i32, i32) {
    %c0_i32 = arith.constant 0 : i32
    %c0_i32_0 = arith.constant 0 : i32
    %c0_i32_1 = arith.constant 0 : i32
    return %c0_i32, %c0_i32_0 : i32, i32
  }
  func.func @transform_2(%arg0: i32) -> (i32, i32) {
    %c0_i32 = arith.constant 0 : i32
    %c0_i32_0 = arith.constant 0 : i32
    %c0_i32_1 = arith.constant 0 : i32
    return %c0_i32, %c0_i32_0 : i32, i32
  }
  func.func @transform_3(%arg0: i32) -> (i32, i32) {
    %c0_i32 = arith.constant 0 : i32
    %c0_i32_0 = arith.constant 0 : i32
    %c0_i32_1 = arith.constant 0 : i32
    return %c0_i32, %c0_i32_0 : i32, i32
  }
  func.func @transform_4(%arg0: i32) -> (i32, i32) {
    %c0_i32 = arith.constant 0 : i32
    %c0_i32_0 = arith.constant 0 : i32
    %c0_i32_1 = arith.constant 0 : i32
    return %c0_i32, %c0_i32_0 : i32, i32
  }
  func.func @transform_5(%arg0: i32) -> (i32, i32) {
    %c0_i32 = arith.constant 0 : i32
    %c0_i32_0 = arith.constant 0 : i32
    %c0_i32_1 = arith.constant 0 : i32
    return %c0_i32, %c0_i32_0 : i32, i32
  }
  func.func @transform_6(%arg0: i32) -> (i32, i32) {
    %c0_i32 = arith.constant 0 : i32
    %c0_i32_0 = arith.constant 0 : i32
    %c0_i32_1 = arith.constant 0 : i32
    return %c0_i32, %c0_i32_0 : i32, i32
  }
  func.func @transform_7(%arg0: i32) -> (i32, i32, i32) {
    %c0_i32 = arith.constant 0 : i32
    %c0_i32_0 = arith.constant 0 : i32
    %c0_i32_1 = arith.constant 0 : i32
    return %arg0, %c0_i32, %c0_i32_0 : i32, i32, i32
  }
}

module attributes {stable_mosaic.version = 11 : i64} {
  func.func @_layernorm_kernel(%arg0: i32, %arg1: memref<8x32xf32, #tpu.memory_space<vmem>>, %arg2: memref<1x32xf32, #tpu.memory_space<vmem>>, %arg3: memref<1x32xf32, #tpu.memory_space<vmem>>, %arg4: memref<8x32xf32, #tpu.memory_space<vmem>>) attributes {dimension_semantics = [#tpu.dimension_semantics<arbitrary>], iteration_bounds = array<i64: 1>, scalar_prefetch = 0 : i64, scratch_operands = 0 : i64, tpu.core_type = #tpu.core_type<tc>, window_params = [{pipeline_mode = #tpu.pipeline_mode<synchronous>, transform_indices = @transform_0, window_bounds = array<i64: 8, 32>}, {pipeline_mode = #tpu.pipeline_mode<synchronous>, transform_indices = @transform_1, window_bounds = array<i64: 1, 32>}, {pipeline_mode = #tpu.pipeline_mode<synchronous>, transform_indices = @transform_2, window_bounds = array<i64: 1, 32>}, {pipeline_mode = #tpu.pipeline_mode<synchronous>, transform_indices = @transform_3, window_bounds = array<i64: 8, 32>}]} {
    %c0 = arith.constant 0 : index
    %c0_0 = arith.constant 0 : index
    %0 = vector.load %arg1[%c0, %c0_0] : memref<8x32xf32, #tpu.memory_space<vmem>>, vector<8x32xf32>
    %c0_1 = arith.constant 0 : index
    %c0_2 = arith.constant 0 : index
    %1 = vector.load %arg2[%c0_1, %c0_2] : memref<1x32xf32, #tpu.memory_space<vmem>>, vector<1x32xf32>
    %c0_3 = arith.constant 0 : index
    %c0_4 = arith.constant 0 : index
    %2 = vector.load %arg3[%c0_3, %c0_4] : memref<1x32xf32, #tpu.memory_space<vmem>>, vector<1x32xf32>
    %cst = arith.constant dense<0.000000e+00> : vector<8xf32>
    %3 = vector.multi_reduction <add>, %0, %cst [1] : vector<8x32xf32> to vector<8xf32>
    %4 = vector.shape_cast %3 : vector<8xf32> to vector<8x1xf32>
    %cst_5 = arith.constant 3.200000e+01 : f32
    %5 = vector.broadcast %cst_5 : f32 to vector<8x1xf32>
    %6 = arith.divf %4, %5 : vector<8x1xf32>
    %7 = vector.broadcast %6 : vector<8x1xf32> to vector<8x32xf32>
    %8 = arith.subf %0, %7 : vector<8x32xf32>
    %9 = arith.mulf %8, %8 : vector<8x32xf32>
    %cst_6 = arith.constant dense<0.000000e+00> : vector<8xf32>
    %10 = vector.multi_reduction <add>, %9, %cst_6 [1] : vector<8x32xf32> to vector<8xf32>
    %11 = vector.shape_cast %10 : vector<8xf32> to vector<8x1xf32>
    %cst_7 = arith.constant 3.200000e+01 : f32
    %12 = vector.broadcast %cst_7 : f32 to vector<8x1xf32>
    %13 = arith.divf %11, %12 : vector<8x1xf32>
    %14 = vector.broadcast %6 : vector<8x1xf32> to vector<8x32xf32>
    %15 = arith.subf %0, %14 : vector<8x32xf32>
    %cst_8 = arith.constant 9.99999974E-6 : f32
    %16 = vector.broadcast %cst_8 : f32 to vector<8x1xf32>
    %17 = arith.addf %13, %16 : vector<8x1xf32>
    %18 = math.rsqrt %17 : vector<8x1xf32>
    %19 = vector.broadcast %18 : vector<8x1xf32> to vector<8x32xf32>
    %20 = arith.mulf %15, %19 : vector<8x32xf32>
    %21 = vector.broadcast %1 : vector<1x32xf32> to vector<8x32xf32>
    %22 = arith.mulf %20, %21 : vector<8x32xf32>
    %23 = vector.broadcast %2 : vector<1x32xf32> to vector<8x32xf32>
    %24 = arith.addf %22, %23 : vector<8x32xf32>
    %c0_9 = arith.constant 0 : index
    %c0_10 = arith.constant 0 : index
    %25 = vector.load %arg4[%c0_9, %c0_10] : memref<8x32xf32, #tpu.memory_space<vmem>>, vector<8x32xf32>
    tpu.vector_store %arg4[%c0_9, %c0_10], %24 {strides = array<i32>} : memref<8x32xf32, #tpu.memory_space<vmem>>, vector<8x32xf32>,
    return
  }
  func.func @transform_0(%arg0: i32) -> (i32, i32) {
    %c0_i32 = arith.constant 0 : i32
    %c0_i32_0 = arith.constant 0 : i32
    %c0_i32_1 = arith.constant 0 : i32
    return %c0_i32, %c0_i32_0 : i32, i32
  }
  func.func @transform_1(%arg0: i32) -> (i32, i32) {
    %c0_i32 = arith.constant 0 : i32
    %c0_i32_0 = arith.constant 0 : i32
    %c0_i32_1 = arith.constant 0 : i32
    return %c0_i32, %c0_i32_0 : i32, i32
  }
  func.func @transform_2(%arg0: i32) -> (i32, i32) {
    %c0_i32 = arith.constant 0 : i32
    %c0_i32_0 = arith.constant 0 : i32
    %c0_i32_1 = arith.constant 0 : i32
    return %c0_i32, %c0_i32_0 : i32, i32
  }
  func.func @transform_3(%arg0: i32) -> (i32, i32) {
    %c0_i32 = arith.constant 0 : i32
    %c0_i32_0 = arith.constant 0 : i32
    %c0_i32_1 = arith.constant 0 : i32
    return %c0_i32, %c0_i32_0 : i32, i32
  }
}

</mosaic_0001>

<bundles_post_ra>
// kernel: model_forward.20
= control target key start
LH: loop header
LB: loop body
LE: loop exit
PB: predicated region body
PF: predicated region fallthrough
CT: control target
= control target key end

     0   :  { %s458_s18 = smov 0   ;;  %s579_s0 = inlined_call_operand.vmem [shape: f32[8,5,192], index: 0, kind: input, shape index: {}]   ;;  %s580_s1 = inlined_call_operand.vmem [shape: f32[192,32], index: 1, kind: input, shape index: {}]   ;;  %s581_s2 = inlined_call_operand.vmem [shape: f32[5,32], index: 2, kind: input, shape index: {}]   ;;  %s582_s3 = inlined_call_operand.vmem [shape: f32[1,32], index: 3, kind: input, shape index: {}]   ;;  %s583_s4 = inlined_call_operand.vmem [shape: f32[1,32], index: 4, kind: input, shape index: {}]   ;;  %s584_s5 = inlined_call_operand.vmem [shape: f32[8,5,32], index: 5, kind: output, shape index: {}]  }
   0x1 LB: > { %s394_s19 = sadd.s32 4294967295, %s425_s18   ;;  %p398_p0 = scmp.ge.s32.totalorder %s425_s18, 1  ;;  %s425_s18 = sphi %s458_s18, %s15_s18  }
   0x2   : > { %p187_p1 = scmp.lt.s32.totalorder %s425_s18, 9 }
   0x4   : > { %p188_p2 = pnand %p398_p0, %p187_p1 }
   0x5   : > { %v226_v0 = vld [vmem:[%s580_s1] sm:$0xff] (!%p188_p2)  ;;  %v227_v1 = vld [vmem:[%s580_s1 + $0x8] sm:$0xff] (!%p188_p2)  ;;  %v228_v2 = vld [vmem:[%s580_s1 + $0x10] sm:$0xff] (!%p188_p2)  ;;  %p214_p3 = scmp.lt.s32.totalorder (!%p188_p2), %s394_s19, 7  ;;  %v427_v3 = vmov (!%p188_p2), 0   ;;  %vm265_vm0 = vcmask (!%p188_p2), 523264  }
   0x6   : > { %191 = sbr.rel (%p188_p2) target bundleno = 583 (0x247), region = 40  ;;  %269 = vmatprep.subr.bf16.mxu0 (!%p188_p2), %v427_v3  ;;  %v253_v4 = vpack.c.bf16 (!%p188_p2), %v227_v1, %v226_v0  ;;  %v229_v5 = vld [vmem:[%s580_s1 + $0x18] sm:$0xff] (!%p188_p2)  ;;  %v230_v7 = vld [vmem:[%s580_s1 + $0x20] sm:$0xff] (!%p188_p2)  ;;  %v231_v8 = vld [vmem:[%s580_s1 + $0x28] sm:$0xff] (!%p188_p2)  ;;  %vm311_vm1 = vcmask (!%p188_p2), 258048  }
   0x7   : > { %v254_v6 = vpack.c.bf16 (!%p188_p2), %v229_v5, %v228_v2  ;;  %v255_v9 = vpack.c.bf16 (!%p188_p2), %v231_v8, %v230_v7  ;;  %v232_v10 = vld [vmem:[%s580_s1 + $0x30] sm:$0xff] (!%p188_p2)  ;;  %v233_v11 = vld [vmem:[%s580_s1 + $0x38] sm:$0xff] (!%p188_p2)  ;;  %v234_v15 = vld [vmem:[%s580_s1 + $0x40] sm:$0xff] (!%p188_p2) }
   0x8   : > { %270 = vmatpush1.bf16.msra.mxu0 (!%p188_p2), %v253_v4  ;;  %v256_v14 = vpack.c.bf16 (!%p188_p2), %v233_v11, %v232_v10  ;;  %v235_v16 = vld [vmem:[%s580_s1 + $0x48] sm:$0xff] (!%p188_p2)  ;;  %v236_v18 = vld [vmem:[%s580_s1 + $0x50] sm:$0xff] (!%p188_p2)  ;;  %v237_v19 = vld [vmem:[%s580_s1 + $0x58] sm:$0xff] (!%p188_p2) }
   0x9   : > { %271 = vmatprep.subr.bf16.mxu0 (!%p188_p2), %v427_v3  ;;  %v257_v17 = vpack.c.bf16 (!%p188_p2), %v235_v16, %v234_v15  ;;  %v258_v20 = vpack.c.bf16 (!%p188_p2), %v237_v19, %v236_v18  ;;  %v238_v21 = vld [vmem:[%s580_s1 + $0x60] sm:$0xff] (!%p188_p2)  ;;  %v239_v22 = vld [vmem:[%s580_s1 + $0x68] sm:$0xff] (!%p188_p2)  ;;  %v240_v24 = vld [vmem:[%s580_s1 + $0x70] sm:$0xff] (!%p188_p2) }
   0xa   : > { %v259_v23 = vpack.c.bf16 (!%p188_p2), %v239_v22, %v238_v21  ;;  %v241_v25 = vld [vmem:[%s580_s1 + $0x78] sm:$0xff] (!%p188_p2)  ;;  %v242_v27 = vld [vmem:[%s580_s1 + $0x80] sm:$0xff] (!%p188_p2)  ;;  %v243_v28 = vld [vmem:[%s580_s1 + $0x88] sm:$0xff] (!%p188_p2) }
   0xb   : > { %v260_v26 = vpack.c.bf16 (!%p188_p2), %v241_v25, %v240_v24  ;;  %v261_v29 = vpack.c.bf16 (!%p188_p2), %v243_v28, %v242_v27  ;;  %v244_v30 = vld [vmem:[%s580_s1 + $0x90] sm:$0xff] (!%p188_p2)  ;;  %v245_v31 = vld [vmem:[%s580_s1 + $0x98] sm:$0xff] (!%p188_p2)  ;;  %v246_v33 = vld [vmem:[%s580_s1 + $0xa0] sm:$0xff] (!%p188_p2) }
   0xc   : > { %272 = vmatpush1.bf16.msra.mxu0 (!%p188_p2), %v254_v6  ;;  %v262_v32 = vpack.c.bf16 (!%p188_p2), %v245_v31, %v244_v30  ;;  %v247_v34 = vld [vmem:[%s580_s1 + $0xa8] sm:$0xff] (!%p188_p2)  ;;  %v248_v36 = vld [vmem:[%s580_s1 + $0xb0] sm:$0xff] (!%p188_p2)  ;;  %v249_v37 = vld [vmem:[%s580_s1 + $0xb8] sm:$0xff] (!%p188_p2) }
   0xd   : > { %s586_s19 = smov (!%p214_p3, %s394_s19), 7  ;;  %273 = vmatprep.subr.bf16.mxu0 %v427_v3  ;;  %v263_v35 = vpack.c.bf16 %v247_v34, %v246_v33  ;;  %v264_v38 = vpack.c.bf16 %v249_v37, %v248_v36  ;;  %v250_v41 = vld [vmem:[%s581_s2] sm:$0x1f] }
   0xe   : > { %s407_s7 = sshll.u32 %s586_s19, 4  ;;  %v403_v57 = vld [vmem:[%s582_s3] ss:$0 sm:$0xff]  ;;  %s401_s30 = sshll.u32 %s586_s19, 3 }
   0xf   : > { %s492_s10 = scalar_lea.vmem %s579_s0, %s407_s7  ;;  %v404_v59 = vld [vmem:[%s583_s4] ss:$0 sm:$0xff]  ;;  %s222_s11 = scalar_lea.vmem %s584_s5, %s401_s30 }
  0x10   : > { %v225_v12 = vld [vmem:[%s492_s10 + $0x8] sm:$0x1f]  ;;  %274 = vmatpush1.bf16.msra.mxu0 %v255_v9  ;;  %v224_v39 = vld [vmem:[%s492_s10] sm:$0x1f] }
  0x11   : > { %v252_v13 = vpack.c.bf16 %v225_v12, %v225_v12  ;;  %275 = vmatprep.subr.bf16.mxu0 %v427_v3  ;;  %v251_v40 = vpack.c.bf16 %v224_v39, %v224_v39 }
  0x13   : > { %402 = vmatprep.mubr.msk.bf16.mxu0 %vm265_vm0, %v252_v13 }
  0x14   : > { %276 = vmatpush1.bf16.msra.mxu0 %v256_v14 }
  0x15   : > { %277 = vmatprep.subr.bf16.mxu0 %v427_v3 }
  0x18   : > { %278 = vmatpush1.bf16.msra.mxu0 %v257_v17 }
  0x19   : > { %279 = vmatprep.subr.bf16.mxu0 %v427_v3 }
  0x1c   : > { %280 = vmatpush1.bf16.msra.mxu0 %v258_v20 }
  0x1d   : > { %281 = vmatprep.subr.bf16.mxu0 %v427_v3 }
  0x20   : > { %282 = vmatpush1.bf16.msra.mxu0 %v259_v23 }
  0x21   : > { %283 = vmatprep.subr.bf16.mxu0 %v427_v3 }
  0x24   : > { %284 = vmatpush1.bf16.msra.mxu0 %v260_v26 }
  0x25   : > { %285 = vmatprep.subr.bf16.mxu0 %v427_v3 }
  0x28   : > { %286 = vmatpush1.bf16.msra.mxu0 %v261_v29 }
  0x29   : > { %287 = vmatprep.subr.bf16.mxu0 %v427_v3 }
  0x2c   : > { %288 = vmatpush1.bf16.msra.mxu0 %v262_v32 }
  0x2d   : > { %289 = vmatprep.subr.bf16.mxu0 %v427_v3 }
  0x30   : > { %290 = vmatpush1.bf16.msra.mxu0 %v263_v35 }
  0x31   : > { %291 = vmatprep.subr.bf16.mxu0 %v427_v3 }
  0x34   : > { %292 = vmatpush1.bf16.msra.mxu0 %v264_v38 }
  0x37   : > { %302 = vmatmul.mubr.bf16.vlgmr.msra.gmra.mrb[0].mxu0 %v251_v40 }
 0x10a   : > { %v303_v42 = vpop.f32.mrb[0].mxu0 }
 0x10b   : > { %v304_v43 = vadd.f32 %v303_v42, %v250_v41  ;;  %v305_v44 = vpop.f32.mrb[1].mxu0 }
 0x10c   : > { %v306_v45 = vpop.f32.mrb[2].mxu0 }
 0x10d   : > { %v307_v46 = vpop.f32.mrb[3].mxu0  ;;  %v312_v47 = vsel %vm311_vm1, %v304_v43, 0.0 }
 0x10e   : > { %313 = vadd.xlane.f32.xlu0 %v312_v47 }
 0x19b   : > { %v314_v48 = vpop.xlane.xlu0 %313 }
 0x19c   : > { %v316_v49 = vmul.f32 0.03125, %v314_v48 }
 0x19e   : > { %v317_v50 = vsub.f32 %v304_v43, %v316_v49 }
 0x1a0   : > { %v318_v51 = vmul.f32 %v317_v50, %v317_v50 }
 0x1a2   : > { %v319_v52 = vsel %vm311_vm1, %v318_v51, 0.0 }
 0x1a3   : > { %320 = vadd.xlane.f32.xlu0 %v319_v52 }
 0x230   : > { %v321_v53 = vpop.xlane.xlu0 %320 }
 0x231   : > { %v322_v54 = vmul.f32 0.03125, %v321_v53 }
 0x233   : > { %v323_v55 = vadd.f32 1e-05, %v322_v54 }
 0x235   : > { %417 = vrsqrt.f32 %v323_v55 }
 0x23f   : > { %v418_v56 = vpop.eup %417 }
 0x240   : > { %v325_v58 = vmul.f32 %v418_v56, %v317_v50 }
 0x242   : > { %v332_v60 = vmul.f32 %v403_v57, %v325_v58 }
 0x244   : > { %v339_v61 = vadd.f32 %v404_v59, %v332_v60 }
 0x246   : > { %340 = vst.msk [vmem:[%s222_s11] sm:$0x1f] %vm311_vm1, %v339_v61 }
 0x247 PF: > { %s15_s18 = sadd.s32 1, %s425_s18  }
 0x248   : > { %p12_p4 = scmp.ge.s32.totalorder %s15_s18, 10  }
 0x24a   :  { %14 = sbr.rel (!%p12_p4) target bundleno = 1 (0x1), region = 70 }

// kernel: model_forward.21
= control target key start
LH: loop header
LB: loop body
LE: loop exit
PB: predicated region body
PF: predicated region fallthrough
CT: control target
= control target key end

     0   :  { %s2594_s24 = smov 0   ;;  %s3040_s0 = inlined_call_operand.vmem [shape: f32[8,5,32], index: 0, kind: input, shape index: {}]   ;;  %s3041_s1 = inlined_call_operand.vmem [shape: f32[1,32], index: 1, kind: input, shape index: {}, may-alias: {1,11}]   ;;  %s3042_s2 = inlined_call_operand.vmem [shape: f32[1,32], index: 2, kind: input, shape index: {}, may-alias: {2,10,12,16}]   ;;  %s3043_s3 = inlined_call_operand.vmem [shape: f32[4,32,8], index: 3, kind: input, shape index: {}]   ;;  %s3044_s4 = inlined_call_operand.vmem [shape: f32[4,1,8], index: 4, kind: input, shape index: {}, may-alias: {4,6,8}]   ;;  %s3045_s5 = inlined_call_operand.vmem [shape: f32[4,32,8], index: 5, kind: input, shape index: {}]   ;;  %s3046_s6 = inlined_call_operand.vmem [shape: f32[4,1,8], index: 6, kind: input, shape index: {}, may-alias: {4,6,8}]   ;;  %s3047_s7 = inlined_call_operand.vmem [shape: f32[4,32,8], index: 7, kind: input, shape index: {}]   ;;  %s3048_s8 = inlined_call_operand.vmem [shape: f32[4,1,8], index: 8, kind: input, shape index: {}, may-alias: {4,6,8}]   ;;  %s3049_s9 = inlined_call_operand.vmem [shape: f32[4,8,32], index: 9, kind: input, shape index: {}]   ;;  %s3050_s10 = inlined_call_operand.vmem [shape: f32[1,32], index: 10, kind: input, shape index: {}, may-alias: {2,10,12,16}]   ;;  %s3051_s11 = inlined_call_operand.vmem [shape: f32[1,32], index: 11, kind: input, shape index: {}, may-alias: {1,11}]   ;;  %s3052_s12 = inlined_call_operand.vmem [shape: f32[1,32], index: 12, kind: input, shape index: {}, may-alias: {2,10,12,16}]   ;;  %s3053_s13 = inlined_call_operand.vmem [shape: f32[32,64], index: 13, kind: input, shape index: {}]   ;;  %s3054_s14 = inlined_call_operand.vmem [shape: f32[1,64], index: 14, kind: input, shape index: {}]   ;;  %s3055_s15 = inlined_call_operand.vmem [shape: f32[64,32], index: 15, kind: input, shape index: {}]   ;;  %s3056_s16 = inlined_call_operand.vmem [shape: f32[1,32], index: 16, kind: input, shape index: {}, may-alias: {2,10,12,16}]   ;;  %s3057_s17 = inlined_call_operand.vmem [shape: f32[8,5,32], index: 17, kind: output, shape index: {}]  }
   0x1   :  { %3058 = sst [smem:[#allocation2_spill]] %s3040_s0 }
   0x2   :  { %3059 = sst [smem:[#allocation3_spill]] %s3041_s1 }
   0x3 LB: > { %s2099_s25 = sadd.s32 4294967295, %s2499_s24   ;;  %p2103_p0 = scmp.ge.s32.totalorder %s2499_s24, 1  ;;  %s2499_s24 = sphi %s2594_s24, %s27_s24  }
   0x4   : > { %p486_p1 = scmp.lt.s32.totalorder %s2499_s24, 9 }
   0x6   : > { %p487_p2 = pnand %p2103_p0, %p486_p1 }
   0x7   : > { %p536_p3 = scmp.lt.s32.totalorder (!%p487_p2), %s2099_s25, 7  ;;  %vm548_vm0 = vcmask (!%p487_p2), 258048   ;;  %s3060_s29 = sld [smem:[#allocation2_spill]] (!%p487_p2)  ;;  %v578_v7 = vld [vmem:[%s3043_s3] sm:$0xff] (!%p487_p2)  ;;  %v579_v8 = vld [vmem:[%s3043_s3 + $0x8] sm:$0xff] (!%p487_p2)  ;;  %v2501_v12 = vmov (!%p487_p2), 0.0  }
   0x8   : > { %490 = sbr.rel (%p487_p2) target bundleno = 4998 (0x1386), region = 88  ;;  %v636_v9 = vld [vmem:[%s3045_s5] sm:$0xff] (!%p487_p2)  ;;  %v582_v10 = vpack.c.bf16 (!%p487_p2), %v579_v8, %v578_v7  ;;  %v637_v11 = vld [vmem:[%s3045_s5 + $0x8] sm:$0xff] (!%p487_p2)  ;;  %2270 = vmatprep.subr.bf16.mxu0 (!%p487_p2), %v2501_v12  ;;  %2278 = vmatprep.subr.bf16.mxu1 (!%p487_p2), %v2501_v12  ;;  %v580_v14 = vld [vmem:[%s3043_s3 + $0x10] sm:$0xff] (!%p487_p2)  ;;  %vm2502_vm1 = vmmov (!%p487_p2), 0   ;;  %s3061_s22 = sld [smem:[#allocation3_spill]] (!%p487_p2) }
   0x9   : > { %v640_v13 = vpack.c.bf16 (!%p487_p2), %v637_v11, %v636_v9  ;;  %v581_v15 = vld [vmem:[%s3043_s3 + $0x18] sm:$0xff] (!%p487_p2)  ;;  %v638_v16 = vld [vmem:[%s3045_s5 + $0x10] sm:$0xff] (!%p487_p2)  ;;  %2274 = vmatprep.mubr.msk.bf16.mxu0 (!%p487_p2), %vm2502_vm1, %v2501_v12  ;;  %2282 = vmatprep.mubr.msk.bf16.mxu1 (!%p487_p2), %vm2502_vm1, %v2501_v12  ;;  %v2107_v26 = vld [vmem:[%s3042_s2] ss:$0 sm:$0xff] (!%p487_p2)  ;;  %vm591_vm2 = vcmask (!%p487_p2), 261120   ;;  %vm744_vm3 = vcmask (!%p487_p2), 64512  }
   0xa   : > { %2271 = vmatpush3.bf16.msra.mxu0 (!%p487_p2), %v582_v10  ;;  %v583_v17 = vpack.c.bf16 (!%p487_p2), %v581_v15, %v580_v14  ;;  %v639_v18 = vld [vmem:[%s3045_s5 + $0x18] sm:$0xff] (!%p487_p2)  ;;  %v689_v28 = vld [vmem:[%s3047_s7] sm:$0xff] (!%p487_p2)  ;;  %v690_v29 = vld [vmem:[%s3047_s7 + $0x8] sm:$0xff] (!%p487_p2)  ;;  %vm809_vm4 = vcmask (!%p487_p2), 1041408   ;;  %vm810_vm5 = vcmask (!%p487_p2), 1042432   ;;  %v2503_v52 = vmov (!%p487_p2), 65535  }
   0xb   : > { %2279 = vmatpush3.bf16.msra.mxu1 (!%p487_p2), %v640_v13  ;;  %2272 = vmatprep.subr.bf16.mxu0 (!%p487_p2), %v2501_v12  ;;  %v641_v19 = vpack.c.bf16 (!%p487_p2), %v639_v18, %v638_v16  ;;  %v693_v31 = vpack.c.bf16 (!%p487_p2), %v690_v29, %v689_v28  ;;  %v691_v33 = vld [vmem:[%s3047_s7 + $0x10] sm:$0xff] (!%p487_p2)  ;;  %v692_v34 = vld [vmem:[%s3047_s7 + $0x18] sm:$0xff] (!%p487_p2)  ;;  %v2110_v36 = vld [vmem:[%s3046_s6] ss:$0 sm:$0xff] (!%p487_p2)  ;;  %v811_v53 = vsel (!%p487_p2), %vm809_vm4, 4294967295, %v2503_v52  ;;  %vm791_vm6 = vcmask (!%p487_p2), 36864  }
   0xc   : > { %2280 = vmatprep.subr.bf16.mxu1 (!%p487_p2), %v2501_v12  ;;  %v694_v35 = vpack.c.bf16 (!%p487_p2), %v692_v34, %v691_v33  ;;  %v2108_v37 = vld [vmem:[%s3044_s4] ss:$0 sm:$0xff] (!%p487_p2)  ;;  %v2117_v55 = vld [vmem:[%s3043_s3 + $0x28] sm:$0xff] (!%p487_p2)  ;;  %v2701_v59 = vsel (!%p487_p2), %vm810_vm5, %v811_v53, 0  ;;  %v2132_v9 = vld [vmem:[%s3047_s7 + $0x30] sm:$0xff] (!%p487_p2)  ;;  %vm805_vm7 = vcmask (!%p487_p2), 39936  }
   0xd   : > { %v2112_v50 = vld [vmem:[%s3048_s8] ss:$0 sm:$0xff] (!%p487_p2)  ;;  %v2131_v7 = vld [vmem:[%s3047_s7 + $0x28] sm:$0xff] (!%p487_p2)  ;;  %v2133_v10 = vld [vmem:[%s3047_s7 + $0x38] sm:$0xff] (!%p487_p2)  ;;  %vm1139_vm8 = vcmask (!%p487_p2), 1043456   ;;  %vm2000_vm9 = vcmask (!%p487_p2), 523264  }
   0xe   : > { %2273 = vmatpush3.bf16.msra.mxu0 (!%p487_p2), %v583_v17  ;;  %v2106_v24 = vld [vmem:[%s3061_s22] ss:$0 sm:$0xff] (!%p487_p2)  ;;  %v976_v11 = vpack.c.bf16 (!%p487_p2), %v2133_v10, %v2132_v9  ;;  %v2139_v10 = vld [vmem:[%s3049_s9 + $0x8] sm:$0xff] (!%p487_p2) }
   0xf   : > { %s3063_s25 = smov (!%p536_p3, %s2099_s25), 7  ;;  %2281 = vmatpush3.bf16.msra.mxu1 %v641_v19  ;;  %2286 = vmatprep.subr.bf16.mxu0 %v2501_v12  ;;  %v2116_v54 = vld [vmem:[%s3043_s3 + $0x20] sm:$0xff] }
  0x10   : > { %s2104_s26 = sshll.u32 %s3063_s25, 3  ;;  %2294 = vmatprep.subr.bf16.mxu1 %v2501_v12  ;;  %v864_v61 = vpack.c.bf16 %v2117_v55, %v2116_v54 }
  0x11   : > { %s539_s0 = scalar_lea.vmem %s3060_s29, %s2104_s26  ;;  %s543_s18 = scalar_lea.vmem %s3057_s17, %s2104_s26 }
  0x12   : > { %v2610_v0 = vld [vmem:[%s539_s0] sm:$0x1f] }
  0x13   : > { %v549_v1 = vsel %vm548_vm0, %v2610_v0, 0.0 }
  0x14   : > { %550 = vadd.xlane.f32.xlu0 %v549_v1 }
  0xa1   : > { %v551_v2 = vpop.xlane.xlu0 %550 }
  0xa2   : > { %v553_v3 = vmul.f32 0.03125, %v551_v2  ;;  %v2118_v2 = vld [vmem:[%s3043_s3 + $0x30] sm:$0xff] }
  0xa4   : > { %v554_v4 = vsub.f32 %v2610_v0, %v553_v3  ;;  %v2119_v3 = vld [vmem:[%s3043_s3 + $0x38] sm:$0xff] }
  0xa6   : > { %v555_v5 = vmul.f32 %v554_v4, %v554_v4 }
  0xa8   : > { %v556_v6 = vsel %vm548_vm0, %v555_v5, 0.0  ;;  %v865_v5 = vpack.c.bf16 %v2119_v3, %v2118_v2 }
  0xa9   : > { %557 = vadd.xlane.f32.xlu0 %v556_v6  ;;  %v2130_v6 = vld [vmem:[%s3047_s7 + $0x20] sm:$0xff] }
  0xaa   : > { %v975_v8 = vpack.c.bf16 %v2131_v7, %v2130_v6 }
 0x136   : > { %v558_v20 = vpop.xlane.xlu0 %557 }
 0x137   : > { %v559_v21 = vmul.f32 0.03125, %v558_v20 }
 0x139   : > { %v560_v22 = vadd.f32 1e-05, %v559_v21 }
 0x13b   : > { %2469 = vrsqrt.f32 %v560_v22  ;;  %v2135_v22 = vld [vmem:[%s3048_s8 + $0x1] ss:$0 sm:$0xff] }
 0x145   : > { %v2470_v23 = vpop.eup %2469 }
 0x146   : > { %v562_v25 = vmul.f32 %v2470_v23, %v554_v4 }
 0x148   : > { %v569_v27 = vmul.f32 %v2106_v24, %v562_v25 }
 0x14a   : > { %v576_v30 = vadd.f32 %v2107_v26, %v569_v27 }
 0x14c   : > { %v2662_v32 = vpack.c.bf16 %v576_v30, %v576_v30 }
 0x14e   : > { %2275 = vmatmul.mubr.msk.bf16.vlgmr.msra.gmra.mrb[0].mxu0 %vm591_vm2, %v2662_v32  ;;  %2283 = vmatmul.mubr.msk.bf16.vlgmr.msra.gmra.mrb[0].mxu1 %vm591_vm2, %v2662_v32 }
 0x14f   : > { %2287 = vmatpush3.bf16.msra.mxu0 %v693_v31  ;;  %2290 = vmatprep.mubr.msk.bf16.mxu0 %vm2502_vm1, %v2501_v12 }
 0x150   : > { %2288 = vmatprep.subr.bf16.mxu0 %v2501_v12  ;;  %2296 = vmatprep.mubr.msk.bf16.mxu1 %vm2502_vm1, %v2501_v12 }
 0x153   : > { %2289 = vmatpush3.bf16.msra.mxu0 %v694_v35 }
 0x154   : > { %2300 = vmatprep.subr.bf16.mxu0 %v2501_v12 }
 0x156   : > { %2291 = vmatmul.mubr.msk.bf16.vlgmr.msra.gmra.mrb[4].mxu0 %vm591_vm2, %v2662_v32 }
 0x157   : > { %2302 = vmatprep.mubr.msk.bf16.mxu0 %vm2502_vm1, %v2501_v12 }
 0x221   : > { %v629_v38 = vpop.f32.mrb[0].mxu0  ;;  %v683_v39 = vpop.f32.mrb[0].mxu1 }
 0x222   : > { %v684_v40 = vadd.f32 %v2110_v36, %v683_v39  ;;  %v2276_v41 = vpop.f32.mrb[1].mxu0  ;;  %v2284_v42 = vpop.f32.mrb[1].mxu1  ;;  %v630_v45 = vadd.f32 %v2108_v37, %v629_v38  ;;  %v2123_v37 = vld [vmem:[%s3045_s5 + $0x20] sm:$0xff]  ;;  %v2124_v38 = vld [vmem:[%s3045_s5 + $0x28] sm:$0xff] }
 0x223   : > { %v632_v43 = vpop.f32.mrb[2].mxu0  ;;  %v686_v44 = vpop.f32.mrb[2].mxu1  ;;  %v920_v41 = vpack.c.bf16 %v2124_v38, %v2123_v37 }
 0x224   : > { %v743_v46 = vpack.c.bf16 %v684_v40, %v684_v40  ;;  %v2277_v47 = vpop.f32.mrb[3].mxu0  ;;  %v2285_v48 = vpop.f32.mrb[3].mxu1  ;;  %v635_v51 = vmul.f32 0.35355338, %v630_v45  ;;  %v2125_v43 = vld [vmem:[%s3045_s5 + $0x30] sm:$0xff]  ;;  %v2126_v44 = vld [vmem:[%s3045_s5 + $0x38] sm:$0xff] }
 0x225   : > { %v921_v45 = vpack.c.bf16 %v2126_v44, %v2125_v43 }
 0x226   : > { %v749_v49 = vsel %vm744_vm3, %v743_v46, 0  ;;  %v742_v62 = vpack.c.bf16 %v635_v51, %v635_v51  ;;  %v2121_v51 = vld [vmem:[%s3044_s4 + $0x1] ss:$0 sm:$0xff] }
 0x227   : > { %2295 = vmatpush3.bf16.xpose.msra.mxu1 %v749_v49 }
 0x228   : > { %2306 = vmatprep.subr.bf16.mxu1 %v2501_v12 }
 0x229   : > { %v736_v56 = vpop.f32.mrb[4].mxu0 }
 0x22a   : > { %v737_v57 = vadd.f32 %v2112_v50, %v736_v56  ;;  %v2292_v58 = vpop.f32.mrb[5].mxu0  ;;  %v2128_v50 = vld [vmem:[%s3046_s6 + $0x1] ss:$0 sm:$0xff] }
 0x22b   : > { %v739_v60 = vpop.f32.mrb[6].mxu0 }
 0x22c   : > { %v804_v63 = vpack.c.bf16 %v737_v57, %v737_v57  ;;  %v2293_v1 = vpop.f32.mrb[7].mxu0 }
 0x22e   : > { %v814_v4 = vand.u32 %v2701_v59, %v804_v63  ;;  %2297 = vmatmul.mubr.msk.bf16.vlgmr.msra.gmra.mrb[4].mxu1 %vm744_vm3, %v742_v62 }
 0x22f   : > { %2307 = vmatpush3.bf16.msra.mxu1 %v864_v61  ;;  %2310 = vmatprep.mubr.msk.bf16.mxu1 %vm2502_vm1, %v2501_v12 }
 0x230   : > { %2301 = vmatpush3.bf16.msra.mxu0 %v814_v4  ;;  %2308 = vmatprep.subr.bf16.mxu1 %v2501_v12 }
 0x231   : > { %2314 = vmatprep.subr.bf16.mxu0 %v2501_v12 }
 0x233   : > { %2309 = vmatpush3.bf16.msra.mxu1 %v865_v5 }
 0x234   : > { %2322 = vmatprep.subr.bf16.mxu1 %v2501_v12 }
 0x236   : > { %2311 = vmatmul.mubr.msk.bf16.vlgmr.msra.gmra.mrb[8].mxu1 %vm591_vm2, %v2662_v32 }
 0x237   : > { %2323 = vmatpush3.bf16.msra.mxu1 %v975_v8  ;;  %2326 = vmatprep.mubr.msk.bf16.mxu1 %vm2502_vm1, %v2501_v12 }
 0x238   : > { %2324 = vmatprep.subr.bf16.mxu1 %v2501_v12 }
 0x23b   : > { %2325 = vmatpush3.bf16.msra.mxu1 %v976_v11  ;;  %v1135_v11 = vpack.c.bf16 %v2139_v10, %v2139_v10 }
 0x23c   : > { %2336 = vmatprep.subr.bf16.mxu1 %v2501_v12 }
 0x23e   : > { %2327 = vmatmul.mubr.msk.bf16.vlgmr.msra.gmra.mrb[12].mxu1 %vm591_vm2, %v2662_v32 }
 0x23f   : > { %2338 = vmatprep.mubr.msk.bf16.mxu1 %vm2502_vm1, %v2501_v12 }
 0x301   : > { %v785_v13 = vpop.f32.mrb[4].mxu1 }
 0x302   : > { %v2298_v14 = vpop.f32.mrb[5].mxu1  ;;  %v792_v15 = vsel %vm791_vm6, %v785_v13, -inf }
 0x303   : > { %793 = vmax.xlane.f32.xlu1 %v792_v15  ;;  %v788_v16 = vpop.f32.mrb[6].mxu1  ;;  %v857_v15 = vld [vmem:[%s3049_s9] sm:$0xff] }
 0x304   : > { %v2299_v17 = vpop.f32.mrb[7].mxu1  ;;  %v858_v16 = vpack.c.bf16 %v857_v15, %v857_v15 }
 0x309   : > { %v908_v18 = vpop.f32.mrb[8].mxu1 }
 0x30a   : > { %v2312_v19 = vpop.f32.mrb[9].mxu1  ;;  %v909_v56 = vadd.f32 %v2121_v51, %v908_v18 }
 0x30b   : > { %v911_v20 = vpop.f32.mrb[10].mxu1 }
 0x30c   : > { %v2313_v21 = vpop.f32.mrb[11].mxu1  ;;  %v914_v61 = vmul.f32 0.35355338, %v909_v56  ;;  %v1187_v20 = vsel %vm1139_vm8, %v858_v16, 0 }
 0x30d   : > { %v2149_v21 = vld [vmem:[%s3045_s5 + $0x40] sm:$0xff] }
 0x30e   : > { %v1025_v62 = vpack.c.bf16 %v914_v61, %v914_v61 }
 0x311   : > { %v1019_v23 = vpop.f32.mrb[12].mxu1 }
 0x312   : > { %v1020_v24 = vadd.f32 %v2135_v22, %v1019_v23  ;;  %v2328_v25 = vpop.f32.mrb[13].mxu1  ;;  %v2150_v22 = vld [vmem:[%s3045_s5 + $0x48] sm:$0xff] }
 0x313   : > { %v1022_v26 = vpop.f32.mrb[14].mxu1  ;;  %v1290_v23 = vpack.c.bf16 %v2150_v22, %v2149_v21  ;;  %v2151_v25 = vld [vmem:[%s3045_s5 + $0x50] sm:$0xff] }
 0x314   : > { %v1085_v27 = vpack.c.bf16 %v1020_v24, %v1020_v24  ;;  %v2329_v28 = vpop.f32.mrb[15].mxu1  ;;  %v2152_v26 = vld [vmem:[%s3045_s5 + $0x58] sm:$0xff] }
 0x315   : > { %v2142_v28 = vld [vmem:[%s3043_s3 + $0x40] sm:$0xff] }
 0x316   : > { %v1090_v29 = vand.u32 %v1085_v27, %v2701_v59  ;;  %v1291_v27 = vpack.c.bf16 %v2152_v26, %v2151_v25 }
 0x318   : > { %2337 = vmatpush3.bf16.msra.mxu1 %v1090_v29  ;;  %v2143_v29 = vld [vmem:[%s3043_s3 + $0x48] sm:$0xff] }
 0x319   : > { %2348 = vmatprep.subr.bf16.mxu1 %v2501_v12 }
 0x390   : > { %v794_v30 = vpop.xlane.xlu1 %793 }
 0x391   : > { %v795_v31 = vsub.f32 %v785_v13, %v794_v30  ;;  %v1141_v13 = vsel %vm1139_vm8, %v1135_v11, 0 }
 0x393   : > { %v796_v33 = vmul.f32 1.442695, %v795_v31  ;;  %v1234_v31 = vpack.c.bf16 %v2143_v29, %v2142_v28  ;;  %v2165_v28 = vld [vmem:[%s3049_s9 + $0x10] sm:$0xff] }
 0x394   : > { %v1505_v29 = vpack.c.bf16 %v2165_v28, %v2165_v28 }
 0x395   : > { %2471 = vpow2.f32 %v796_v33 }
 0x39f   : > { %v2472_v34 = vpop.eup %2471 }
 0x3a0   : > { %v798_v35 = vsel %vm791_vm6, %v2472_v34, 0.0 }
 0x3a1   : > { %799 = vadd.xlane.f32.xlu1 %v798_v35  ;;  %v2144_v35 = vld [vmem:[%s3043_s3 + $0x50] sm:$0xff] }
 0x42e   : > { %v800_v36 = vpop.xlane.xlu1 %799 }
 0x42f   : > { %2473 = vrcp.f32 %v800_v36  ;;  %v2145_v36 = vld [vmem:[%s3043_s3 + $0x58] sm:$0xff] }
 0x439   : > { %v2474_v39 = vpop.eup %2473 }
 0x43a   : > { %v802_v40 = vmul.f32 %v2474_v39, %v2472_v34  ;;  %v1235_v39 = vpack.c.bf16 %v2145_v36, %v2144_v35 }
 0x43c   : > { %v803_v42 = vpack.c.bf16 %v802_v40, %v802_v40  ;;  %v2156_v40 = vld [vmem:[%s3047_s7 + $0x40] sm:$0xff] }
 0x43e   : > { %2303 = vmatmul.mubr.msk.bf16.vlgmr.msra.gmra.mrb[8].mxu0 %vm805_vm7, %v803_v42 }
 0x43f   : > { %2315 = vmatpush3.bf16.msra.mxu0 %v920_v41  ;;  %2318 = vmatprep.mubr.msk.bf16.mxu0 %vm2502_vm1, %v2501_v12  ;;  %v2157_v41 = vld [vmem:[%s3047_s7 + $0x48] sm:$0xff] }
 0x440   : > { %2316 = vmatprep.subr.bf16.mxu0 %v2501_v12  ;;  %v1345_v43 = vpack.c.bf16 %v2157_v41, %v2156_v40  ;;  %v2170_v40 = vld [vmem:[%s3043_s3 + $0x78] sm:$0xff] }
 0x443   : > { %2317 = vmatpush3.bf16.msra.mxu0 %v921_v45  ;;  %v2158_v45 = vld [vmem:[%s3047_s7 + $0x50] sm:$0xff] }
 0x444   : > { %2330 = vmatprep.subr.bf16.mxu0 %v2501_v12 }
 0x446   : > { %2319 = vmatmul.mubr.msk.bf16.vlgmr.msra.gmra.mrb[12].mxu0 %vm591_vm2, %v2662_v32 }
 0x447   : > { %2332 = vmatprep.mubr.msk.bf16.mxu0 %vm2502_vm1, %v2501_v12 }
 0x511   : > { %v850_v46 = vpop.f32.mrb[8].mxu0 }
 0x512   : > { %v2304_v47 = vpop.f32.mrb[9].mxu0  ;;  %v856_v24 = vpack.c.bf16 %v850_v46, %v850_v46  ;;  %v2159_v46 = vld [vmem:[%s3047_s7 + $0x58] sm:$0xff] }
 0x513   : > { %v853_v48 = vpop.f32.mrb[10].mxu0 }
 0x514   : > { %v2305_v49 = vpop.f32.mrb[11].mxu0 }
 0x515   : > { %v1346_v49 = vpack.c.bf16 %v2159_v46, %v2158_v45  ;;  %v2183_v45 = vld [vmem:[%s3047_s7 + $0x70] sm:$0xff]  ;;  %v2184_v46 = vld [vmem:[%s3047_s7 + $0x78] sm:$0xff] }
 0x519   : > { %v964_v52 = vpop.f32.mrb[12].mxu0 }
 0x51a   : > { %v965_v53 = vadd.f32 %v2128_v50, %v964_v52  ;;  %v2320_v54 = vpop.f32.mrb[13].mxu0  ;;  %v2154_v50 = vld [vmem:[%s3046_s6 + $0x2] ss:$0 sm:$0xff] }
 0x51b   : > { %v967_v55 = vpop.f32.mrb[14].mxu0 }
 0x51c   : > { %v1026_v57 = vpack.c.bf16 %v965_v53, %v965_v53  ;;  %v2321_v58 = vpop.f32.mrb[15].mxu0 }
 0x51e   : > { %v1031_v60 = vsel %vm744_vm3, %v1026_v57, 0 }
 0x51f   : > { %2331 = vmatpush3.bf16.xpose.msra.mxu0 %v1031_v60 }
 0x520   : > { %2342 = vmatprep.subr.bf16.mxu0 %v2501_v12 }
 0x526   : > { %2333 = vmatmul.mubr.msk.bf16.vlgmr.msra.gmra.mrb[16].mxu0 %vm744_vm3, %v1025_v62 }
 0x527   : > { %2344 = vmatprep.mubr.msk.bf16.mxu0 %vm2502_vm1, %v2501_v12  ;;  %2343 = vmatpush3.bf16.msra.mxu0 %v1141_v13 }
 0x528   : > { %2354 = vmatprep.subr.bf16.mxu0 %v2501_v12 }
 0x5f9   : > { %v1067_v63 = vpop.f32.mrb[16].mxu0 }
 0x5fa   : > { %v2334_v1 = vpop.f32.mrb[17].mxu0  ;;  %v1073_v2 = vsel %vm791_vm6, %v1067_v63, -inf }
 0x5fb   : > { %1074 = vmax.xlane.f32.xlu0 %v1073_v2  ;;  %v1070_v3 = vpop.f32.mrb[18].mxu0  ;;  %v2147_v1 = vld [vmem:[%s3044_s4 + $0x2] ss:$0 sm:$0xff] }
 0x5fc   : > { %v2335_v4 = vpop.f32.mrb[19].mxu0 }
 0x688   : > { %v1075_v5 = vpop.xlane.xlu0 %1074 }
 0x689   : > { %v1076_v6 = vsub.f32 %v1067_v63, %v1075_v5 }
 0x68b   : > { %v1077_v7 = vmul.f32 1.442695, %v1076_v6 }
 0x68d   : > { %2475 = vpow2.f32 %v1077_v7 }
 0x697   : > { %v2476_v8 = vpop.eup %2475 }
 0x698   : > { %v1079_v9 = vsel %vm791_vm6, %v2476_v8, 0.0 }
 0x699   : > { %1080 = vadd.xlane.f32.xlu1 %v1079_v9  ;;  %v2161_v9 = vld [vmem:[%s3048_s8 + $0x2] ss:$0 sm:$0xff] }
 0x726   : > { %v1081_v14 = vpop.xlane.xlu1 %1080 }
 0x727   : > { %2477 = vrcp.f32 %v1081_v14 }
 0x731   : > { %v2478_v17 = vpop.eup %2477 }
 0x732   : > { %v1083_v18 = vmul.f32 %v2478_v17, %v2476_v8 }
 0x734   : > { %v1084_v19 = vpack.c.bf16 %v1083_v18, %v1083_v18 }
 0x736   : > { %2339 = vmatmul.mubr.msk.bf16.vlgmr.msra.gmra.mrb[16].mxu1 %vm805_vm7, %v1084_v19 }
 0x737   : > { %2349 = vmatpush3.bf16.msra.mxu1 %v1187_v20  ;;  %2350 = vmatprep.mubr.msk.bf16.mxu1 %vm2502_vm1, %v2501_v12 }
 0x738   : > { %2362 = vmatprep.subr.bf16.mxu1 %v2501_v12 }
 0x73e   : > { %2351 = vmatmul.mubr.msk.bf16.vlgmr.msra.gmra.mrb[20].mxu1 %vm744_vm3, %v856_v24 }
 0x73f   : > { %2363 = vmatpush3.bf16.msra.mxu1 %v1290_v23  ;;  %2366 = vmatprep.mubr.msk.bf16.mxu1 %vm2502_vm1, %v2501_v12 }
 0x740   : > { %2364 = vmatprep.subr.bf16.mxu1 %v2501_v12 }
 0x743   : > { %2365 = vmatpush3.bf16.msra.mxu1 %v1291_v27 }
 0x744   : > { %2378 = vmatprep.subr.bf16.mxu1 %v2501_v12 }
 0x746   : > { %2367 = vmatmul.mubr.msk.bf16.vlgmr.msra.gmra.mrb[24].mxu1 %vm591_vm2, %v2662_v32 }
 0x747   : > { %2380 = vmatprep.mubr.msk.bf16.mxu1 %vm2502_vm1, %v2501_v12 }
 0x809   : > { %v1126_v30 = vpop.f32.mrb[16].mxu1 }
 0x80a   : > { %v1132_v33 = vpack.c.bf16 %v1126_v30, %v1126_v30  ;;  %v2340_v34 = vpop.f32.mrb[17].mxu1  ;;  %v1510_v30 = vsel %vm1139_vm8, %v1505_v29, 0 }
 0x80b   : > { %v1129_v37 = vpop.f32.mrb[18].mxu1  ;;  %v2168_v34 = vld [vmem:[%s3043_s3 + $0x68] sm:$0xff] }
 0x80c   : > { %v2341_v38 = vpop.f32.mrb[19].mxu1  ;;  %2345 = vmatmul.mubr.msk.bf16.vlgmr.msra.gmra.mrb[20].mxu0 %vm744_vm3, %v1132_v33  ;;  %v2167_v33 = vld [vmem:[%s3043_s3 + $0x60] sm:$0xff] }
 0x80d   : > { %2355 = vmatpush3.bf16.msra.mxu0 %v1234_v31  ;;  %2358 = vmatprep.mubr.msk.bf16.mxu0 %vm2502_vm1, %v2501_v12  ;;  %v1558_v37 = vpack.c.bf16 %v2168_v34, %v2167_v33 }
 0x80e   : > { %2356 = vmatprep.subr.bf16.mxu0 %v2501_v12 }
 0x811   : > { %v1223_v42 = vpop.f32.mrb[20].mxu1  ;;  %2357 = vmatpush3.bf16.msra.mxu0 %v1235_v39  ;;  %v2169_v39 = vld [vmem:[%s3043_s3 + $0x70] sm:$0xff] }
 0x812   : > { %v2352_v44 = vpop.f32.mrb[21].mxu1  ;;  %2370 = vmatprep.subr.bf16.mxu0 %v2501_v12  ;;  %v1559_v41 = vpack.c.bf16 %v2170_v40, %v2169_v39 }
 0x813   : > { %v1226_v47 = vpop.f32.mrb[22].mxu1 }
 0x814   : > { %v2353_v48 = vpop.f32.mrb[23].mxu1  ;;  %2359 = vmatmul.mubr.msk.bf16.vlgmr.msra.gmra.mrb[24].mxu0 %vm591_vm2, %v2662_v32  ;;  %v1670_v47 = vpack.c.bf16 %v2184_v46, %v2183_v45 }
 0x815   : > { %2371 = vmatpush3.bf16.msra.mxu0 %v1345_v43  ;;  %2374 = vmatprep.mubr.msk.bf16.mxu0 %vm2502_vm1, %v2501_v12  ;;  %v2182_v43 = vld [vmem:[%s3047_s7 + $0x68] sm:$0xff]  ;;  %v2174_v48 = vld [vmem:[%s3045_s5 + $0x60] sm:$0xff] }
 0x816   : > { %2372 = vmatprep.subr.bf16.mxu0 %v2501_v12 }
 0x819   : > { %v1334_v51 = vpop.f32.mrb[24].mxu1  ;;  %2373 = vmatpush3.bf16.msra.mxu0 %v1346_v49  ;;  %v2175_v49 = vld [vmem:[%s3045_s5 + $0x68] sm:$0xff] }
 0x81a   : > { %v1335_v52 = vadd.f32 %v2154_v50, %v1334_v51  ;;  %v2368_v53 = vpop.f32.mrb[25].mxu1  ;;  %2384 = vmatprep.subr.bf16.mxu0 %v2501_v12  ;;  %v1614_v51 = vpack.c.bf16 %v2175_v49, %v2174_v48  ;;  %v2192_v49 = vld [vmem:[%s3050_s10] ss:$0 sm:$0xff] }
 0x81b   : > { %v1337_v54 = vpop.f32.mrb[26].mxu1 }
 0x81c   : > { %v1396_v55 = vpack.c.bf16 %v1335_v52, %v1335_v52  ;;  %v2369_v56 = vpop.f32.mrb[27].mxu1  ;;  %2375 = vmatmul.mubr.msk.bf16.vlgmr.msra.gmra.mrb[28].mxu0 %vm591_vm2, %v2662_v32  ;;  %v2176_v54 = vld [vmem:[%s3045_s5 + $0x70] sm:$0xff] }
 0x81d   : > { %2386 = vmatprep.mubr.msk.bf16.mxu0 %vm2502_vm1, %v2501_v12 }
 0x81e   : > { %v1401_v57 = vsel %vm744_vm3, %v1396_v55, 0  ;;  %v2177_v55 = vld [vmem:[%s3045_s5 + $0x78] sm:$0xff] }
 0x81f   : > { %2379 = vmatpush3.bf16.xpose.msra.mxu1 %v1401_v57 }
 0x820   : > { %2390 = vmatprep.subr.bf16.mxu1 %v2501_v12 }
 0x8df   : > { %v1177_v58 = vpop.f32.mrb[20].mxu0 }
 0x8e0   : > { %v2857_v60 = vadd.f32 %v1223_v42, %v1177_v58  ;;  %v2346_v61 = vpop.f32.mrb[21].mxu0  ;;  %v2181_v42 = vld [vmem:[%s3047_s7 + $0x60] sm:$0xff]  ;;  %v1615_v58 = vpack.c.bf16 %v2177_v55, %v2176_v54 }
 0x8e1   : > { %v1180_v62 = vpop.f32.mrb[22].mxu0  ;;  %v1669_v44 = vpack.c.bf16 %v2182_v43, %v2181_v42 }
 0x8e2   : > { %v2347_v63 = vpop.f32.mrb[23].mxu0 }
 0x8e7   : > { %v1278_v2 = vpop.f32.mrb[24].mxu0 }
 0x8e8   : > { %v1279_v3 = vadd.f32 %v2147_v1, %v1278_v2  ;;  %v2360_v4 = vpop.f32.mrb[25].mxu0  ;;  %v2186_v2 = vld [vmem:[%s3048_s8 + $0x3] ss:$0 sm:$0xff] }
 0x8e9   : > { %v1281_v5 = vpop.f32.mrb[26].mxu0 }
 0x8ea   : > { %v1284_v6 = vmul.f32 0.35355338, %v1279_v3  ;;  %v2361_v7 = vpop.f32.mrb[27].mxu0 }
 0x8ec   : > { %v1395_v8 = vpack.c.bf16 %v1284_v6, %v1284_v6 }
 0x8ee   : > { %2381 = vmatmul.mubr.msk.bf16.vlgmr.msra.gmra.mrb[28].mxu1 %vm744_vm3, %v1395_v8 }
 0x8ef   : > { %v1389_v10 = vpop.f32.mrb[28].mxu0  ;;  %2392 = vmatprep.mubr.msk.bf16.mxu1 %vm2502_vm1, %v2501_v12  ;;  %2391 = vmatpush3.bf16.msra.mxu1 %v1510_v30 }
 0x8f0   : > { %v1390_v11 = vadd.f32 %v2161_v9, %v1389_v10  ;;  %v2376_v13 = vpop.f32.mrb[29].mxu0  ;;  %2404 = vmatprep.subr.bf16.mxu1 %v2501_v12 }
 0x8f1   : > { %v1392_v14 = vpop.f32.mrb[30].mxu0 }
 0x8f2   : > { %v1455_v15 = vpack.c.bf16 %v1390_v11, %v1390_v11  ;;  %v2377_v16 = vpop.f32.mrb[31].mxu0 }
 0x8f3   : > { %v2172_v16 = vld [vmem:[%s3044_s4 + $0x3] ss:$0 sm:$0xff] }
 0x8f4   : > { %v1460_v17 = vand.u32 %v1455_v15, %v2701_v59  ;;  %v2179_v15 = vld [vmem:[%s3046_s6 + $0x3] ss:$0 sm:$0xff] }
 0x8f6   : > { %2385 = vmatpush3.bf16.msra.mxu0 %v1460_v17 }
 0x8f7   : > { %2396 = vmatprep.subr.bf16.mxu0 %v2501_v12 }
 0x9c1   : > { %v1437_v18 = vpop.f32.mrb[28].mxu1 }
 0x9c2   : > { %v2382_v19 = vpop.f32.mrb[29].mxu1  ;;  %v1443_v20 = vsel %vm791_vm6, %v1437_v18, -inf }
 0x9c3   : > { %1444 = vmax.xlane.f32.xlu0 %v1443_v20  ;;  %v1440_v21 = vpop.f32.mrb[30].mxu1 }
 0x9c4   : > { %v2383_v22 = vpop.f32.mrb[31].mxu1 }
 0xa50   : > { %v1445_v23 = vpop.xlane.xlu0 %1444 }
 0xa51   : > { %v1446_v24 = vsub.f32 %v1437_v18, %v1445_v23 }
 0xa53   : > { %v1447_v25 = vmul.f32 1.442695, %v1446_v24 }
 0xa55   : > { %2479 = vpow2.f32 %v1447_v25 }
 0xa5f   : > { %v2480_v26 = vpop.eup %2479 }
 0xa60   : > { %v1449_v27 = vsel %vm791_vm6, %v2480_v26, 0.0 }
 0xa61   : > { %1450 = vadd.xlane.f32.xlu1 %v1449_v27 }
 0xaee   : > { %v1451_v31 = vpop.xlane.xlu1 %1450 }
 0xaef   : > { %2481 = vrcp.f32 %v1451_v31 }
 0xaf9   : > { %v2482_v35 = vpop.eup %2481 }
 0xafa   : > { %v1453_v36 = vmul.f32 %v2482_v35, %v2480_v26 }
 0xafc   : > { %v1454_v38 = vpack.c.bf16 %v1453_v36, %v1453_v36  ;;  %v2190_v36 = vld [vmem:[%s3049_s9 + $0x18] sm:$0xff] }
 0xafe   : > { %2387 = vmatmul.mubr.msk.bf16.vlgmr.msra.gmra.mrb[32].mxu0 %vm805_vm7, %v1454_v38 }
 0xaff   : > { %2397 = vmatpush3.bf16.msra.mxu0 %v1558_v37  ;;  %2400 = vmatprep.mubr.msk.bf16.mxu0 %vm2502_vm1, %v2501_v12  ;;  %v1829_v37 = vpack.c.bf16 %v2190_v36, %v2190_v36 }
 0xb00   : > { %2398 = vmatprep.subr.bf16.mxu0 %v2501_v12 }
 0xb01   : > { %v1834_v38 = vsel %vm1139_vm8, %v1829_v37, 0 }
 0xb03   : > { %2399 = vmatpush3.bf16.msra.mxu0 %v1559_v41 }
 0xb04   : > { %2412 = vmatprep.subr.bf16.mxu0 %v2501_v12 }
 0xb06   : > { %2401 = vmatmul.mubr.msk.bf16.vlgmr.msra.gmra.mrb[36].mxu0 %vm591_vm2, %v2662_v32 }
 0xb07   : > { %2413 = vmatpush3.bf16.msra.mxu0 %v1669_v44  ;;  %2416 = vmatprep.mubr.msk.bf16.mxu0 %vm2502_vm1, %v2501_v12 }
 0xb08   : > { %2414 = vmatprep.subr.bf16.mxu0 %v2501_v12 }
 0xb0b   : > { %2415 = vmatpush3.bf16.msra.mxu0 %v1670_v47 }
 0xb0c   : > { %2426 = vmatprep.subr.bf16.mxu0 %v2501_v12 }
 0xb0e   : > { %2417 = vmatmul.mubr.msk.bf16.vlgmr.msra.gmra.mrb[40].mxu0 %vm591_vm2, %v2662_v32 }
 0xb0f   : > { %2428 = vmatprep.mubr.msk.bf16.mxu0 %vm2502_vm1, %v2501_v12 }
 0xbd1   : > { %v1496_v50 = vpop.f32.mrb[32].mxu0 }
 0xbd2   : > { %v1502_v52 = vpack.c.bf16 %v1496_v50, %v1496_v50  ;;  %v2388_v53 = vpop.f32.mrb[33].mxu0 }
 0xbd3   : > { %v1499_v56 = vpop.f32.mrb[34].mxu0 }
 0xbd4   : > { %v2389_v57 = vpop.f32.mrb[35].mxu0  ;;  %2393 = vmatmul.mubr.msk.bf16.vlgmr.msra.gmra.mrb[32].mxu1 %vm744_vm3, %v1502_v52 }
 0xbd5   : > { %2405 = vmatpush3.bf16.msra.mxu1 %v1614_v51  ;;  %2408 = vmatprep.mubr.msk.bf16.mxu1 %vm2502_vm1, %v2501_v12 }
 0xbd6   : > { %2406 = vmatprep.subr.bf16.mxu1 %v2501_v12 }
 0xbd9   : > { %v1602_v61 = vpop.f32.mrb[36].mxu0  ;;  %2407 = vmatpush3.bf16.msra.mxu1 %v1615_v58 }
 0xbda   : > { %v2402_v62 = vpop.f32.mrb[37].mxu0  ;;  %2420 = vmatprep.subr.bf16.mxu1 %v2501_v12  ;;  %v1603_v20 = vadd.f32 %v2172_v16, %v1602_v61  ;;  %v1980_v16 = vld [vmem:[%s3055_s15] sm:$0xff] }
 0xbdb   : > { %v1605_v63 = vpop.f32.mrb[38].mxu0 }
 0xbdc   : > { %v2403_v1 = vpop.f32.mrb[39].mxu0  ;;  %2409 = vmatmul.mubr.msk.bf16.vlgmr.msra.gmra.mrb[36].mxu1 %vm591_vm2, %v2662_v32  ;;  %v1608_v23 = vmul.f32 0.35355338, %v1603_v20 }
 0xbdd   : > { %2422 = vmatprep.mubr.msk.bf16.mxu1 %vm2502_vm1, %v2501_v12  ;;  %v1915_v1 = vld [vmem:[%s3053_s13] sm:$0xff] }
 0xbde   : > { %v1719_v24 = vpack.c.bf16 %v1608_v23, %v1608_v23  ;;  %v1986_v23 = vld [vmem:[%s3055_s15 + $0x30] sm:$0xff] }
 0xbe1   : > { %v1713_v3 = vpop.f32.mrb[40].mxu0 }
 0xbe2   : > { %v1714_v4 = vadd.f32 %v2186_v2, %v1713_v3  ;;  %v2418_v5 = vpop.f32.mrb[41].mxu0  ;;  %v1917_v3 = vld [vmem:[%s3053_s13 + $0x10] sm:$0xff] }
 0xbe3   : > { %v1716_v6 = vpop.f32.mrb[42].mxu0 }
 0xbe4   : > { %v1779_v7 = vpack.c.bf16 %v1714_v4, %v1714_v4  ;;  %v2419_v8 = vpop.f32.mrb[43].mxu0  ;;  %v1918_v4 = vld [vmem:[%s3053_s13 + $0x18] sm:$0xff] }
 0xbe5   : > { %v1922_v5 = vpack.c.bf16 %v1918_v4, %v1917_v3 }
 0xbe6   : > { %v1784_v9 = vand.u32 %v1779_v7, %v2701_v59 }
 0xbe8   : > { %2427 = vmatpush3.bf16.msra.mxu0 %v1784_v9 }
 0xbe9   : > { %2438 = vmatprep.subr.bf16.mxu0 %v2501_v12 }
 0xca7   : > { %v1546_v10 = vpop.f32.mrb[32].mxu1 }
 0xca8   : > { %v1552_v32 = vadd.f32 %v1546_v10, %v2857_v60  ;;  %v2394_v11 = vpop.f32.mrb[33].mxu1  ;;  %v2193_v10 = vld [vmem:[%s3051_s11] ss:$0 sm:$0xff] }
 0xca9   : > { %v1549_v13 = vpop.f32.mrb[34].mxu1  ;;  %v2194_v11 = vld [vmem:[%s3052_s12] ss:$0 sm:$0xff] }
 0xcaa   : > { %v2395_v14 = vpop.f32.mrb[35].mxu1 }
 0xcaf   : > { %v1658_v17 = vpop.f32.mrb[36].mxu1 }
 0xcb0   : > { %v1659_v18 = vadd.f32 %v2179_v15, %v1658_v17  ;;  %v2410_v59 = vpop.f32.mrb[37].mxu1  ;;  %v1981_v17 = vld [vmem:[%s3055_s15 + $0x8] sm:$0xff] }
 0xcb1   : > { %v1661_v19 = vpop.f32.mrb[38].mxu1  ;;  %v1982_v59 = vld [vmem:[%s3055_s15 + $0x10] sm:$0xff] }
 0xcb2   : > { %v1720_v21 = vpack.c.bf16 %v1659_v18, %v1659_v18  ;;  %v2411_v22 = vpop.f32.mrb[39].mxu1  ;;  %v1990_v18 = vpack.c.bf16 %v1981_v17, %v1980_v16  ;;  %v1983_v19 = vld [vmem:[%s3055_s15 + $0x18] sm:$0xff] }
 0xcb3   : > { %v1991_v20 = vpack.c.bf16 %v1983_v19, %v1982_v59  ;;  %v1985_v22 = vld [vmem:[%s3055_s15 + $0x28] sm:$0xff] }
 0xcb4   : > { %v1725_v60 = vsel %vm744_vm3, %v1720_v21, 0  ;;  %v1984_v21 = vld [vmem:[%s3055_s15 + $0x20] sm:$0xff] }
 0xcb5   : > { %2421 = vmatpush3.bf16.xpose.msra.mxu1 %v1725_v60  ;;  %v1992_v60 = vpack.c.bf16 %v1985_v22, %v1984_v21 }
 0xcb6   : > { %2432 = vmatprep.subr.bf16.mxu1 %v2501_v12 }
 0xcbc   : > { %2423 = vmatmul.mubr.msk.bf16.vlgmr.msra.gmra.mrb[40].mxu1 %vm744_vm3, %v1719_v24  ;;  %v1987_v24 = vld [vmem:[%s3055_s15 + $0x38] sm:$0xff] }
 0xcbd   : > { %2434 = vmatprep.mubr.msk.bf16.mxu1 %vm2502_vm1, %v2501_v12  ;;  %2433 = vmatpush3.bf16.msra.mxu1 %v1834_v38 }
 0xcbe   : > { %2446 = vmatprep.subr.bf16.mxu1 %v2501_v12 }
 0xd8f   : > { %v1761_v25 = vpop.f32.mrb[40].mxu1 }
 0xd90   : > { %v2424_v26 = vpop.f32.mrb[41].mxu1  ;;  %v1767_v27 = vsel %vm791_vm6, %v1761_v25, -inf }
 0xd91   : > { %1768 = vmax.xlane.f32.xlu0 %v1767_v27  ;;  %v1764_v28 = vpop.f32.mrb[42].mxu1  ;;  %v2195_v26 = vld [vmem:[%s3054_s14] ss:$0 sm:$0xff] }
 0xd92   : > { %v2425_v29 = vpop.f32.mrb[43].mxu1 }
 0xe1e   : > { %v1769_v30 = vpop.xlane.xlu0 %1768 }
 0xe1f   : > { %v1770_v31 = vsub.f32 %v1761_v25, %v1769_v30  ;;  %v1993_v25 = vpack.c.bf16 %v1987_v24, %v1986_v23 }
 0xe21   : > { %v1771_v33 = vmul.f32 1.442695, %v1770_v31 }
 0xe23   : > { %2483 = vpow2.f32 %v1771_v33 }
 0xe2d   : > { %v2484_v34 = vpop.eup %2483 }
 0xe2e   : > { %v1773_v35 = vsel %vm791_vm6, %v2484_v34, 0.0 }
 0xe2f   : > { %1774 = vadd.xlane.f32.xlu1 %v1773_v35 }
 0xebc   : > { %v1775_v39 = vpop.xlane.xlu1 %1774 }
 0xebd   : > { %2485 = vrcp.f32 %v1775_v39  ;;  %v2198_v39 = vld [vmem:[%s3056_s16] ss:$0 sm:$0xff] }
 0xec7   : > { %v2486_v40 = vpop.eup %2485 }
 0xec8   : > { %v1777_v41 = vmul.f32 %v2486_v40, %v2484_v34 }
 0xeca   : > { %v1778_v42 = vpack.c.bf16 %v1777_v41, %v1777_v41 }
 0xecc   : > { %2429 = vmatmul.mubr.msk.bf16.vlgmr.msra.gmra.mrb[44].mxu0 %vm805_vm7, %v1778_v42 }
 0xecd   : > { %2442 = vmatprep.mubr.msk.bf16.mxu0 %vm2502_vm1, %v2501_v12 }
 0xf9f   : > { %v1820_v43 = vpop.f32.mrb[44].mxu0 }
 0xfa0   : > { %v1826_v44 = vpack.c.bf16 %v1820_v43, %v1820_v43  ;;  %v2430_v45 = vpop.f32.mrb[45].mxu0 }
 0xfa1   : > { %v1823_v46 = vpop.f32.mrb[46].mxu0 }
 0xfa2   : > { %v2431_v47 = vpop.f32.mrb[47].mxu0  ;;  %2435 = vmatmul.mubr.msk.bf16.vlgmr.msra.gmra.mrb[44].mxu1 %vm744_vm3, %v1826_v44 }
 0xfa3   : > { %2454 = vmatprep.mubr.msk.bf16.mxu1 %vm2502_vm1, %v2501_v12  ;;  %2447 = vmatpush3.bf16.msra.mxu1 %v1990_v18 }
 0xfa4   : > { %2448 = vmatprep.subr.bf16.mxu1 %v2501_v12 }
 0xfa7   : > { %2449 = vmatpush3.bf16.msra.mxu1 %v1991_v20 }
 0xfa8   : > { %2450 = vmatprep.subr.bf16.mxu1 %v2501_v12 }
 0xfab   : > { %2451 = vmatpush3.bf16.msra.mxu1 %v1992_v60 }
 0xfac   : > { %2452 = vmatprep.subr.bf16.mxu1 %v2501_v12 }
 0xfaf   : > { %2453 = vmatpush3.bf16.msra.mxu1 %v1993_v25 }
0x1075   : > { %v1870_v48 = vpop.f32.mrb[44].mxu1 }
0x1076   : > { %v1876_v50 = vadd.f32 %v1870_v48, %v1552_v32  ;;  %v2436_v51 = vpop.f32.mrb[45].mxu1 }
0x1077   : > { %v1873_v52 = vpop.f32.mrb[46].mxu1 }
0x1078   : > { %v1884_v53 = vadd.f32 %v2192_v49, %v1876_v50  ;;  %v2437_v54 = vpop.f32.mrb[47].mxu1 }
0x107a   : > { %v2971_v55 = vadd.f32 %v1884_v53, %v2610_v0  ;;  %v1916_v0 = vld [vmem:[%s3053_s13 + $0x8] sm:$0xff] }
0x107b   : > { %v1921_v2 = vpack.c.bf16 %v1916_v0, %v1915_v1 }
0x107c   : > { %v1888_v56 = vsel %vm548_vm0, %v2971_v55, 0.0 }
0x107d   : > { %1889 = vadd.xlane.f32.xlu0 %v1888_v56  ;;  %2439 = vmatpush3.bf16.msra.mxu0 %v1921_v2 }
0x107e   : > { %2440 = vmatprep.subr.bf16.mxu0 %v2501_v12 }
0x1081   : > { %2441 = vmatpush3.bf16.msra.mxu0 %v1922_v5 }
0x110a   : > { %v1890_v57 = vpop.xlane.xlu0 %1889 }
0x110b   : > { %v1891_v58 = vmul.f32 0.03125, %v1890_v57 }
0x110d   : > { %v1892_v61 = vsub.f32 %v2971_v55, %v1891_v58 }
0x110f   : > { %v1893_v62 = vmul.f32 %v1892_v61, %v1892_v61 }
0x1111   : > { %v1894_v63 = vsel %vm548_vm0, %v1893_v62, 0.0 }
0x1112   : > { %1895 = vadd.xlane.f32.xlu1 %v1894_v63 }
0x119f   : > { %v1896_v6 = vpop.xlane.xlu1 %1895 }
0x11a0   : > { %v1897_v7 = vmul.f32 0.03125, %v1896_v6 }
0x11a2   : > { %v1898_v8 = vadd.f32 1e-05, %v1897_v7 }
0x11a4   : > { %2487 = vrsqrt.f32 %v1898_v8 }
0x11ae   : > { %v2488_v9 = vpop.eup %2487 }
0x11af   : > { %v1900_v32 = vmul.f32 %v2488_v9, %v1892_v61 }
0x11b1   : > { %v1907_v13 = vmul.f32 %v2193_v10, %v1900_v32 }
0x11b3   : > { %v1914_v14 = vadd.f32 %v2194_v11, %v1907_v13 }
0x11b5   : > { %v1920_v15 = vpack.c.bf16 %v1914_v14, %v1914_v14 }
0x11b7   : > { %2443 = vmatmul.mubr.msk.bf16.vlgmr.msra.gmra.mrb[48].mxu0 %vm591_vm2, %v1920_v15 }
0x128a   : > { %v1966_v27 = vpop.f32.mrb[48].mxu0 }
0x128b   : > { %v1967_v28 = vadd.f32 %v2195_v26, %v1966_v27  ;;  %v2444_v29 = vpop.f32.mrb[49].mxu0 }
0x128c   : > { %v1969_v30 = vpop.f32.mrb[50].mxu0 }
0x128d   : > { %v2197_v31 = vmul.f32 -1.702, %v1967_v28  ;;  %v2445_v12 = vpop.f32.mrb[51].mxu0 }
0x128f   : > { %v1974_v33 = vmul.f32 1.442695, %v2197_v31 }
0x1291   : > { %2489 = vpow2.f32 %v1974_v33 }
0x129b   : > { %v2490_v34 = vpop.eup %2489 }
0x129c   : > { %v1976_v35 = vadd.f32 1.0, %v2490_v34 }
0x129e   : > { %2491 = vrcp.f32 %v1976_v35 }
0x12a8   : > { %v2492_v36 = vpop.eup %2491 }
0x12a9   : > { %v1979_v37 = vmul.f32 %v2492_v36, %v1967_v28 }
0x12ab   : > { %v1989_v38 = vpack.c.bf16 %v1979_v37, %v1979_v37 }
0x12ad   : > { %2455 = vmatmul.mubr.msk.bf16.vlgmr.msra.gmra.mrb[48].mxu1 %vm2000_vm9, %v1989_v38 }
0x1380   : > { %v2038_v40 = vpop.f32.mrb[48].mxu1 }
0x1381   : > { %v2039_v41 = vadd.f32 %v2198_v39, %v2038_v40  ;;  %v2456_v42 = vpop.f32.mrb[49].mxu1 }
0x1382   : > { %v2041_v43 = vpop.f32.mrb[50].mxu1 }
0x1383   : > { %v2044_v44 = vadd.f32 %v2039_v41, %v2971_v55  ;;  %v2457_v45 = vpop.f32.mrb[51].mxu1 }
0x1385   : > { %2045 = vst.msk [vmem:[%s543_s18] sm:$0x1f] %vm548_vm0, %v2044_v44 }
0x1386 PF: > { %s27_s24 = sadd.s32 1, %s2499_s24  }
0x1387   : > { %p24_p4 = scmp.ge.s32.totalorder %s27_s24, 10  }
0x1389   :  { %26 = sbr.rel (!%p24_p4) target bundleno = 3 (0x3), region = 139 }

// kernel: model_forward.24
= control target key start
LH: loop header
LB: loop body
LE: loop exit
PB: predicated region body
PF: predicated region fallthrough
CT: control target
= control target key end

     0   :  { %s2331_s25 = smov 0   ;;  %s2729_s0 = inlined_call_operand.vmem [shape: f32[8,4,32], index: 0, kind: input, shape index: {}]   ;;  %s2730_s1 = inlined_call_operand.vmem [shape: f32[1,32], index: 1, kind: input, shape index: {}]   ;;  %s2731_s2 = inlined_call_operand.vmem [shape: f32[1,32], index: 2, kind: input, shape index: {}, may-alias: {2,10,12}]   ;;  %s2732_s3 = inlined_call_operand.vmem [shape: f32[4,32,8], index: 3, kind: input, shape index: {}]   ;;  %s2733_s4 = inlined_call_operand.vmem [shape: f32[4,1,8], index: 4, kind: input, shape index: {}, may-alias: {4,6,8}]   ;;  %s2734_s5 = inlined_call_operand.vmem [shape: f32[4,32,8], index: 5, kind: input, shape index: {}]   ;;  %s2735_s6 = inlined_call_operand.vmem [shape: f32[4,1,8], index: 6, kind: input, shape index: {}, may-alias: {4,6,8}]   ;;  %s2736_s7 = inlined_call_operand.vmem [shape: f32[4,32,8], index: 7, kind: input, shape index: {}]   ;;  %s2737_s8 = inlined_call_operand.vmem [shape: f32[4,1,8], index: 8, kind: input, shape index: {}, may-alias: {4,6,8}]   ;;  %s2738_s9 = inlined_call_operand.vmem [shape: f32[4,8,32], index: 9, kind: input, shape index: {}]   ;;  %s2739_s10 = inlined_call_operand.vmem [shape: f32[1,32], index: 10, kind: input, shape index: {}, may-alias: {2,10,12}]   ;;  %s2740_s11 = inlined_call_operand.vmem [shape: f32[32,32], index: 11, kind: input, shape index: {}]   ;;  %s2741_s12 = inlined_call_operand.vmem [shape: f32[1,32], index: 12, kind: input, shape index: {}, may-alias: {2,10,12}]   ;;  %s2742_s13 = inlined_call_operand.vmem [shape: f32[8,4,32], index: 13, kind: output, shape index: {}]  }
   0x1 LB: > { %s1886_s26 = sadd.s32 4294967295, %s2257_s25   ;;  %p1890_p0 = scmp.ge.s32.totalorder %s2257_s25, 1  ;;  %s2257_s25 = sphi %s2331_s25, %s23_s25  }
   0x2   : > { %p386_p1 = scmp.lt.s32.totalorder %s2257_s25, 9 }
   0x4   : > { %p387_p2 = pnand %p1890_p0, %p386_p1 }
   0x5   : > { %p428_p3 = scmp.lt.s32.totalorder (!%p387_p2), %s1886_s26, 7  ;;  %vm440_vm0 = vcmask (!%p387_p2), 257024   ;;  %v470_v7 = vld [vmem:[%s2732_s3] sm:$0xff] (!%p387_p2)  ;;  %v471_v8 = vld [vmem:[%s2732_s3 + $0x8] sm:$0xff] (!%p387_p2)  ;;  %v2259_v12 = vmov (!%p387_p2), 0.0   ;;  %v472_v14 = vld [vmem:[%s2732_s3 + $0x10] sm:$0xff] (!%p387_p2) }
   0x6   : > { %390 = sbr.rel (%p387_p2) target bundleno = 4435 (0x1153), region = 72  ;;  %v528_v9 = vld [vmem:[%s2734_s5] sm:$0xff] (!%p387_p2)  ;;  %v474_v10 = vpack.c.bf16 (!%p387_p2), %v471_v8, %v470_v7  ;;  %v529_v11 = vld [vmem:[%s2734_s5 + $0x8] sm:$0xff] (!%p387_p2)  ;;  %2047 = vmatprep.subr.bf16.mxu0 (!%p387_p2), %v2259_v12  ;;  %2055 = vmatprep.subr.bf16.mxu1 (!%p387_p2), %v2259_v12  ;;  %v473_v15 = vld [vmem:[%s2732_s3 + $0x18] sm:$0xff] (!%p387_p2)  ;;  %vm2260_vm1 = vmmov (!%p387_p2), 0   ;;  %vm483_vm2 = vcmask (!%p387_p2), 261120  }
   0x7   : > { %v532_v13 = vpack.c.bf16 (!%p387_p2), %v529_v11, %v528_v9  ;;  %v530_v16 = vld [vmem:[%s2734_s5 + $0x10] sm:$0xff] (!%p387_p2)  ;;  %v475_v17 = vpack.c.bf16 (!%p387_p2), %v473_v15, %v472_v14  ;;  %v531_v18 = vld [vmem:[%s2734_s5 + $0x18] sm:$0xff] (!%p387_p2)  ;;  %2051 = vmatprep.mubr.msk.bf16.mxu0 (!%p387_p2), %vm2260_vm1, %v2259_v12  ;;  %2059 = vmatprep.mubr.msk.bf16.mxu1 (!%p387_p2), %vm2260_vm1, %v2259_v12  ;;  %v1893_v24 = vld [vmem:[%s2730_s1] ss:$0 sm:$0xff] (!%p387_p2)  ;;  %vm636_vm3 = vcmask (!%p387_p2), 64512   ;;  %vm701_vm4 = vcmask (!%p387_p2), 1041408  }
   0x8   : > { %2048 = vmatpush3.bf16.msra.mxu0 (!%p387_p2), %v474_v10  ;;  %v533_v19 = vpack.c.bf16 (!%p387_p2), %v531_v18, %v530_v16  ;;  %v1894_v26 = vld [vmem:[%s2731_s2] ss:$0 sm:$0xff] (!%p387_p2)  ;;  %v582_v29 = vld [vmem:[%s2736_s7 + $0x8] sm:$0xff] (!%p387_p2)  ;;  %v583_v33 = vld [vmem:[%s2736_s7 + $0x10] sm:$0xff] (!%p387_p2)  ;;  %vm683_vm5 = vcmask (!%p387_p2), 27648   ;;  %vm697_vm6 = vcmask (!%p387_p2), 31744  }
   0x9   : > { %2056 = vmatpush3.bf16.msra.mxu1 (!%p387_p2), %v532_v13  ;;  %2049 = vmatprep.subr.bf16.mxu0 (!%p387_p2), %v2259_v12  ;;  %v581_v28 = vld [vmem:[%s2736_s7] sm:$0xff] (!%p387_p2)  ;;  %v584_v34 = vld [vmem:[%s2736_s7 + $0x18] sm:$0xff] (!%p387_p2)  ;;  %v1904_v53 = vld [vmem:[%s2732_s3 + $0x28] sm:$0xff] (!%p387_p2)  ;;  %vm1028_vm7 = vcmask (!%p387_p2), 1043456  }
   0xa   : > { %2057 = vmatprep.subr.bf16.mxu1 (!%p387_p2), %v2259_v12  ;;  %v585_v31 = vpack.c.bf16 (!%p387_p2), %v582_v29, %v581_v28  ;;  %v586_v35 = vpack.c.bf16 (!%p387_p2), %v584_v34, %v583_v33  ;;  %v1897_v36 = vld [vmem:[%s2735_s6] ss:$0 sm:$0xff] (!%p387_p2)  ;;  %v1905_v62 = vld [vmem:[%s2732_s3 + $0x30] sm:$0xff] (!%p387_p2)  ;;  %v1906_v63 = vld [vmem:[%s2732_s3 + $0x38] sm:$0xff] (!%p387_p2) }
   0xb   : > { %v1895_v37 = vld [vmem:[%s2733_s4] ss:$0 sm:$0xff] (!%p387_p2)  ;;  %v1920_v7 = vld [vmem:[%s2736_s7 + $0x38] sm:$0xff] (!%p387_p2) }
   0xc   : > { %2050 = vmatpush3.bf16.msra.mxu0 (!%p387_p2), %v475_v17  ;;  %v1899_v50 = vld [vmem:[%s2737_s8] ss:$0 sm:$0xff] (!%p387_p2) }
   0xd   : > { %s2744_s26 = smov (!%p428_p3, %s1886_s26), 7  ;;  %2058 = vmatpush3.bf16.msra.mxu1 %v533_v19  ;;  %2063 = vmatprep.subr.bf16.mxu0 %v2259_v12  ;;  %v1903_v52 = vld [vmem:[%s2732_s3 + $0x20] sm:$0xff] }
   0xe   : > { %s1891_s27 = sshll.u32 %s2744_s26, 2  ;;  %2071 = vmatprep.subr.bf16.mxu1 %v2259_v12  ;;  %v753_v58 = vpack.c.bf16 %v1904_v53, %v1903_v52  ;;  %v1922_v19 = vld [vmem:[%s2737_s8 + $0x1] ss:$0 sm:$0xff] }
   0xf   : > { %s431_s30 = scalar_lea.vmem %s2729_s0, %s1891_s27  ;;  %v1910_v34 = vld [vmem:[%s2734_s5 + $0x20] sm:$0xff]  ;;  %s435_s20 = scalar_lea.vmem %s2742_s13, %s1891_s27 }
  0x10   : > { %v2347_v0 = vld [vmem:[%s431_s30] sm:$0xf] }
  0x11   : > { %v441_v1 = vsel %vm440_vm0, %v2347_v0, 0.0 }
  0x12   : > { %442 = vadd.xlane.f32.xlu0 %v441_v1 }
  0x9f   : > { %v443_v2 = vpop.xlane.xlu0 %442 }
  0xa0   : > { %v445_v3 = vmul.f32 0.03125, %v443_v2  ;;  %v754_v2 = vpack.c.bf16 %v1906_v63, %v1905_v62 }
  0xa2   : > { %v446_v4 = vsub.f32 %v2347_v0, %v445_v3  ;;  %v1917_v3 = vld [vmem:[%s2736_s7 + $0x20] sm:$0xff] }
  0xa4   : > { %v447_v5 = vmul.f32 %v446_v4, %v446_v4 }
  0xa6   : > { %v448_v6 = vsel %vm440_vm0, %v447_v5, 0.0 }
  0xa7   : > { %449 = vadd.xlane.f32.xlu0 %v448_v6  ;;  %v1919_v6 = vld [vmem:[%s2736_s7 + $0x30] sm:$0xff] }
  0xa8   : > { %v865_v8 = vpack.c.bf16 %v1920_v7, %v1919_v6  ;;  %v1926_v6 = vld [vmem:[%s2738_s9 + $0x8] sm:$0xff] }
  0xa9   : > { %v1024_v7 = vpack.c.bf16 %v1926_v6, %v1926_v6 }
 0x134   : > { %v450_v20 = vpop.xlane.xlu0 %449 }
 0x135   : > { %v451_v21 = vmul.f32 0.03125, %v450_v20 }
 0x137   : > { %v452_v22 = vadd.f32 1e-05, %v451_v21 }
 0x139   : > { %2233 = vrsqrt.f32 %v452_v22 }
 0x143   : > { %v2234_v23 = vpop.eup %2233 }
 0x144   : > { %v454_v25 = vmul.f32 %v2234_v23, %v446_v4  ;;  %v1918_v4 = vld [vmem:[%s2736_s7 + $0x28] sm:$0xff] }
 0x145   : > { %v864_v5 = vpack.c.bf16 %v1918_v4, %v1917_v3 }
 0x146   : > { %v461_v27 = vmul.f32 %v1893_v24, %v454_v25 }
 0x148   : > { %v468_v30 = vadd.f32 %v1894_v26, %v461_v27 }
 0x14a   : > { %v2399_v32 = vpack.c.bf16 %v468_v30, %v468_v30 }
 0x14c   : > { %2052 = vmatmul.mubr.msk.bf16.vlgmr.msra.gmra.mrb[0].mxu0 %vm483_vm2, %v2399_v32  ;;  %2060 = vmatmul.mubr.msk.bf16.vlgmr.msra.gmra.mrb[0].mxu1 %vm483_vm2, %v2399_v32 }
 0x14d   : > { %2064 = vmatpush3.bf16.msra.mxu0 %v585_v31  ;;  %2067 = vmatprep.mubr.msk.bf16.mxu0 %vm2260_vm1, %v2259_v12 }
 0x14e   : > { %2065 = vmatprep.subr.bf16.mxu0 %v2259_v12  ;;  %2073 = vmatprep.mubr.msk.bf16.mxu1 %vm2260_vm1, %v2259_v12 }
 0x151   : > { %2066 = vmatpush3.bf16.msra.mxu0 %v586_v35  ;;  %v1911_v35 = vld [vmem:[%s2734_s5 + $0x28] sm:$0xff] }
 0x152   : > { %2077 = vmatprep.subr.bf16.mxu0 %v2259_v12 }
 0x154   : > { %2068 = vmatmul.mubr.msk.bf16.vlgmr.msra.gmra.mrb[4].mxu0 %vm483_vm2, %v2399_v32 }
 0x155   : > { %2079 = vmatprep.mubr.msk.bf16.mxu0 %vm2260_vm1, %v2259_v12 }
 0x21f   : > { %v521_v38 = vpop.f32.mrb[0].mxu0  ;;  %v575_v39 = vpop.f32.mrb[0].mxu1 }
 0x220   : > { %v576_v40 = vadd.f32 %v1897_v36, %v575_v39  ;;  %v2053_v41 = vpop.f32.mrb[1].mxu0  ;;  %v2061_v42 = vpop.f32.mrb[1].mxu1  ;;  %v522_v45 = vadd.f32 %v1895_v37, %v521_v38  ;;  %v809_v38 = vpack.c.bf16 %v1911_v35, %v1910_v34 }
 0x221   : > { %v524_v43 = vpop.f32.mrb[2].mxu0  ;;  %v578_v44 = vpop.f32.mrb[2].mxu1  ;;  %v1913_v41 = vld [vmem:[%s2734_s5 + $0x38] sm:$0xff] }
 0x222   : > { %v635_v46 = vpack.c.bf16 %v576_v40, %v576_v40  ;;  %v2054_v47 = vpop.f32.mrb[3].mxu0  ;;  %v2062_v48 = vpop.f32.mrb[3].mxu1  ;;  %v527_v51 = vmul.f32 0.35355338, %v522_v45  ;;  %v1912_v40 = vld [vmem:[%s2734_s5 + $0x30] sm:$0xff] }
 0x223   : > { %v810_v42 = vpack.c.bf16 %v1913_v41, %v1912_v40  ;;  %v1915_v47 = vld [vmem:[%s2735_s6 + $0x1] ss:$0 sm:$0xff]  ;;  %v1945_v41 = vld [vmem:[%s2736_s7 + $0x50] sm:$0xff] }
 0x224   : > { %v641_v49 = vsel %vm636_vm3, %v635_v46, 0  ;;  %v634_v59 = vpack.c.bf16 %v527_v51, %v527_v51  ;;  %v1908_v48 = vld [vmem:[%s2733_s4 + $0x1] ss:$0 sm:$0xff] }
 0x225   : > { %2072 = vmatpush3.bf16.xpose.msra.mxu1 %v641_v49 }
 0x226   : > { %2083 = vmatprep.subr.bf16.mxu1 %v2259_v12 }
 0x227   : > { %v628_v54 = vpop.f32.mrb[4].mxu0 }
 0x228   : > { %v629_v55 = vadd.f32 %v1899_v50, %v628_v54  ;;  %v2069_v56 = vpop.f32.mrb[5].mxu0 }
 0x229   : > { %v631_v57 = vpop.f32.mrb[6].mxu0 }
 0x22a   : > { %v696_v60 = vpack.c.bf16 %v629_v55, %v629_v55  ;;  %v2070_v61 = vpop.f32.mrb[7].mxu0 }
 0x22c   : > { %v703_v1 = vsel %vm701_vm4, %v696_v60, 0  ;;  %2074 = vmatmul.mubr.msk.bf16.vlgmr.msra.gmra.mrb[4].mxu1 %vm636_vm3, %v634_v59 }
 0x22d   : > { %2078 = vmatpush3.bf16.msra.mxu0 %v703_v1  ;;  %2084 = vmatpush3.bf16.msra.mxu1 %v753_v58 }
 0x22e   : > { %2085 = vmatprep.subr.bf16.mxu1 %v2259_v12  ;;  %2087 = vmatprep.mubr.msk.bf16.mxu1 %vm2260_vm1, %v2259_v12 }
 0x22f   : > { %2091 = vmatprep.subr.bf16.mxu0 %v2259_v12 }
 0x231   : > { %2086 = vmatpush3.bf16.msra.mxu1 %v754_v2 }
 0x232   : > { %2099 = vmatprep.subr.bf16.mxu1 %v2259_v12 }
 0x234   : > { %2088 = vmatmul.mubr.msk.bf16.vlgmr.msra.gmra.mrb[8].mxu1 %vm483_vm2, %v2399_v32 }
 0x235   : > { %2100 = vmatpush3.bf16.msra.mxu1 %v864_v5  ;;  %2103 = vmatprep.mubr.msk.bf16.mxu1 %vm2260_vm1, %v2259_v12 }
 0x236   : > { %2101 = vmatprep.subr.bf16.mxu1 %v2259_v12 }
 0x239   : > { %2102 = vmatpush3.bf16.msra.mxu1 %v865_v8  ;;  %v1030_v8 = vsel %vm1028_vm7, %v1024_v7, 0 }
 0x23a   : > { %2113 = vmatprep.subr.bf16.mxu1 %v2259_v12 }
 0x23c   : > { %2104 = vmatmul.mubr.msk.bf16.vlgmr.msra.gmra.mrb[12].mxu1 %vm483_vm2, %v2399_v32 }
 0x23d   : > { %2115 = vmatprep.mubr.msk.bf16.mxu1 %vm2260_vm1, %v2259_v12 }
 0x2ff   : > { %v677_v9 = vpop.f32.mrb[4].mxu1 }
 0x300   : > { %v2075_v10 = vpop.f32.mrb[5].mxu1  ;;  %v684_v11 = vsel %vm683_vm5, %v677_v9, -inf }
 0x301   : > { %685 = vmax.xlane.f32.xlu1 %v684_v11  ;;  %v680_v13 = vpop.f32.mrb[6].mxu1  ;;  %v746_v10 = vld [vmem:[%s2738_s9] sm:$0xff] }
 0x302   : > { %v2076_v14 = vpop.f32.mrb[7].mxu1  ;;  %v747_v11 = vpack.c.bf16 %v746_v10, %v746_v10 }
 0x307   : > { %v797_v15 = vpop.f32.mrb[8].mxu1 }
 0x308   : > { %v2089_v16 = vpop.f32.mrb[9].mxu1  ;;  %v798_v53 = vadd.f32 %v1908_v48, %v797_v15 }
 0x309   : > { %v800_v17 = vpop.f32.mrb[10].mxu1  ;;  %v1076_v16 = vsel %vm1028_vm7, %v747_v11, 0 }
 0x30a   : > { %v2090_v18 = vpop.f32.mrb[11].mxu1  ;;  %v803_v57 = vmul.f32 0.35355338, %v798_v53  ;;  %v1936_v17 = vld [vmem:[%s2734_s5 + $0x40] sm:$0xff] }
 0x30b   : > { %v1937_v18 = vld [vmem:[%s2734_s5 + $0x48] sm:$0xff] }
 0x30c   : > { %v914_v58 = vpack.c.bf16 %v803_v57, %v803_v57 }
 0x30f   : > { %v908_v20 = vpop.f32.mrb[12].mxu1 }
 0x310   : > { %v909_v21 = vadd.f32 %v1922_v19, %v908_v20  ;;  %v2105_v22 = vpop.f32.mrb[13].mxu1  ;;  %v1179_v19 = vpack.c.bf16 %v1937_v18, %v1936_v17 }
 0x311   : > { %v911_v23 = vpop.f32.mrb[14].mxu1  ;;  %v1939_v22 = vld [vmem:[%s2734_s5 + $0x58] sm:$0xff] }
 0x312   : > { %v974_v24 = vpack.c.bf16 %v909_v21, %v909_v21  ;;  %v2106_v25 = vpop.f32.mrb[15].mxu1  ;;  %v1938_v21 = vld [vmem:[%s2734_s5 + $0x50] sm:$0xff] }
 0x313   : > { %v1180_v23 = vpack.c.bf16 %v1939_v22, %v1938_v21  ;;  %v1930_v25 = vld [vmem:[%s2732_s3 + $0x48] sm:$0xff] }
 0x314   : > { %v979_v26 = vsel %vm701_vm4, %v974_v24, 0  ;;  %v1929_v24 = vld [vmem:[%s2732_s3 + $0x40] sm:$0xff] }
 0x315   : > { %2114 = vmatpush3.bf16.msra.mxu1 %v979_v26 }
 0x316   : > { %2125 = vmatprep.subr.bf16.mxu1 %v2259_v12 }
 0x38e   : > { %v686_v27 = vpop.xlane.xlu1 %685 }
 0x38f   : > { %v687_v28 = vsub.f32 %v677_v9, %v686_v27  ;;  %v1123_v27 = vpack.c.bf16 %v1930_v25, %v1929_v24 }
 0x391   : > { %v688_v29 = vmul.f32 1.442695, %v687_v28 }
 0x393   : > { %2235 = vpow2.f32 %v688_v29 }
 0x39d   : > { %v2236_v30 = vpop.eup %2235 }
 0x39e   : > { %v690_v31 = vsel %vm683_vm5, %v2236_v30, 0.0 }
 0x39f   : > { %691 = vadd.xlane.f32.xlu1 %v690_v31  ;;  %v1932_v31 = vld [vmem:[%s2732_s3 + $0x58] sm:$0xff] }
 0x42c   : > { %v692_v33 = vpop.xlane.xlu1 %691 }
 0x42d   : > { %2237 = vrcp.f32 %v692_v33 }
 0x437   : > { %v2238_v36 = vpop.eup %2237 }
 0x438   : > { %v694_v37 = vmul.f32 %v2238_v36, %v2236_v30  ;;  %v1931_v30 = vld [vmem:[%s2732_s3 + $0x50] sm:$0xff]  ;;  %v1943_v36 = vld [vmem:[%s2736_s7 + $0x40] sm:$0xff] }
 0x439   : > { %v1124_v35 = vpack.c.bf16 %v1932_v31, %v1931_v30 }
 0x43a   : > { %v695_v39 = vpack.c.bf16 %v694_v37, %v694_v37  ;;  %v1944_v37 = vld [vmem:[%s2736_s7 + $0x48] sm:$0xff] }
 0x43c   : > { %2080 = vmatmul.mubr.msk.bf16.vlgmr.msra.gmra.mrb[8].mxu0 %vm697_vm6, %v695_v39  ;;  %v1234_v39 = vpack.c.bf16 %v1944_v37, %v1943_v36  ;;  %v1968_v37 = vld [vmem:[%s2736_s7 + $0x60] sm:$0xff] }
 0x43d   : > { %2092 = vmatpush3.bf16.msra.mxu0 %v809_v38  ;;  %2095 = vmatprep.mubr.msk.bf16.mxu0 %vm2260_vm1, %v2259_v12 }
 0x43e   : > { %2093 = vmatprep.subr.bf16.mxu0 %v2259_v12 }
 0x441   : > { %2094 = vmatpush3.bf16.msra.mxu0 %v810_v42  ;;  %v1946_v42 = vld [vmem:[%s2736_s7 + $0x58] sm:$0xff] }
 0x442   : > { %2107 = vmatprep.subr.bf16.mxu0 %v2259_v12 }
 0x444   : > { %2096 = vmatmul.mubr.msk.bf16.vlgmr.msra.gmra.mrb[12].mxu0 %vm483_vm2, %v2399_v32 }
 0x445   : > { %2109 = vmatprep.mubr.msk.bf16.mxu0 %vm2260_vm1, %v2259_v12 }
 0x50f   : > { %v739_v43 = vpop.f32.mrb[8].mxu0 }
 0x510   : > { %v2081_v44 = vpop.f32.mrb[9].mxu0  ;;  %v745_v20 = vpack.c.bf16 %v739_v43, %v739_v43 }
 0x511   : > { %v742_v45 = vpop.f32.mrb[10].mxu0 }
 0x512   : > { %v2082_v46 = vpop.f32.mrb[11].mxu0  ;;  %v1235_v45 = vpack.c.bf16 %v1946_v42, %v1945_v41  ;;  %v1971_v41 = vld [vmem:[%s2736_s7 + $0x78] sm:$0xff] }
 0x513   : > { %v1941_v46 = vld [vmem:[%s2735_s6 + $0x2] ss:$0 sm:$0xff] }
 0x517   : > { %v853_v49 = vpop.f32.mrb[12].mxu0 }
 0x518   : > { %v854_v50 = vadd.f32 %v1915_v47, %v853_v49  ;;  %v2097_v51 = vpop.f32.mrb[13].mxu0 }
 0x519   : > { %v856_v52 = vpop.f32.mrb[14].mxu0 }
 0x51a   : > { %v915_v54 = vpack.c.bf16 %v854_v50, %v854_v50  ;;  %v2098_v55 = vpop.f32.mrb[15].mxu0 }
 0x51c   : > { %v920_v56 = vsel %vm636_vm3, %v915_v54, 0 }
 0x51d   : > { %2108 = vmatpush3.bf16.xpose.msra.mxu0 %v920_v56 }
 0x51e   : > { %2119 = vmatprep.subr.bf16.mxu0 %v2259_v12 }
 0x524   : > { %2110 = vmatmul.mubr.msk.bf16.vlgmr.msra.gmra.mrb[16].mxu0 %vm636_vm3, %v914_v58 }
 0x525   : > { %2121 = vmatprep.mubr.msk.bf16.mxu0 %vm2260_vm1, %v2259_v12  ;;  %2120 = vmatpush3.bf16.msra.mxu0 %v1030_v8 }
 0x526   : > { %2131 = vmatprep.subr.bf16.mxu0 %v2259_v12 }
 0x5f7   : > { %v956_v59 = vpop.f32.mrb[16].mxu0 }
 0x5f8   : > { %v2111_v60 = vpop.f32.mrb[17].mxu0  ;;  %v962_v61 = vsel %vm683_vm5, %v956_v59, -inf }
 0x5f9   : > { %963 = vmax.xlane.f32.xlu0 %v962_v61  ;;  %v959_v62 = vpop.f32.mrb[18].mxu0 }
 0x5fa   : > { %v2112_v63 = vpop.f32.mrb[19].mxu0 }
 0x686   : > { %v964_v1 = vpop.xlane.xlu0 %963 }
 0x687   : > { %v965_v2 = vsub.f32 %v956_v59, %v964_v1  ;;  %v1934_v59 = vld [vmem:[%s2733_s4 + $0x2] ss:$0 sm:$0xff] }
 0x689   : > { %v966_v3 = vmul.f32 1.442695, %v965_v2 }
 0x68b   : > { %2239 = vpow2.f32 %v966_v3 }
 0x695   : > { %v2240_v4 = vpop.eup %2239 }
 0x696   : > { %v968_v5 = vsel %vm683_vm5, %v2240_v4, 0.0 }
 0x697   : > { %969 = vadd.xlane.f32.xlu1 %v968_v5 }
 0x724   : > { %v970_v9 = vpop.xlane.xlu1 %969 }
 0x725   : > { %2241 = vrcp.f32 %v970_v9 }
 0x72f   : > { %v2242_v13 = vpop.eup %2241 }
 0x730   : > { %v972_v14 = vmul.f32 %v2242_v13, %v2240_v4  ;;  %v1948_v4 = vld [vmem:[%s2737_s8 + $0x2] ss:$0 sm:$0xff] }
 0x732   : > { %v973_v15 = vpack.c.bf16 %v972_v14, %v972_v14 }
 0x734   : > { %2116 = vmatmul.mubr.msk.bf16.vlgmr.msra.gmra.mrb[16].mxu1 %vm697_vm6, %v973_v15 }
 0x735   : > { %2126 = vmatpush3.bf16.msra.mxu1 %v1076_v16  ;;  %2127 = vmatprep.mubr.msk.bf16.mxu1 %vm2260_vm1, %v2259_v12 }
 0x736   : > { %2139 = vmatprep.subr.bf16.mxu1 %v2259_v12 }
 0x73c   : > { %2128 = vmatmul.mubr.msk.bf16.vlgmr.msra.gmra.mrb[20].mxu1 %vm636_vm3, %v745_v20 }
 0x73d   : > { %2140 = vmatpush3.bf16.msra.mxu1 %v1179_v19  ;;  %2143 = vmatprep.mubr.msk.bf16.mxu1 %vm2260_vm1, %v2259_v12 }
 0x73e   : > { %2141 = vmatprep.subr.bf16.mxu1 %v2259_v12 }
 0x741   : > { %2142 = vmatpush3.bf16.msra.mxu1 %v1180_v23  ;;  %v1952_v23 = vld [vmem:[%s2738_s9 + $0x10] sm:$0xff] }
 0x742   : > { %2155 = vmatprep.subr.bf16.mxu1 %v2259_v12  ;;  %v1394_v24 = vpack.c.bf16 %v1952_v23, %v1952_v23 }
 0x744   : > { %2144 = vmatmul.mubr.msk.bf16.vlgmr.msra.gmra.mrb[24].mxu1 %vm483_vm2, %v2399_v32  ;;  %v1399_v25 = vsel %vm1028_vm7, %v1394_v24, 0 }
 0x745   : > { %2157 = vmatprep.mubr.msk.bf16.mxu1 %vm2260_vm1, %v2259_v12 }
 0x807   : > { %v1015_v26 = vpop.f32.mrb[16].mxu1 }
 0x808   : > { %v1021_v28 = vpack.c.bf16 %v1015_v26, %v1015_v26  ;;  %v2117_v29 = vpop.f32.mrb[17].mxu1 }
 0x809   : > { %v1018_v33 = vpop.f32.mrb[18].mxu1 }
 0x80a   : > { %v2118_v34 = vpop.f32.mrb[19].mxu1  ;;  %2122 = vmatmul.mubr.msk.bf16.vlgmr.msra.gmra.mrb[20].mxu0 %vm636_vm3, %v1021_v28  ;;  %v1955_v28 = vld [vmem:[%s2732_s3 + $0x68] sm:$0xff] }
 0x80b   : > { %2132 = vmatpush3.bf16.msra.mxu0 %v1123_v27  ;;  %2135 = vmatprep.mubr.msk.bf16.mxu0 %vm2260_vm1, %v2259_v12  ;;  %v1954_v27 = vld [vmem:[%s2732_s3 + $0x60] sm:$0xff]  ;;  %v1956_v34 = vld [vmem:[%s2732_s3 + $0x70] sm:$0xff] }
 0x80c   : > { %2133 = vmatprep.subr.bf16.mxu0 %v2259_v12  ;;  %v1447_v31 = vpack.c.bf16 %v1955_v28, %v1954_v27 }
 0x80f   : > { %v1112_v38 = vpop.f32.mrb[20].mxu1  ;;  %2134 = vmatpush3.bf16.msra.mxu0 %v1124_v35  ;;  %v1957_v35 = vld [vmem:[%s2732_s3 + $0x78] sm:$0xff] }
 0x810   : > { %v2129_v40 = vpop.f32.mrb[21].mxu1  ;;  %2147 = vmatprep.subr.bf16.mxu0 %v2259_v12  ;;  %v1448_v36 = vpack.c.bf16 %v1957_v35, %v1956_v34 }
 0x811   : > { %v1115_v43 = vpop.f32.mrb[22].mxu1  ;;  %v1970_v40 = vld [vmem:[%s2736_s7 + $0x70] sm:$0xff] }
 0x812   : > { %v2130_v44 = vpop.f32.mrb[23].mxu1  ;;  %2136 = vmatmul.mubr.msk.bf16.vlgmr.msra.gmra.mrb[24].mxu0 %vm483_vm2, %v2399_v32  ;;  %v1559_v42 = vpack.c.bf16 %v1971_v41, %v1970_v40  ;;  %v1961_v43 = vld [vmem:[%s2734_s5 + $0x60] sm:$0xff] }
 0x813   : > { %2148 = vmatpush3.bf16.msra.mxu0 %v1234_v39  ;;  %2151 = vmatprep.mubr.msk.bf16.mxu0 %vm2260_vm1, %v2259_v12  ;;  %v1962_v44 = vld [vmem:[%s2734_s5 + $0x68] sm:$0xff] }
 0x814   : > { %2149 = vmatprep.subr.bf16.mxu0 %v2259_v12 }
 0x817   : > { %v1223_v47 = vpop.f32.mrb[24].mxu1  ;;  %2150 = vmatpush3.bf16.msra.mxu0 %v1235_v45 }
 0x818   : > { %v1224_v48 = vadd.f32 %v1941_v46, %v1223_v47  ;;  %v2145_v49 = vpop.f32.mrb[25].mxu1  ;;  %2161 = vmatprep.subr.bf16.mxu0 %v2259_v12  ;;  %v1503_v46 = vpack.c.bf16 %v1962_v44, %v1961_v43  ;;  %v1774_v43 = vld [vmem:[%s2740_s11] sm:$0xff]  ;;  %v1775_v44 = vld [vmem:[%s2740_s11 + $0x8] sm:$0xff] }
 0x819   : > { %v1226_v50 = vpop.f32.mrb[26].mxu1  ;;  %v1963_v49 = vld [vmem:[%s2734_s5 + $0x70] sm:$0xff] }
 0x81a   : > { %v1285_v51 = vpack.c.bf16 %v1224_v48, %v1224_v48  ;;  %v2146_v52 = vpop.f32.mrb[27].mxu1  ;;  %2152 = vmatmul.mubr.msk.bf16.vlgmr.msra.gmra.mrb[28].mxu0 %vm483_vm2, %v2399_v32  ;;  %v1964_v50 = vld [vmem:[%s2734_s5 + $0x78] sm:$0xff] }
 0x81b   : > { %2163 = vmatprep.mubr.msk.bf16.mxu0 %vm2260_vm1, %v2259_v12 }
 0x81c   : > { %v1290_v53 = vsel %vm636_vm3, %v1285_v51, 0 }
 0x81d   : > { %2156 = vmatpush3.bf16.xpose.msra.mxu1 %v1290_v53  ;;  %v1504_v53 = vpack.c.bf16 %v1964_v50, %v1963_v49  ;;  %v1979_v50 = vld [vmem:[%s2739_s10] ss:$0 sm:$0xff] }
 0x81e   : > { %2167 = vmatprep.subr.bf16.mxu1 %v2259_v12 }
 0x8dd   : > { %v1066_v54 = vpop.f32.mrb[20].mxu0 }
 0x8de   : > { %v2592_v55 = vadd.f32 %v1112_v38, %v1066_v54  ;;  %v2123_v56 = vpop.f32.mrb[21].mxu0  ;;  %v1969_v38 = vld [vmem:[%s2736_s7 + $0x68] sm:$0xff] }
 0x8df   : > { %v1069_v57 = vpop.f32.mrb[22].mxu0  ;;  %v1558_v39 = vpack.c.bf16 %v1969_v38, %v1968_v37 }
 0x8e0   : > { %v2124_v58 = vpop.f32.mrb[23].mxu0 }
 0x8e5   : > { %v1167_v60 = vpop.f32.mrb[24].mxu0 }
 0x8e6   : > { %v1168_v61 = vadd.f32 %v1934_v59, %v1167_v60  ;;  %v2137_v62 = vpop.f32.mrb[25].mxu0  ;;  %v1973_v59 = vld [vmem:[%s2737_s8 + $0x3] ss:$0 sm:$0xff] }
 0x8e7   : > { %v1170_v63 = vpop.f32.mrb[26].mxu0 }
 0x8e8   : > { %v1173_v1 = vmul.f32 0.35355338, %v1168_v61  ;;  %v2138_v2 = vpop.f32.mrb[27].mxu0 }
 0x8ea   : > { %v1284_v3 = vpack.c.bf16 %v1173_v1, %v1173_v1 }
 0x8ec   : > { %2158 = vmatmul.mubr.msk.bf16.vlgmr.msra.gmra.mrb[28].mxu1 %vm636_vm3, %v1284_v3 }
 0x8ed   : > { %v1278_v5 = vpop.f32.mrb[28].mxu0  ;;  %2169 = vmatprep.mubr.msk.bf16.mxu1 %vm2260_vm1, %v2259_v12  ;;  %2168 = vmatpush3.bf16.msra.mxu1 %v1399_v25 }
 0x8ee   : > { %v1279_v6 = vadd.f32 %v1948_v4, %v1278_v5  ;;  %v2153_v7 = vpop.f32.mrb[29].mxu0  ;;  %2181 = vmatprep.subr.bf16.mxu1 %v2259_v12 }
 0x8ef   : > { %v1281_v8 = vpop.f32.mrb[30].mxu0 }
 0x8f0   : > { %v1344_v9 = vpack.c.bf16 %v1279_v6, %v1279_v6  ;;  %v2154_v10 = vpop.f32.mrb[31].mxu0  ;;  %v1966_v8 = vld [vmem:[%s2735_s6 + $0x3] ss:$0 sm:$0xff] }
 0x8f2   : > { %v1349_v11 = vsel %vm701_vm4, %v1344_v9, 0  ;;  %v1959_v9 = vld [vmem:[%s2733_s4 + $0x3] ss:$0 sm:$0xff] }
 0x8f3   : > { %2162 = vmatpush3.bf16.msra.mxu0 %v1349_v11 }
 0x8f4   : > { %2173 = vmatprep.subr.bf16.mxu0 %v2259_v12 }
 0x9bf   : > { %v1326_v13 = vpop.f32.mrb[28].mxu1 }
 0x9c0   : > { %v2159_v14 = vpop.f32.mrb[29].mxu1  ;;  %v1332_v15 = vsel %vm683_vm5, %v1326_v13, -inf }
 0x9c1   : > { %1333 = vmax.xlane.f32.xlu0 %v1332_v15  ;;  %v1329_v16 = vpop.f32.mrb[30].mxu1 }
 0x9c2   : > { %v2160_v17 = vpop.f32.mrb[31].mxu1 }
 0xa4e   : > { %v1334_v18 = vpop.xlane.xlu0 %1333 }
 0xa4f   : > { %v1335_v19 = vsub.f32 %v1326_v13, %v1334_v18 }
 0xa51   : > { %v1336_v20 = vmul.f32 1.442695, %v1335_v19 }
 0xa53   : > { %2243 = vpow2.f32 %v1336_v20 }
 0xa5d   : > { %v2244_v21 = vpop.eup %2243 }
 0xa5e   : > { %v1338_v22 = vsel %vm683_vm5, %v2244_v21, 0.0 }
 0xa5f   : > { %1339 = vadd.xlane.f32.xlu1 %v1338_v22 }
 0xaec   : > { %v1340_v26 = vpop.xlane.xlu1 %1339 }
 0xaed   : > { %2245 = vrcp.f32 %v1340_v26 }
 0xaf7   : > { %v2246_v29 = vpop.eup %2245 }
 0xaf8   : > { %v1342_v30 = vmul.f32 %v2246_v29, %v2244_v21 }
 0xafa   : > { %v1343_v33 = vpack.c.bf16 %v1342_v30, %v1342_v30  ;;  %v1977_v30 = vld [vmem:[%s2738_s9 + $0x18] sm:$0xff] }
 0xafc   : > { %2164 = vmatmul.mubr.msk.bf16.vlgmr.msra.gmra.mrb[32].mxu0 %vm697_vm6, %v1343_v33 }
 0xafd   : > { %2174 = vmatpush3.bf16.msra.mxu0 %v1447_v31  ;;  %2177 = vmatprep.mubr.msk.bf16.mxu0 %vm2260_vm1, %v2259_v12  ;;  %v1718_v31 = vpack.c.bf16 %v1977_v30, %v1977_v30 }
 0xafe   : > { %2175 = vmatprep.subr.bf16.mxu0 %v2259_v12 }
 0xaff   : > { %v1723_v33 = vsel %vm1028_vm7, %v1718_v31, 0 }
 0xb01   : > { %2176 = vmatpush3.bf16.msra.mxu0 %v1448_v36 }
 0xb02   : > { %2189 = vmatprep.subr.bf16.mxu0 %v2259_v12 }
 0xb04   : > { %2178 = vmatmul.mubr.msk.bf16.vlgmr.msra.gmra.mrb[36].mxu0 %vm483_vm2, %v2399_v32 }
 0xb05   : > { %2190 = vmatpush3.bf16.msra.mxu0 %v1558_v39  ;;  %2193 = vmatprep.mubr.msk.bf16.mxu0 %vm2260_vm1, %v2259_v12 }
 0xb06   : > { %2191 = vmatprep.subr.bf16.mxu0 %v2259_v12 }
 0xb09   : > { %2192 = vmatpush3.bf16.msra.mxu0 %v1559_v42 }
 0xb0a   : > { %2203 = vmatprep.subr.bf16.mxu0 %v2259_v12 }
 0xb0c   : > { %2194 = vmatmul.mubr.msk.bf16.vlgmr.msra.gmra.mrb[40].mxu0 %vm483_vm2, %v2399_v32 }
 0xb0d   : > { %2205 = vmatprep.mubr.msk.bf16.mxu0 %vm2260_vm1, %v2259_v12 }
 0xbcf   : > { %v1385_v45 = vpop.f32.mrb[32].mxu0 }
 0xbd0   : > { %v1391_v47 = vpack.c.bf16 %v1385_v45, %v1385_v45  ;;  %v2165_v48 = vpop.f32.mrb[33].mxu0  ;;  %v1780_v45 = vpack.c.bf16 %v1775_v44, %v1774_v43 }
 0xbd1   : > { %v1388_v51 = vpop.f32.mrb[34].mxu0 }
 0xbd2   : > { %v2166_v52 = vpop.f32.mrb[35].mxu0  ;;  %2170 = vmatmul.mubr.msk.bf16.vlgmr.msra.gmra.mrb[32].mxu1 %vm636_vm3, %v1391_v47  ;;  %v1777_v47 = vld [vmem:[%s2740_s11 + $0x18] sm:$0xff] }
 0xbd3   : > { %2182 = vmatpush3.bf16.msra.mxu1 %v1503_v46  ;;  %2185 = vmatprep.mubr.msk.bf16.mxu1 %vm2260_vm1, %v2259_v12  ;;  %v1776_v46 = vld [vmem:[%s2740_s11 + $0x10] sm:$0xff] }
 0xbd4   : > { %2183 = vmatprep.subr.bf16.mxu1 %v2259_v12  ;;  %v1781_v48 = vpack.c.bf16 %v1777_v47, %v1776_v46 }
 0xbd7   : > { %v1491_v54 = vpop.f32.mrb[36].mxu0  ;;  %2184 = vmatpush3.bf16.msra.mxu1 %v1504_v53 }
 0xbd8   : > { %v2179_v56 = vpop.f32.mrb[37].mxu0  ;;  %2197 = vmatprep.subr.bf16.mxu1 %v2259_v12  ;;  %v1492_v15 = vadd.f32 %v1959_v9, %v1491_v54 }
 0xbd9   : > { %v1494_v57 = vpop.f32.mrb[38].mxu0 }
 0xbda   : > { %v2180_v58 = vpop.f32.mrb[39].mxu0  ;;  %2186 = vmatmul.mubr.msk.bf16.vlgmr.msra.gmra.mrb[36].mxu1 %vm483_vm2, %v2399_v32  ;;  %v1497_v18 = vmul.f32 0.35355338, %v1492_v15  ;;  %v1980_v57 = vld [vmem:[%s2741_s12] ss:$0 sm:$0xff] }
 0xbdb   : > { %2199 = vmatprep.mubr.msk.bf16.mxu1 %vm2260_vm1, %v2259_v12 }
 0xbdc   : > { %v1608_v19 = vpack.c.bf16 %v1497_v18, %v1497_v18 }
 0xbdf   : > { %v1602_v60 = vpop.f32.mrb[40].mxu0 }
 0xbe0   : > { %v1603_v61 = vadd.f32 %v1973_v59, %v1602_v60  ;;  %v2195_v62 = vpop.f32.mrb[41].mxu0 }
 0xbe1   : > { %v1605_v63 = vpop.f32.mrb[42].mxu0 }
 0xbe2   : > { %v1668_v1 = vpack.c.bf16 %v1603_v61, %v1603_v61  ;;  %v2196_v2 = vpop.f32.mrb[43].mxu0 }
 0xbe4   : > { %v1673_v3 = vsel %vm701_vm4, %v1668_v1, 0 }
 0xbe5   : > { %2204 = vmatpush3.bf16.msra.mxu0 %v1673_v3 }
 0xbe6   : > { %2215 = vmatprep.subr.bf16.mxu0 %v2259_v12 }
 0xca5   : > { %v1435_v4 = vpop.f32.mrb[32].mxu1 }
 0xca6   : > { %v1441_v32 = vadd.f32 %v1435_v4, %v2592_v55  ;;  %v2171_v5 = vpop.f32.mrb[33].mxu1 }
 0xca7   : > { %v1438_v6 = vpop.f32.mrb[34].mxu1 }
 0xca8   : > { %v2172_v7 = vpop.f32.mrb[35].mxu1 }
 0xcad   : > { %v1547_v10 = vpop.f32.mrb[36].mxu1 }
 0xcae   : > { %v1548_v11 = vadd.f32 %v1966_v8, %v1547_v10  ;;  %v2187_v13 = vpop.f32.mrb[37].mxu1 }
 0xcaf   : > { %v1550_v14 = vpop.f32.mrb[38].mxu1 }
 0xcb0   : > { %v1609_v16 = vpack.c.bf16 %v1548_v11, %v1548_v11  ;;  %v2188_v17 = vpop.f32.mrb[39].mxu1 }
 0xcb2   : > { %v1614_v55 = vsel %vm636_vm3, %v1609_v16, 0 }
 0xcb3   : > { %2198 = vmatpush3.bf16.xpose.msra.mxu1 %v1614_v55 }
 0xcb4   : > { %2209 = vmatprep.subr.bf16.mxu1 %v2259_v12 }
 0xcba   : > { %2200 = vmatmul.mubr.msk.bf16.vlgmr.msra.gmra.mrb[40].mxu1 %vm636_vm3, %v1608_v19 }
 0xcbb   : > { %2211 = vmatprep.mubr.msk.bf16.mxu1 %vm2260_vm1, %v2259_v12  ;;  %2210 = vmatpush3.bf16.msra.mxu1 %v1723_v33 }
 0xd8d   : > { %v1650_v20 = vpop.f32.mrb[40].mxu1 }
 0xd8e   : > { %v2201_v21 = vpop.f32.mrb[41].mxu1  ;;  %v1656_v22 = vsel %vm683_vm5, %v1650_v20, -inf }
 0xd8f   : > { %1657 = vmax.xlane.f32.xlu0 %v1656_v22  ;;  %v1653_v23 = vpop.f32.mrb[42].mxu1 }
 0xd90   : > { %v2202_v24 = vpop.f32.mrb[43].mxu1 }
 0xe1c   : > { %v1658_v25 = vpop.xlane.xlu0 %1657 }
 0xe1d   : > { %v1659_v26 = vsub.f32 %v1650_v20, %v1658_v25 }
 0xe1f   : > { %v1660_v27 = vmul.f32 1.442695, %v1659_v26 }
 0xe21   : > { %2247 = vpow2.f32 %v1660_v27 }
 0xe2b   : > { %v2248_v28 = vpop.eup %2247 }
 0xe2c   : > { %v1662_v29 = vsel %vm683_vm5, %v2248_v28, 0.0 }
 0xe2d   : > { %1663 = vadd.xlane.f32.xlu1 %v1662_v29 }
 0xeba   : > { %v1664_v34 = vpop.xlane.xlu1 %1663 }
 0xebb   : > { %2249 = vrcp.f32 %v1664_v34 }
 0xec5   : > { %v2250_v35 = vpop.eup %2249 }
 0xec6   : > { %v1666_v36 = vmul.f32 %v2250_v35, %v2248_v28 }
 0xec8   : > { %v1667_v37 = vpack.c.bf16 %v1666_v36, %v1666_v36 }
 0xeca   : > { %2206 = vmatmul.mubr.msk.bf16.vlgmr.msra.gmra.mrb[44].mxu0 %vm697_vm6, %v1667_v37 }
 0xecb   : > { %2219 = vmatprep.mubr.msk.bf16.mxu0 %vm2260_vm1, %v2259_v12  ;;  %2216 = vmatpush3.bf16.msra.mxu0 %v1780_v45 }
 0xecc   : > { %2217 = vmatprep.subr.bf16.mxu0 %v2259_v12 }
 0xecf   : > { %2218 = vmatpush3.bf16.msra.mxu0 %v1781_v48 }
 0xf9d   : > { %v1709_v38 = vpop.f32.mrb[44].mxu0 }
 0xf9e   : > { %v1715_v39 = vpack.c.bf16 %v1709_v38, %v1709_v38  ;;  %v2207_v40 = vpop.f32.mrb[45].mxu0 }
 0xf9f   : > { %v1712_v41 = vpop.f32.mrb[46].mxu0 }
 0xfa0   : > { %v2208_v42 = vpop.f32.mrb[47].mxu0  ;;  %2212 = vmatmul.mubr.msk.bf16.vlgmr.msra.gmra.mrb[44].mxu1 %vm636_vm3, %v1715_v39 }
0x1073   : > { %v1759_v49 = vpop.f32.mrb[44].mxu1 }
0x1074   : > { %v1765_v51 = vadd.f32 %v1759_v49, %v1441_v32  ;;  %v2213_v52 = vpop.f32.mrb[45].mxu1 }
0x1075   : > { %v1762_v53 = vpop.f32.mrb[46].mxu1 }
0x1076   : > { %v1773_v12 = vadd.f32 %v1979_v50, %v1765_v51  ;;  %v2214_v54 = vpop.f32.mrb[47].mxu1 }
0x1078   : > { %v1779_v56 = vpack.c.bf16 %v1773_v12, %v1773_v12 }
0x107a   : > { %2220 = vmatmul.mubr.msk.bf16.vlgmr.msra.gmra.mrb[48].mxu0 %vm483_vm2, %v1779_v56 }
0x114d   : > { %v1825_v58 = vpop.f32.mrb[48].mxu0 }
0x114e   : > { %v1826_v59 = vadd.f32 %v1980_v57, %v1825_v58  ;;  %v2221_v60 = vpop.f32.mrb[49].mxu0 }
0x114f   : > { %v1828_v61 = vpop.f32.mrb[50].mxu0 }
0x1150   : > { %v1831_v62 = vadd.f32 %v1826_v59, %v2347_v0  ;;  %v2222_v63 = vpop.f32.mrb[51].mxu0 }
0x1152   : > { %1832 = vst.msk [vmem:[%s435_s20] sm:$0xf] %vm440_vm0, %v1831_v62 }
0x1153 PF: > { %s23_s25 = sadd.s32 1, %s2257_s25  }
0x1154   : > { %p20_p4 = scmp.ge.s32.totalorder %s23_s25, 10  }
0x1156   :  { %22 = sbr.rel (!%p20_p4) target bundleno = 1 (0x1), region = 123 }

// kernel: model_forward.25
= control target key start
LH: loop header
LB: loop body
LE: loop exit
PB: predicated region body
PF: predicated region fallthrough
CT: control target
= control target key end

     0   :  { %s2321_s17 = smov 0   ;;  %s2732_s0 = inlined_call_operand.vmem [shape: f32[4,9,32], index: 0, kind: input, shape index: {}]   ;;  %s2733_s1 = inlined_call_operand.vmem [shape: f32[1,32], index: 1, kind: input, shape index: {}]   ;;  %s2734_s2 = inlined_call_operand.vmem [shape: f32[1,32], index: 2, kind: input, shape index: {}, may-alias: {2,10}]   ;;  %s2735_s3 = inlined_call_operand.vmem [shape: f32[4,32,8], index: 3, kind: input, shape index: {}]   ;;  %s2736_s4 = inlined_call_operand.vmem [shape: f32[4,1,8], index: 4, kind: input, shape index: {}, may-alias: {4,6,8}]   ;;  %s2737_s5 = inlined_call_operand.vmem [shape: f32[4,32,8], index: 5, kind: input, shape index: {}]   ;;  %s2738_s6 = inlined_call_operand.vmem [shape: f32[4,1,8], index: 6, kind: input, shape index: {}, may-alias: {4,6,8}]   ;;  %s2739_s7 = inlined_call_operand.vmem [shape: f32[4,32,8], index: 7, kind: input, shape index: {}]   ;;  %s2740_s8 = inlined_call_operand.vmem [shape: f32[4,1,8], index: 8, kind: input, shape index: {}, may-alias: {4,6,8}]   ;;  %s2741_s9 = inlined_call_operand.vmem [shape: f32[4,8,32], index: 9, kind: input, shape index: {}]   ;;  %s2742_s10 = inlined_call_operand.vmem [shape: f32[1,32], index: 10, kind: input, shape index: {}, may-alias: {2,10}]   ;;  %s2743_s11 = inlined_call_operand.vmem [shape: f32[4,9,32], index: 11, kind: output, shape index: {}]  }
   0x1 LB: > { %s1875_s18 = sadd.s32 4294967295, %s2256_s17   ;;  %p1879_p0 = scmp.ge.s32.totalorder %s2256_s17, 1  ;;  %s2256_s17 = sphi %s2321_s17, %s21_s17  }
   0x2   : > { %p337_p1 = scmp.lt.s32.totalorder %s2256_s17, 5 }
   0x4   : > { %p338_p2 = pnand %p1879_p0, %p337_p1 }
   0x5   : > { %p377_p3 = scmp.lt.s32.totalorder (!%p338_p2), %s1875_s18, 3  ;;  %vm392_vm0 = vcmask (!%p338_p2), 261120   ;;  %vm396_vm1 = vcmask (!%p338_p2), 253952   ;;  %v438_v14 = vld [vmem:[%s2735_s3] sm:$0xff] (!%p338_p2)  ;;  %v439_v15 = vld [vmem:[%s2735_s3 + $0x8] sm:$0xff] (!%p338_p2)  ;;  %v2258_v19 = vmov (!%p338_p2), 0.0  }
   0x6   : > { %341 = sbr.rel (%p338_p2) target bundleno = 4245 (0x1095), region = 64  ;;  %v497_v16 = vld [vmem:[%s2737_s5] sm:$0xff] (!%p338_p2)  ;;  %v442_v17 = vpack.c.bf16 (!%p338_p2), %v439_v15, %v438_v14  ;;  %v498_v18 = vld [vmem:[%s2737_s5 + $0x8] sm:$0xff] (!%p338_p2)  ;;  %2035 = vmatprep.subr.bf16.mxu0 (!%p338_p2), %v2258_v19  ;;  %2043 = vmatprep.subr.bf16.mxu1 (!%p338_p2), %v2258_v19  ;;  %v440_v21 = vld [vmem:[%s2735_s3 + $0x10] sm:$0xff] (!%p338_p2)  ;;  %vm2259_vm2 = vmmov (!%p338_p2), 0   ;;  %vm607_vm3 = vcmask (!%p338_p2), 64512  }
   0x7   : > { %v501_v20 = vpack.c.bf16 (!%p338_p2), %v498_v18, %v497_v16  ;;  %v441_v22 = vld [vmem:[%s2735_s3 + $0x18] sm:$0xff] (!%p338_p2)  ;;  %v499_v23 = vld [vmem:[%s2737_s5 + $0x10] sm:$0xff] (!%p338_p2)  ;;  %2039 = vmatprep.mubr.msk.bf16.mxu0 (!%p338_p2), %vm2259_vm2, %v2258_v19  ;;  %2047 = vmatprep.mubr.msk.bf16.mxu1 (!%p338_p2), %vm2259_vm2, %v2258_v19  ;;  %v1884_v35 = vld [vmem:[%s2733_s1] ss:$0 sm:$0xff] (!%p338_p2)  ;;  %vm684_vm4 = vcmask (!%p338_p2), 1043456   ;;  %vm685_vm5 = vcmask (!%p338_p2), 1044480  }
   0x8   : > { %2036 = vmatpush3.bf16.msra.mxu0 (!%p338_p2), %v442_v17  ;;  %v443_v24 = vpack.c.bf16 (!%p338_p2), %v441_v22, %v440_v21  ;;  %v500_v25 = vld [vmem:[%s2737_s5 + $0x18] sm:$0xff] (!%p338_p2)  ;;  %v1885_v39 = vld [vmem:[%s2734_s2] ss:$0 sm:$0xff] (!%p338_p2)  ;;  %v552_v42 = vld [vmem:[%s2739_s7 + $0x8] sm:$0xff] (!%p338_p2)  ;;  %vm655_vm6 = vcmask (!%p338_p2), 72704   ;;  %vm659_vm7 = vcmask (!%p338_p2), 65536  }
   0x9   : > { %2044 = vmatpush3.bf16.msra.mxu1 (!%p338_p2), %v501_v20  ;;  %2037 = vmatprep.subr.bf16.mxu0 (!%p338_p2), %v2258_v19  ;;  %v502_v26 = vpack.c.bf16 (!%p338_p2), %v500_v25, %v499_v23  ;;  %v551_v41 = vld [vmem:[%s2739_s7] sm:$0xff] (!%p338_p2)  ;;  %v553_v47 = vld [vmem:[%s2739_s7 + $0x10] sm:$0xff] (!%p338_p2)  ;;  %v554_v48 = vld [vmem:[%s2739_s7 + $0x18] sm:$0xff] (!%p338_p2) }
   0xa   : > { %2045 = vmatprep.subr.bf16.mxu1 (!%p338_p2), %v2258_v19  ;;  %v555_v45 = vpack.c.bf16 (!%p338_p2), %v552_v42, %v551_v41  ;;  %v556_v49 = vpack.c.bf16 (!%p338_p2), %v554_v48, %v553_v47  ;;  %v1886_v50 = vld [vmem:[%s2736_s4] ss:$0 sm:$0xff] (!%p338_p2)  ;;  %v1896_v20 = vld [vmem:[%s2735_s3 + $0x30] sm:$0xff] (!%p338_p2)  ;;  %v1897_v21 = vld [vmem:[%s2735_s3 + $0x38] sm:$0xff] (!%p338_p2) }
   0xb   : > { %v1888_v52 = vld [vmem:[%s2738_s6] ss:$0 sm:$0xff] (!%p338_p2)  ;;  %v741_v23 = vpack.c.bf16 (!%p338_p2), %v1897_v21, %v1896_v20  ;;  %v1909_v25 = vld [vmem:[%s2739_s7 + $0x28] sm:$0xff] (!%p338_p2)  ;;  %v1913_v47 = vld [vmem:[%s2740_s8 + $0x1] ss:$0 sm:$0xff] (!%p338_p2) }
   0xc   : > { %2038 = vmatpush3.bf16.msra.mxu0 (!%p338_p2), %v443_v24  ;;  %v1908_v24 = vld [vmem:[%s2739_s7 + $0x20] sm:$0xff] (!%p338_p2) }
   0xd   : > { %s2745_s18 = smov (!%p377_p3, %s1875_s18), 3  ;;  %2046 = vmatpush3.bf16.msra.mxu1 %v502_v26  ;;  %2051 = vmatprep.subr.bf16.mxu0 %v2258_v19  ;;  %v854_v26 = vpack.c.bf16 %v1909_v25, %v1908_v24 }
   0xe   : > { %s1973_s19 = sshll.u32 %s2745_s18, 4  ;;  %2059 = vmatprep.subr.bf16.mxu1 %v2258_v19 }
   0xf   : > { %s381_s22 = scalar_lea.vmem %s2732_s0, %s1973_s19  ;;  %s386_s12 = scalar_lea.vmem %s2743_s11, %s1973_s19 }
  0x10   : > { %v388_v0 = vld [vmem:[%s381_s22] sm:$0xff]  ;;  %v389_v1 = vld [vmem:[%s381_s22 + $0x8] sm:$0x1] }
  0x11   : > { %v393_v2 = vsel %vm392_vm0, %v388_v0, 0.0  ;;  %v397_v3 = vsel %vm396_vm1, %v389_v1, 0.0 }
  0x12   : > { %394 = vadd.xlane.f32.xlu0 %v393_v2 }
  0x16   : > { %398 = vadd.xlane.f32.xlu0 %v397_v3 }
  0x9f   : > { %v395_v4 = vpop.xlane.xlu0 %394 }
  0xa0   : > { %v401_v5 = vmul.f32 0.03125, %v395_v4 }
  0xa2   : > { %v403_v6 = vsub.f32 %v388_v0, %v401_v5  ;;  %v1890_v5 = vld [vmem:[%s2740_s8] ss:$0 sm:$0xff] }
  0xa3   : > { %v399_v7 = vpop.xlane.xlu0 %398 }
  0xa4   : > { %v402_v8 = vmul.f32 0.03125, %v399_v7  ;;  %v405_v9 = vmul.f32 %v403_v6, %v403_v6 }
  0xa6   : > { %v404_v10 = vsub.f32 %v389_v1, %v402_v8  ;;  %v407_v11 = vsel %vm392_vm0, %v405_v9, 0.0  ;;  %v2260_v8 = vmov 65535  }
  0xa7   : > { %408 = vadd.xlane.f32.xlu1 %v407_v11  ;;  %v686_v9 = vsel %vm684_vm4, 4294967295, %v2260_v8  ;;  %v1895_v11 = vld [vmem:[%s2735_s3 + $0x28] sm:$0xff] }
  0xa8   : > { %v406_v12 = vmul.f32 %v404_v10, %v404_v10  ;;  %v2427_v16 = vsel %vm685_vm5, %v686_v9, 0 }
  0xaa   : > { %v410_v13 = vsel %vm396_vm1, %v406_v12, 0.0 }
  0xab   : > { %411 = vadd.xlane.f32.xlu1 %v410_v13 }
 0x134   : > { %v409_v27 = vpop.xlane.xlu1 %408 }
 0x135   : > { %v413_v28 = vmul.f32 0.03125, %v409_v27  ;;  %v1910_v27 = vld [vmem:[%s2739_s7 + $0x30] sm:$0xff] }
 0x137   : > { %v415_v29 = vadd.f32 1e-05, %v413_v28  ;;  %v1911_v28 = vld [vmem:[%s2739_s7 + $0x38] sm:$0xff] }
 0x138   : > { %v412_v30 = vpop.xlane.xlu1 %411 }
 0x139   : > { %2214 = vrsqrt.f32 %v415_v29  ;;  %v414_v31 = vmul.f32 0.03125, %v412_v30  ;;  %v855_v29 = vpack.c.bf16 %v1911_v28, %v1910_v27 }
 0x13b   : > { %v416_v32 = vadd.f32 1e-05, %v414_v31 }
 0x13d   : > { %2216 = vrsqrt.f32 %v416_v32 }
 0x143   : > { %v2215_v33 = vpop.eup %2214 }
 0x144   : > { %v419_v34 = vmul.f32 %v2215_v33, %v403_v6 }
 0x146   : > { %v427_v37 = vmul.f32 %v1884_v35, %v419_v34 }
 0x147   : > { %v2217_v36 = vpop.eup %2216 }
 0x148   : > { %v420_v38 = vmul.f32 %v2217_v36, %v404_v10  ;;  %v435_v43 = vadd.f32 %v1885_v39, %v427_v37  ;;  %v1894_v10 = vld [vmem:[%s2735_s3 + $0x20] sm:$0xff] }
 0x149   : > { %v740_v17 = vpack.c.bf16 %v1895_v11, %v1894_v10  ;;  %v1899_v36 = vld [vmem:[%s2736_s4 + $0x1] ss:$0 sm:$0xff] }
 0x14a   : > { %v428_v40 = vmul.f32 %v1884_v35, %v420_v38 }
 0x14c   : > { %v436_v44 = vadd.f32 %v1885_v39, %v428_v40 }
 0x14e   : > { %v2387_v46 = vpack.c.bf16 %v436_v44, %v435_v43 }
 0x150   : > { %2040 = vmatmul.mubr.msk.bf16.vlgmr.msra.gmra.mrb[0].mxu0 %vm392_vm0, %v2387_v46  ;;  %2048 = vmatmul.mubr.msk.bf16.vlgmr.msra.gmra.mrb[0].mxu1 %vm392_vm0, %v2387_v46 }
 0x151   : > { %2052 = vmatpush3.bf16.msra.mxu0 %v555_v45  ;;  %2055 = vmatprep.mubr.msk.bf16.mxu0 %vm2259_vm2, %v2258_v19 }
 0x152   : > { %2053 = vmatprep.subr.bf16.mxu0 %v2258_v19  ;;  %2061 = vmatprep.mubr.msk.bf16.mxu1 %vm2259_vm2, %v2258_v19 }
 0x155   : > { %2054 = vmatpush3.bf16.msra.mxu0 %v556_v49 }
 0x156   : > { %2065 = vmatprep.subr.bf16.mxu0 %v2258_v19 }
 0x158   : > { %2056 = vmatmul.mubr.msk.bf16.vlgmr.msra.gmra.mrb[4].mxu0 %vm392_vm0, %v2387_v46 }
 0x159   : > { %2067 = vmatprep.mubr.msk.bf16.mxu0 %vm2259_vm2, %v2258_v19 }
 0x223   : > { %v488_v51 = vpop.f32.mrb[0].mxu0  ;;  %v544_v53 = vpop.f32.mrb[0].mxu1 }
 0x224   : > { %v489_v54 = vadd.f32 %v1886_v50, %v488_v51  ;;  %v2041_v55 = vpop.f32.mrb[1].mxu0  ;;  %v2049_v56 = vpop.f32.mrb[1].mxu1  ;;  %v545_v59 = vadd.f32 %v1888_v52, %v544_v53 }
 0x225   : > { %v491_v57 = vpop.f32.mrb[2].mxu0  ;;  %v547_v58 = vpop.f32.mrb[2].mxu1 }
 0x226   : > { %v492_v60 = vadd.f32 %v1886_v50, %v491_v57  ;;  %v548_v61 = vadd.f32 %v1888_v52, %v547_v58  ;;  %v2042_v62 = vpop.f32.mrb[3].mxu0  ;;  %v2050_v63 = vpop.f32.mrb[3].mxu1  ;;  %v495_v0 = vmul.f32 0.35355338, %v489_v54 }
 0x228   : > { %v496_v1 = vmul.f32 0.35355338, %v492_v60  ;;  %v606_v2 = vpack.c.bf16 %v548_v61, %v545_v59 }
 0x22a   : > { %v605_v3 = vpack.c.bf16 %v496_v1, %v495_v0  ;;  %v612_v4 = vsel %vm607_vm3, %v606_v2, 0 }
 0x22b   : > { %v598_v6 = vpop.f32.mrb[4].mxu0  ;;  %2060 = vmatpush3.bf16.xpose.msra.mxu1 %v612_v4 }
 0x22c   : > { %v2057_v7 = vpop.f32.mrb[5].mxu0  ;;  %2071 = vmatprep.subr.bf16.mxu1 %v2258_v19  ;;  %v599_v13 = vadd.f32 %v1890_v5, %v598_v6  ;;  %v1902_v6 = vld [vmem:[%s2737_s5 + $0x28] sm:$0xff] }
 0x22d   : > { %v601_v12 = vpop.f32.mrb[6].mxu0 }
 0x22e   : > { %v602_v14 = vadd.f32 %v1890_v5, %v601_v12  ;;  %v2058_v15 = vpop.f32.mrb[7].mxu0  ;;  %v1901_v5 = vld [vmem:[%s2737_s5 + $0x20] sm:$0xff]  ;;  %v1903_v12 = vld [vmem:[%s2737_s5 + $0x30] sm:$0xff] }
 0x22f   : > { %v798_v10 = vpack.c.bf16 %v1902_v6, %v1901_v5 }
 0x230   : > { %v680_v18 = vpack.c.bf16 %v602_v14, %v599_v13  ;;  %v1904_v13 = vld [vmem:[%s2737_s5 + $0x38] sm:$0xff] }
 0x231   : > { %v799_v14 = vpack.c.bf16 %v1904_v13, %v1903_v12  ;;  %v1923_v12 = vld [vmem:[%s2735_s3 + $0x58] sm:$0xff] }
 0x232   : > { %v689_v22 = vand.u32 %v2427_v16, %v680_v18  ;;  %2062 = vmatmul.mubr.msk.bf16.vlgmr.msra.gmra.mrb[4].mxu1 %vm607_vm3, %v605_v3 }
 0x233   : > { %2072 = vmatpush3.bf16.msra.mxu1 %v740_v17  ;;  %2075 = vmatprep.mubr.msk.bf16.mxu1 %vm2259_vm2, %v2258_v19 }
 0x234   : > { %2066 = vmatpush3.bf16.msra.mxu0 %v689_v22  ;;  %2073 = vmatprep.subr.bf16.mxu1 %v2258_v19  ;;  %v1906_v22 = vld [vmem:[%s2738_s6 + $0x1] ss:$0 sm:$0xff] }
 0x235   : > { %2079 = vmatprep.subr.bf16.mxu0 %v2258_v19 }
 0x237   : > { %2074 = vmatpush3.bf16.msra.mxu1 %v741_v23 }
 0x238   : > { %2087 = vmatprep.subr.bf16.mxu1 %v2258_v19 }
 0x23a   : > { %2076 = vmatmul.mubr.msk.bf16.vlgmr.msra.gmra.mrb[8].mxu1 %vm392_vm0, %v2387_v46 }
 0x23b   : > { %2088 = vmatpush3.bf16.msra.mxu1 %v854_v26  ;;  %2091 = vmatprep.mubr.msk.bf16.mxu1 %vm2259_vm2, %v2258_v19 }
 0x23c   : > { %2089 = vmatprep.subr.bf16.mxu1 %v2258_v19 }
 0x23f   : > { %2090 = vmatpush3.bf16.msra.mxu1 %v855_v29 }
 0x240   : > { %2101 = vmatprep.subr.bf16.mxu1 %v2258_v19 }
 0x242   : > { %2092 = vmatmul.mubr.msk.bf16.vlgmr.msra.gmra.mrb[12].mxu1 %vm392_vm0, %v2387_v46 }
 0x243   : > { %2103 = vmatprep.mubr.msk.bf16.mxu1 %vm2259_vm2, %v2258_v19 }
 0x305   : > { %v648_v30 = vpop.f32.mrb[4].mxu1 }
 0x306   : > { %v2063_v31 = vpop.f32.mrb[5].mxu1  ;;  %v656_v32 = vsel %vm655_vm6, %v648_v30, -inf }
 0x307   : > { %657 = vmax.xlane.f32.xlu0 %v656_v32  ;;  %v651_v33 = vpop.f32.mrb[6].mxu1 }
 0x308   : > { %v2064_v34 = vpop.f32.mrb[7].mxu1  ;;  %v660_v35 = vsel %vm659_vm7, %v651_v33, -inf }
 0x309   : > { %661 = vmax.xlane.f32.xlu1 %v660_v35 }
 0x30d   : > { %v784_v37 = vpop.f32.mrb[8].mxu1 }
 0x30e   : > { %v785_v38 = vadd.f32 %v1899_v36, %v784_v37  ;;  %v2077_v39 = vpop.f32.mrb[9].mxu1 }
 0x30f   : > { %v787_v40 = vpop.f32.mrb[10].mxu1 }
 0x310   : > { %v788_v41 = vadd.f32 %v1899_v36, %v787_v40  ;;  %v2078_v42 = vpop.f32.mrb[11].mxu1  ;;  %v2469_v43 = vmul.f32 0.35355338, %v785_v38 }
 0x312   : > { %v2471_v44 = vmul.f32 0.35355338, %v788_v41 }
 0x314   : > { %v905_v45 = vpack.c.bf16 %v2471_v44, %v2469_v43 }
 0x315   : > { %v898_v48 = vpop.f32.mrb[12].mxu1 }
 0x316   : > { %v2093_v49 = vpop.f32.mrb[13].mxu1  ;;  %v899_v51 = vadd.f32 %v1913_v47, %v898_v48  ;;  %v1917_v48 = vld [vmem:[%s2741_s9 + $0x8] sm:$0xff] }
 0x317   : > { %v901_v50 = vpop.f32.mrb[14].mxu1  ;;  %v1028_v49 = vpack.c.bf16 %v1917_v48, %v1917_v48 }
 0x318   : > { %v902_v52 = vadd.f32 %v1913_v47, %v901_v50  ;;  %v2094_v53 = vpop.f32.mrb[15].mxu1 }
 0x319   : > { %v1033_v50 = vsel %vm684_vm4, %v1028_v49, 0  ;;  %v733_v53 = vld [vmem:[%s2741_s9] sm:$0xff] }
 0x31a   : > { %v977_v54 = vpack.c.bf16 %v902_v52, %v899_v51 }
 0x31c   : > { %v982_v55 = vand.u32 %v977_v54, %v2427_v16 }
 0x31e   : > { %2102 = vmatpush3.bf16.msra.mxu1 %v982_v55  ;;  %v734_v55 = vpack.c.bf16 %v733_v53, %v733_v53 }
 0x31f   : > { %2113 = vmatprep.subr.bf16.mxu1 %v2258_v19 }
 0x394   : > { %v658_v56 = vpop.xlane.xlu0 %657 }
 0x395   : > { %v663_v57 = vsub.f32 %v648_v30, %v658_v56 }
 0x396   : > { %v662_v58 = vpop.xlane.xlu1 %661 }
 0x397   : > { %v665_v59 = vmul.f32 1.442695, %v663_v57  ;;  %v664_v60 = vsub.f32 %v651_v33, %v662_v58 }
 0x399   : > { %2218 = vpow2.f32 %v665_v59  ;;  %v667_v61 = vmul.f32 1.442695, %v664_v60  ;;  %v1080_v60 = vsel %vm684_vm4, %v734_v55, 0 }
 0x39b   : > { %2220 = vpow2.f32 %v667_v61  ;;  %v1927_v61 = vld [vmem:[%s2737_s5 + $0x40] sm:$0xff] }
 0x3a3   : > { %v2219_v62 = vpop.eup %2218 }
 0x3a4   : > { %v669_v63 = vsel %vm655_vm6, %v2219_v62, 0.0 }
 0x3a5   : > { %v2221_v0 = vpop.eup %2220  ;;  %670 = vadd.xlane.f32.xlu0 %v669_v63 }
 0x3a6   : > { %v672_v1 = vsel %vm659_vm7, %v2221_v0, 0.0 }
 0x3a7   : > { %673 = vadd.xlane.f32.xlu1 %v672_v1  ;;  %v1930_v1 = vld [vmem:[%s2737_s5 + $0x58] sm:$0xff] }
 0x432   : > { %v671_v2 = vpop.xlane.xlu0 %670 }
 0x433   : > { %2222 = vrcp.f32 %v671_v2 }
 0x434   : > { %v674_v3 = vpop.xlane.xlu1 %673 }
 0x435   : > { %2224 = vrcp.f32 %v674_v3  ;;  %v1920_v3 = vld [vmem:[%s2735_s3 + $0x40] sm:$0xff] }
 0x43d   : > { %v2223_v4 = vpop.eup %2222 }
 0x43e   : > { %v677_v8 = vmul.f32 %v2223_v4, %v2219_v62  ;;  %v1928_v62 = vld [vmem:[%s2737_s5 + $0x48] sm:$0xff] }
 0x43f   : > { %v2225_v7 = vpop.eup %2224  ;;  %v1186_v63 = vpack.c.bf16 %v1928_v62, %v1927_v61  ;;  %v1921_v4 = vld [vmem:[%s2735_s3 + $0x48] sm:$0xff] }
 0x440   : > { %v678_v9 = vmul.f32 %v2225_v7, %v2221_v0  ;;  %v1929_v0 = vld [vmem:[%s2737_s5 + $0x50] sm:$0xff] }
 0x441   : > { %v1187_v2 = vpack.c.bf16 %v1930_v1, %v1929_v0 }
 0x442   : > { %v679_v11 = vpack.c.bf16 %v678_v9, %v677_v8  ;;  %v1128_v8 = vpack.c.bf16 %v1921_v4, %v1920_v3 }
 0x444   : > { %2068 = vmatmul.mubr.msk.bf16.vlgmr.msra.gmra.mrb[8].mxu0 %vm655_vm6, %v679_v11  ;;  %v1922_v11 = vld [vmem:[%s2735_s3 + $0x50] sm:$0xff] }
 0x445   : > { %2080 = vmatpush3.bf16.msra.mxu0 %v798_v10  ;;  %2083 = vmatprep.mubr.msk.bf16.mxu0 %vm2259_vm2, %v2258_v19  ;;  %v1129_v13 = vpack.c.bf16 %v1923_v12, %v1922_v11 }
 0x446   : > { %2081 = vmatprep.subr.bf16.mxu0 %v2258_v19 }
 0x449   : > { %2082 = vmatpush3.bf16.msra.mxu0 %v799_v14  ;;  %v1934_v14 = vld [vmem:[%s2739_s7 + $0x40] sm:$0xff] }
 0x44a   : > { %2095 = vmatprep.subr.bf16.mxu0 %v2258_v19 }
 0x44c   : > { %2084 = vmatmul.mubr.msk.bf16.vlgmr.msra.gmra.mrb[12].mxu0 %vm392_vm0, %v2387_v46 }
 0x44d   : > { %2097 = vmatprep.mubr.msk.bf16.mxu0 %vm2259_vm2, %v2258_v19 }
 0x517   : > { %v2503_v15 = vpop.f32.mrb[8].mxu0 }
 0x518   : > { %v2069_v17 = vpop.f32.mrb[9].mxu0 }
 0x519   : > { %v2505_v18 = vpop.f32.mrb[10].mxu0 }
 0x51a   : > { %v732_v20 = vpack.c.bf16 %v2505_v18, %v2503_v15  ;;  %v2070_v21 = vpop.f32.mrb[11].mxu0  ;;  %v1935_v15 = vld [vmem:[%s2739_s7 + $0x48] sm:$0xff] }
 0x51b   : > { %v1242_v21 = vpack.c.bf16 %v1935_v15, %v1934_v14 }
 0x51f   : > { %v842_v23 = vpop.f32.mrb[12].mxu0 }
 0x520   : > { %v2085_v24 = vpop.f32.mrb[13].mxu0  ;;  %v843_v26 = vadd.f32 %v1906_v22, %v842_v23  ;;  %v1936_v23 = vld [vmem:[%s2739_s7 + $0x50] sm:$0xff] }
 0x521   : > { %v845_v25 = vpop.f32.mrb[14].mxu0  ;;  %v1937_v24 = vld [vmem:[%s2739_s7 + $0x58] sm:$0xff] }
 0x522   : > { %v846_v27 = vadd.f32 %v1906_v22, %v845_v25  ;;  %v2086_v28 = vpop.f32.mrb[15].mxu0  ;;  %v1243_v25 = vpack.c.bf16 %v1937_v24, %v1936_v23 }
 0x524   : > { %v906_v29 = vpack.c.bf16 %v846_v27, %v843_v26  ;;  %v1932_v26 = vld [vmem:[%s2738_s6 + $0x2] ss:$0 sm:$0xff] }
 0x526   : > { %v911_v30 = vsel %vm607_vm3, %v906_v29, 0 }
 0x527   : > { %2096 = vmatpush3.bf16.xpose.msra.mxu0 %v911_v30 }
 0x528   : > { %2107 = vmatprep.subr.bf16.mxu0 %v2258_v19 }
 0x52e   : > { %2098 = vmatmul.mubr.msk.bf16.vlgmr.msra.gmra.mrb[16].mxu0 %vm607_vm3, %v905_v45 }
 0x52f   : > { %2109 = vmatprep.mubr.msk.bf16.mxu0 %vm2259_vm2, %v2258_v19  ;;  %2108 = vmatpush3.bf16.msra.mxu0 %v1033_v50 }
 0x530   : > { %2119 = vmatprep.subr.bf16.mxu0 %v2258_v19 }
 0x601   : > { %v947_v31 = vpop.f32.mrb[16].mxu0 }
 0x602   : > { %v2099_v32 = vpop.f32.mrb[17].mxu0  ;;  %v954_v33 = vsel %vm655_vm6, %v947_v31, -inf }
 0x603   : > { %955 = vmax.xlane.f32.xlu0 %v954_v33  ;;  %v950_v34 = vpop.f32.mrb[18].mxu0 }
 0x604   : > { %v2100_v35 = vpop.f32.mrb[19].mxu0  ;;  %v957_v36 = vsel %vm659_vm7, %v950_v34, -inf }
 0x605   : > { %958 = vmax.xlane.f32.xlu1 %v957_v36 }
 0x690   : > { %v956_v37 = vpop.xlane.xlu0 %955 }
 0x691   : > { %v960_v38 = vsub.f32 %v947_v31, %v956_v37 }
 0x692   : > { %v959_v39 = vpop.xlane.xlu1 %958 }
 0x693   : > { %v962_v40 = vmul.f32 1.442695, %v960_v38  ;;  %v961_v41 = vsub.f32 %v950_v34, %v959_v39 }
 0x695   : > { %2226 = vpow2.f32 %v962_v40  ;;  %v964_v42 = vmul.f32 1.442695, %v961_v41  ;;  %v1925_v41 = vld [vmem:[%s2736_s4 + $0x2] ss:$0 sm:$0xff] }
 0x697   : > { %2228 = vpow2.f32 %v964_v42 }
 0x69f   : > { %v2227_v43 = vpop.eup %2226 }
 0x6a0   : > { %v966_v44 = vsel %vm655_vm6, %v2227_v43, 0.0 }
 0x6a1   : > { %v2229_v45 = vpop.eup %2228  ;;  %967 = vadd.xlane.f32.xlu0 %v966_v44 }
 0x6a2   : > { %v969_v47 = vsel %vm659_vm7, %v2229_v45, 0.0 }
 0x6a3   : > { %970 = vadd.xlane.f32.xlu1 %v969_v47 }
 0x72e   : > { %v968_v51 = vpop.xlane.xlu0 %967 }
 0x72f   : > { %2230 = vrcp.f32 %v968_v51 }
 0x730   : > { %v971_v52 = vpop.xlane.xlu1 %970 }
 0x731   : > { %2232 = vrcp.f32 %v971_v52  ;;  %v1939_v52 = vld [vmem:[%s2740_s8 + $0x2] ss:$0 sm:$0xff] }
 0x739   : > { %v2231_v54 = vpop.eup %2230 }
 0x73a   : > { %v974_v57 = vmul.f32 %v2231_v54, %v2227_v43 }
 0x73b   : > { %v2233_v56 = vpop.eup %2232 }
 0x73c   : > { %v975_v58 = vmul.f32 %v2233_v56, %v2229_v45 }
 0x73e   : > { %v976_v59 = vpack.c.bf16 %v975_v58, %v974_v57 }
 0x740   : > { %2104 = vmatmul.mubr.msk.bf16.vlgmr.msra.gmra.mrb[16].mxu1 %vm655_vm6, %v976_v59 }
 0x741   : > { %2114 = vmatpush3.bf16.msra.mxu1 %v1080_v60  ;;  %2115 = vmatprep.mubr.msk.bf16.mxu1 %vm2259_vm2, %v2258_v19 }
 0x742   : > { %2127 = vmatprep.subr.bf16.mxu1 %v2258_v19 }
 0x748   : > { %2116 = vmatmul.mubr.msk.bf16.vlgmr.msra.gmra.mrb[20].mxu1 %vm607_vm3, %v732_v20 }
 0x749   : > { %2128 = vmatpush3.bf16.msra.mxu1 %v1186_v63  ;;  %2131 = vmatprep.mubr.msk.bf16.mxu1 %vm2259_vm2, %v2258_v19 }
 0x74a   : > { %2129 = vmatprep.subr.bf16.mxu1 %v2258_v19 }
 0x74d   : > { %2130 = vmatpush3.bf16.msra.mxu1 %v1187_v2 }
 0x74e   : > { %2143 = vmatprep.subr.bf16.mxu1 %v2258_v19 }
 0x750   : > { %2132 = vmatmul.mubr.msk.bf16.vlgmr.msra.gmra.mrb[24].mxu1 %vm392_vm0, %v2387_v46 }
 0x751   : > { %2145 = vmatprep.mubr.msk.bf16.mxu1 %vm2259_vm2, %v2258_v19 }
 0x813   : > { %v1018_v5 = vpop.f32.mrb[16].mxu1 }
 0x814   : > { %v2105_v6 = vpop.f32.mrb[17].mxu1 }
 0x815   : > { %v1021_v7 = vpop.f32.mrb[18].mxu1 }
 0x816   : > { %v1025_v9 = vpack.c.bf16 %v1021_v7, %v1018_v5  ;;  %v2106_v10 = vpop.f32.mrb[19].mxu1 }
 0x818   : > { %2110 = vmatmul.mubr.msk.bf16.vlgmr.msra.gmra.mrb[20].mxu0 %vm607_vm3, %v1025_v9 }
 0x819   : > { %2120 = vmatpush3.bf16.msra.mxu0 %v1128_v8  ;;  %2123 = vmatprep.mubr.msk.bf16.mxu0 %vm2259_vm2, %v2258_v19 }
 0x81a   : > { %2121 = vmatprep.subr.bf16.mxu0 %v2258_v19 }
 0x81b   : > { %v1116_v17 = vpop.f32.mrb[20].mxu1 }
 0x81c   : > { %v2117_v18 = vpop.f32.mrb[21].mxu1 }
 0x81d   : > { %v1119_v20 = vpop.f32.mrb[22].mxu1  ;;  %2122 = vmatpush3.bf16.msra.mxu0 %v1129_v13  ;;  %v1943_v13 = vld [vmem:[%s2741_s9 + $0x10] sm:$0xff] }
 0x81e   : > { %v2118_v22 = vpop.f32.mrb[23].mxu1  ;;  %2135 = vmatprep.subr.bf16.mxu0 %v2258_v19  ;;  %v1416_v14 = vpack.c.bf16 %v1943_v13, %v1943_v13 }
 0x81f   : > { %v1946_v22 = vld [vmem:[%s2735_s3 + $0x68] sm:$0xff] }
 0x820   : > { %2124 = vmatmul.mubr.msk.bf16.vlgmr.msra.gmra.mrb[24].mxu0 %vm392_vm0, %v2387_v46  ;;  %v1421_v15 = vsel %vm684_vm4, %v1416_v14, 0 }
 0x821   : > { %2136 = vmatpush3.bf16.msra.mxu0 %v1242_v21  ;;  %2139 = vmatprep.mubr.msk.bf16.mxu0 %vm2259_vm2, %v2258_v19  ;;  %v1945_v21 = vld [vmem:[%s2735_s3 + $0x60] sm:$0xff] }
 0x822   : > { %2137 = vmatprep.subr.bf16.mxu0 %v2258_v19 }
 0x823   : > { %v1230_v27 = vpop.f32.mrb[24].mxu1 }
 0x824   : > { %v2133_v28 = vpop.f32.mrb[25].mxu1  ;;  %v1231_v30 = vadd.f32 %v1932_v26, %v1230_v27 }
 0x825   : > { %v1233_v29 = vpop.f32.mrb[26].mxu1  ;;  %2138 = vmatpush3.bf16.msra.mxu0 %v1243_v25  ;;  %v1947_v28 = vld [vmem:[%s2735_s3 + $0x70] sm:$0xff] }
 0x826   : > { %v1234_v31 = vadd.f32 %v1932_v26, %v1233_v29  ;;  %v2134_v32 = vpop.f32.mrb[27].mxu1  ;;  %2149 = vmatprep.subr.bf16.mxu0 %v2258_v19  ;;  %v1471_v26 = vpack.c.bf16 %v1946_v22, %v1945_v21  ;;  %v1948_v29 = vld [vmem:[%s2735_s3 + $0x78] sm:$0xff] }
 0x827   : > { %v1960_v32 = vld [vmem:[%s2739_s7 + $0x68] sm:$0xff] }
 0x828   : > { %v1294_v33 = vpack.c.bf16 %v1234_v31, %v1231_v30  ;;  %2140 = vmatmul.mubr.msk.bf16.vlgmr.msra.gmra.mrb[28].mxu0 %vm392_vm0, %v2387_v46  ;;  %v1472_v30 = vpack.c.bf16 %v1948_v29, %v1947_v28  ;;  %v1959_v31 = vld [vmem:[%s2739_s7 + $0x60] sm:$0xff] }
 0x829   : > { %2151 = vmatprep.mubr.msk.bf16.mxu0 %vm2259_vm2, %v2258_v19 }
 0x82a   : > { %v1299_v34 = vsel %vm607_vm3, %v1294_v33, 0  ;;  %v1585_v33 = vpack.c.bf16 %v1960_v32, %v1959_v31 }
 0x82b   : > { %2144 = vmatpush3.bf16.xpose.msra.mxu1 %v1299_v34  ;;  %v1961_v34 = vld [vmem:[%s2739_s7 + $0x70] sm:$0xff] }
 0x82c   : > { %2155 = vmatprep.subr.bf16.mxu1 %v2258_v19 }
 0x8eb   : > { %v1069_v35 = vpop.f32.mrb[20].mxu0 }
 0x8ec   : > { %v2605_v36 = vadd.f32 %v1116_v17, %v1069_v35  ;;  %v2111_v37 = vpop.f32.mrb[21].mxu0  ;;  %v1962_v35 = vld [vmem:[%s2739_s7 + $0x78] sm:$0xff] }
 0x8ed   : > { %v1072_v38 = vpop.f32.mrb[22].mxu0  ;;  %v1586_v37 = vpack.c.bf16 %v1962_v35, %v1961_v34  ;;  %v1968_v34 = vld [vmem:[%s2741_s9 + $0x18] sm:$0xff] }
 0x8ee   : > { %v2607_v39 = vadd.f32 %v1119_v20, %v1072_v38  ;;  %v2112_v40 = vpop.f32.mrb[23].mxu0  ;;  %v1952_v38 = vld [vmem:[%s2737_s5 + $0x60] sm:$0xff]  ;;  %v1759_v35 = vpack.c.bf16 %v1968_v34, %v1968_v34 }
 0x8ef   : > { %v1953_v40 = vld [vmem:[%s2737_s5 + $0x68] sm:$0xff] }
 0x8f3   : > { %v1172_v42 = vpop.f32.mrb[24].mxu0 }
 0x8f4   : > { %v1173_v43 = vadd.f32 %v1925_v41, %v1172_v42  ;;  %v2125_v44 = vpop.f32.mrb[25].mxu0 }
 0x8f5   : > { %v1175_v45 = vpop.f32.mrb[26].mxu0  ;;  %v1529_v44 = vpack.c.bf16 %v1953_v40, %v1952_v38 }
 0x8f6   : > { %v1176_v47 = vadd.f32 %v1925_v41, %v1175_v45  ;;  %v2126_v48 = vpop.f32.mrb[27].mxu0  ;;  %v1179_v49 = vmul.f32 0.35355338, %v1173_v43 }
 0x8f7   : > { %v1954_v48 = vld [vmem:[%s2737_s5 + $0x70] sm:$0xff] }
 0x8f8   : > { %v1180_v50 = vmul.f32 0.35355338, %v1176_v47 }
 0x8fa   : > { %v1293_v51 = vpack.c.bf16 %v1180_v50, %v1179_v49  ;;  %v1955_v49 = vld [vmem:[%s2737_s5 + $0x78] sm:$0xff]  ;;  %v1950_v50 = vld [vmem:[%s2736_s4 + $0x3] ss:$0 sm:$0xff] }
 0x8fb   : > { %v1286_v53 = vpop.f32.mrb[28].mxu0 }
 0x8fc   : > { %v2141_v54 = vpop.f32.mrb[29].mxu0  ;;  %2146 = vmatmul.mubr.msk.bf16.vlgmr.msra.gmra.mrb[28].mxu1 %vm607_vm3, %v1293_v51  ;;  %v1287_v56 = vadd.f32 %v1939_v52, %v1286_v53  ;;  %v1530_v51 = vpack.c.bf16 %v1955_v49, %v1954_v48 }
 0x8fd   : > { %v1289_v55 = vpop.f32.mrb[30].mxu0  ;;  %2157 = vmatprep.mubr.msk.bf16.mxu1 %vm2259_vm2, %v2258_v19  ;;  %2156 = vmatpush3.bf16.msra.mxu1 %v1421_v15 }
 0x8fe   : > { %v1290_v57 = vadd.f32 %v1939_v52, %v1289_v55  ;;  %v2142_v58 = vpop.f32.mrb[31].mxu0  ;;  %2169 = vmatprep.subr.bf16.mxu1 %v2258_v19 }
 0x900   : > { %v1365_v59 = vpack.c.bf16 %v1290_v57, %v1287_v56 }
 0x902   : > { %v1370_v60 = vand.u32 %v1365_v59, %v2427_v16 }
 0x904   : > { %2150 = vmatpush3.bf16.msra.mxu0 %v1370_v60 }
 0x905   : > { %2161 = vmatprep.subr.bf16.mxu0 %v2258_v19 }
 0x9cf   : > { %v1335_v61 = vpop.f32.mrb[28].mxu1 }
 0x9d0   : > { %v2147_v62 = vpop.f32.mrb[29].mxu1  ;;  %v1342_v63 = vsel %vm655_vm6, %v1335_v61, -inf }
 0x9d1   : > { %1343 = vmax.xlane.f32.xlu0 %v1342_v63  ;;  %v1338_v0 = vpop.f32.mrb[30].mxu1 }
 0x9d2   : > { %v2148_v1 = vpop.f32.mrb[31].mxu1  ;;  %v1345_v2 = vsel %vm659_vm7, %v1338_v0, -inf }
 0x9d3   : > { %1346 = vmax.xlane.f32.xlu1 %v1345_v2 }
 0xa5e   : > { %v1344_v3 = vpop.xlane.xlu0 %1343 }
 0xa5f   : > { %v1348_v4 = vsub.f32 %v1335_v61, %v1344_v3  ;;  %v1964_v61 = vld [vmem:[%s2740_s8 + $0x3] ss:$0 sm:$0xff] }
 0xa60   : > { %v1347_v5 = vpop.xlane.xlu1 %1346 }
 0xa61   : > { %v1350_v6 = vmul.f32 1.442695, %v1348_v4  ;;  %v1349_v7 = vsub.f32 %v1338_v0, %v1347_v5 }
 0xa63   : > { %2234 = vpow2.f32 %v1350_v6  ;;  %v1352_v8 = vmul.f32 1.442695, %v1349_v7 }
 0xa65   : > { %2236 = vpow2.f32 %v1352_v8 }
 0xa6d   : > { %v2235_v9 = vpop.eup %2234 }
 0xa6e   : > { %v1354_v10 = vsel %vm655_vm6, %v2235_v9, 0.0 }
 0xa6f   : > { %v2237_v11 = vpop.eup %2236  ;;  %1355 = vadd.xlane.f32.xlu0 %v1354_v10 }
 0xa70   : > { %v1357_v12 = vsel %vm659_vm7, %v2237_v11, 0.0 }
 0xa71   : > { %1358 = vadd.xlane.f32.xlu1 %v1357_v12 }
 0xafc   : > { %v1356_v17 = vpop.xlane.xlu0 %1355 }
 0xafd   : > { %2238 = vrcp.f32 %v1356_v17 }
 0xafe   : > { %v1359_v18 = vpop.xlane.xlu1 %1358 }
 0xaff   : > { %2240 = vrcp.f32 %v1359_v18 }
 0xb07   : > { %v2239_v20 = vpop.eup %2238 }
 0xb08   : > { %v1362_v24 = vmul.f32 %v2239_v20, %v2235_v9 }
 0xb09   : > { %v2241_v23 = vpop.eup %2240 }
 0xb0a   : > { %v1363_v25 = vmul.f32 %v2241_v23, %v2237_v11  ;;  %v1957_v11 = vld [vmem:[%s2738_s6 + $0x3] ss:$0 sm:$0xff] }
 0xb0c   : > { %v1364_v27 = vpack.c.bf16 %v1363_v25, %v1362_v24 }
 0xb0e   : > { %2152 = vmatmul.mubr.msk.bf16.vlgmr.msra.gmra.mrb[32].mxu0 %vm655_vm6, %v1364_v27 }
 0xb0f   : > { %2162 = vmatpush3.bf16.msra.mxu0 %v1471_v26  ;;  %2165 = vmatprep.mubr.msk.bf16.mxu0 %vm2259_vm2, %v2258_v19 }
 0xb10   : > { %2163 = vmatprep.subr.bf16.mxu0 %v2258_v19 }
 0xb13   : > { %2164 = vmatpush3.bf16.msra.mxu0 %v1472_v30 }
 0xb14   : > { %2177 = vmatprep.subr.bf16.mxu0 %v2258_v19 }
 0xb16   : > { %2166 = vmatmul.mubr.msk.bf16.vlgmr.msra.gmra.mrb[36].mxu0 %vm392_vm0, %v2387_v46 }
 0xb17   : > { %2178 = vmatpush3.bf16.msra.mxu0 %v1585_v33  ;;  %2181 = vmatprep.mubr.msk.bf16.mxu0 %vm2259_vm2, %v2258_v19 }
 0xb18   : > { %2179 = vmatprep.subr.bf16.mxu0 %v2258_v19 }
 0xb1b   : > { %2180 = vmatpush3.bf16.msra.mxu0 %v1586_v37  ;;  %v1764_v37 = vsel %vm684_vm4, %v1759_v35, 0 }
 0xb1c   : > { %2191 = vmatprep.subr.bf16.mxu0 %v2258_v19 }
 0xb1e   : > { %2182 = vmatmul.mubr.msk.bf16.vlgmr.msra.gmra.mrb[40].mxu0 %vm392_vm0, %v2387_v46 }
 0xb1f   : > { %2193 = vmatprep.mubr.msk.bf16.mxu0 %vm2259_vm2, %v2258_v19 }
 0xbe1   : > { %v1406_v41 = vpop.f32.mrb[32].mxu0 }
 0xbe2   : > { %v2153_v42 = vpop.f32.mrb[33].mxu0 }
 0xbe3   : > { %v1409_v43 = vpop.f32.mrb[34].mxu0 }
 0xbe4   : > { %v1413_v45 = vpack.c.bf16 %v1409_v43, %v1406_v41  ;;  %v2154_v47 = vpop.f32.mrb[35].mxu0 }
 0xbe6   : > { %2158 = vmatmul.mubr.msk.bf16.vlgmr.msra.gmra.mrb[32].mxu1 %vm607_vm3, %v1413_v45 }
 0xbe7   : > { %2170 = vmatpush3.bf16.msra.mxu1 %v1529_v44  ;;  %2173 = vmatprep.mubr.msk.bf16.mxu1 %vm2259_vm2, %v2258_v19 }
 0xbe8   : > { %2171 = vmatprep.subr.bf16.mxu1 %v2258_v19 }
 0xbe9   : > { %v1515_v52 = vpop.f32.mrb[36].mxu0 }
 0xbea   : > { %v1516_v53 = vadd.f32 %v1950_v50, %v1515_v52  ;;  %v2167_v54 = vpop.f32.mrb[37].mxu0 }
 0xbeb   : > { %v1518_v55 = vpop.f32.mrb[38].mxu0  ;;  %2172 = vmatpush3.bf16.msra.mxu1 %v1530_v51 }
 0xbec   : > { %v1519_v56 = vadd.f32 %v1950_v50, %v1518_v55  ;;  %v2168_v57 = vpop.f32.mrb[39].mxu0  ;;  %2185 = vmatprep.subr.bf16.mxu1 %v2258_v19  ;;  %v1522_v58 = vmul.f32 0.35355338, %v1516_v53  ;;  %v1970_v53 = vld [vmem:[%s2742_s10] ss:$0 sm:$0xff] }
 0xbee   : > { %v1523_v59 = vmul.f32 0.35355338, %v1519_v56  ;;  %2174 = vmatmul.mubr.msk.bf16.vlgmr.msra.gmra.mrb[36].mxu1 %vm392_vm0, %v2387_v46 }
 0xbef   : > { %2187 = vmatprep.mubr.msk.bf16.mxu1 %vm2259_vm2, %v2258_v19 }
 0xbf0   : > { %v1636_v60 = vpack.c.bf16 %v1523_v59, %v1522_v58 }
 0xbf1   : > { %v1629_v62 = vpop.f32.mrb[40].mxu0 }
 0xbf2   : > { %v2183_v63 = vpop.f32.mrb[41].mxu0  ;;  %v1630_v1 = vadd.f32 %v1964_v61, %v1629_v62 }
 0xbf3   : > { %v1632_v0 = vpop.f32.mrb[42].mxu0 }
 0xbf4   : > { %v1633_v2 = vadd.f32 %v1964_v61, %v1632_v0  ;;  %v2184_v3 = vpop.f32.mrb[43].mxu0 }
 0xbf6   : > { %v1708_v4 = vpack.c.bf16 %v1633_v2, %v1630_v1 }
 0xbf8   : > { %v1713_v5 = vand.u32 %v1708_v4, %v2427_v16 }
 0xbfa   : > { %2192 = vmatpush3.bf16.msra.mxu0 %v1713_v5 }
 0xcb9   : > { %v1457_v6 = vpop.f32.mrb[32].mxu1 }
 0xcba   : > { %v1464_v46 = vadd.f32 %v1457_v6, %v2605_v36  ;;  %v2159_v7 = vpop.f32.mrb[33].mxu1 }
 0xcbb   : > { %v1460_v8 = vpop.f32.mrb[34].mxu1 }
 0xcbc   : > { %v2698_v9 = vadd.f32 %v1460_v8, %v2607_v39  ;;  %v2160_v10 = vpop.f32.mrb[35].mxu1 }
 0xcc1   : > { %v1573_v12 = vpop.f32.mrb[36].mxu1 }
 0xcc2   : > { %v2175_v13 = vpop.f32.mrb[37].mxu1  ;;  %v1574_v15 = vadd.f32 %v1957_v11, %v1573_v12 }
 0xcc3   : > { %v1576_v14 = vpop.f32.mrb[38].mxu1 }
 0xcc4   : > { %v1577_v17 = vadd.f32 %v1957_v11, %v1576_v14  ;;  %v2176_v16 = vpop.f32.mrb[39].mxu1 }
 0xcc6   : > { %v1637_v18 = vpack.c.bf16 %v1577_v17, %v1574_v15 }
 0xcc8   : > { %v1642_v20 = vsel %vm607_vm3, %v1637_v18, 0 }
 0xcc9   : > { %2186 = vmatpush3.bf16.xpose.msra.mxu1 %v1642_v20 }
 0xcca   : > { %2197 = vmatprep.subr.bf16.mxu1 %v2258_v19 }
 0xcd0   : > { %2188 = vmatmul.mubr.msk.bf16.vlgmr.msra.gmra.mrb[40].mxu1 %vm607_vm3, %v1636_v60 }
 0xcd1   : > { %2199 = vmatprep.mubr.msk.bf16.mxu1 %vm2259_vm2, %v2258_v19  ;;  %2198 = vmatpush3.bf16.msra.mxu1 %v1764_v37 }
 0xda3   : > { %v1678_v36 = vpop.f32.mrb[40].mxu1 }
 0xda4   : > { %v2189_v39 = vpop.f32.mrb[41].mxu1  ;;  %v1685_v21 = vsel %vm655_vm6, %v1678_v36, -inf }
 0xda5   : > { %1686 = vmax.xlane.f32.xlu0 %v1685_v21  ;;  %v1681_v22 = vpop.f32.mrb[42].mxu1 }
 0xda6   : > { %v2190_v23 = vpop.f32.mrb[43].mxu1  ;;  %v1688_v24 = vsel %vm659_vm7, %v1681_v22, -inf }
 0xda7   : > { %1689 = vmax.xlane.f32.xlu1 %v1688_v24 }
 0xe32   : > { %v1687_v25 = vpop.xlane.xlu0 %1686 }
 0xe33   : > { %v1691_v26 = vsub.f32 %v1678_v36, %v1687_v25 }
 0xe34   : > { %v1690_v27 = vpop.xlane.xlu1 %1689 }
 0xe35   : > { %v1693_v28 = vmul.f32 1.442695, %v1691_v26  ;;  %v1692_v29 = vsub.f32 %v1681_v22, %v1690_v27 }
 0xe37   : > { %2242 = vpow2.f32 %v1693_v28  ;;  %v1695_v30 = vmul.f32 1.442695, %v1692_v29 }
 0xe39   : > { %2244 = vpow2.f32 %v1695_v30 }
 0xe41   : > { %v2243_v31 = vpop.eup %2242 }
 0xe42   : > { %v1697_v19 = vsel %vm655_vm6, %v2243_v31, 0.0 }
 0xe43   : > { %v2245_v32 = vpop.eup %2244  ;;  %1698 = vadd.xlane.f32.xlu0 %v1697_v19 }
 0xe44   : > { %v1700_v33 = vsel %vm659_vm7, %v2245_v32, 0.0 }
 0xe45   : > { %1701 = vadd.xlane.f32.xlu1 %v1700_v33 }
 0xed0   : > { %v1699_v38 = vpop.xlane.xlu0 %1698 }
 0xed1   : > { %2246 = vrcp.f32 %v1699_v38 }
 0xed2   : > { %v1702_v40 = vpop.xlane.xlu1 %1701 }
 0xed3   : > { %2248 = vrcp.f32 %v1702_v40 }
 0xedb   : > { %v2247_v41 = vpop.eup %2246 }
 0xedc   : > { %v1705_v43 = vmul.f32 %v2247_v41, %v2243_v31 }
 0xedd   : > { %v2249_v42 = vpop.eup %2248 }
 0xede   : > { %v1706_v44 = vmul.f32 %v2249_v42, %v2245_v32 }
 0xee0   : > { %v1707_v45 = vpack.c.bf16 %v1706_v44, %v1705_v43 }
 0xee2   : > { %2194 = vmatmul.mubr.msk.bf16.vlgmr.msra.gmra.mrb[44].mxu0 %vm655_vm6, %v1707_v45 }
 0xfb5   : > { %v1749_v47 = vpop.f32.mrb[44].mxu0 }
 0xfb6   : > { %v2195_v48 = vpop.f32.mrb[45].mxu0 }
 0xfb7   : > { %v1752_v49 = vpop.f32.mrb[46].mxu0 }
 0xfb8   : > { %v1756_v50 = vpack.c.bf16 %v1752_v49, %v1749_v47  ;;  %v2196_v51 = vpop.f32.mrb[47].mxu0 }
 0xfba   : > { %2200 = vmatmul.mubr.msk.bf16.vlgmr.msra.gmra.mrb[44].mxu1 %vm607_vm3, %v1756_v50 }
0x108d   : > { %v1800_v52 = vpop.f32.mrb[44].mxu1 }
0x108e   : > { %v1807_v54 = vadd.f32 %v1800_v52, %v1464_v46  ;;  %v2201_v55 = vpop.f32.mrb[45].mxu1 }
0x108f   : > { %v1803_v56 = vpop.f32.mrb[46].mxu1 }
0x1090   : > { %v1816_v57 = vadd.f32 %v1970_v53, %v1807_v54  ;;  %v1808_v58 = vadd.f32 %v1803_v56, %v2698_v9  ;;  %v2202_v59 = vpop.f32.mrb[47].mxu1 }
0x1092   : > { %1818 = vst.msk [vmem:[%s386_s12] sm:$0xff] %vm392_vm0, %v1816_v57  ;;  %v1817_v60 = vadd.f32 %v1970_v53, %v1808_v58 }
0x1094   : > { %1819 = vst.msk [vmem:[%s386_s12 + $0x8] sm:$0x1] %vm396_vm1, %v1817_v60 }
0x1095 PF: > { %s21_s17 = sadd.s32 1, %s2256_s17  }
0x1096   : > { %p18_p4 = scmp.ge.s32.totalorder %s21_s17, 6  }
0x1098   :  { %20 = sbr.rel (!%p18_p4) target bundleno = 1 (0x1), region = 115 }

// kernel: model_forward.26
= control target key start
LH: loop header
LB: loop body
LE: loop exit
PB: predicated region body
PF: predicated region fallthrough
CT: control target
= control target key end

     0   :  { %vm34_vm0 = vcmask 261120   ;;  %vm47_vm1 = vcmask 253952   ;;  %v442_v38 = vmov 0.0   ;;  %vm443_vm2 = vmmov 0   ;;  %s643_s0 = inlined_call_operand.vmem [shape: f32[1,33,32], index: 0, kind: input, shape index: {}]   ;;  %s644_s3 = inlined_call_operand.vmem [shape: f32[32,64], index: 3, kind: input, shape index: {}]   ;;  %s645_s1 = inlined_call_operand.vmem [shape: f32[1,32], index: 1, kind: input, shape index: {}]   ;;  %s646_s2 = inlined_call_operand.vmem [shape: f32[1,32], index: 2, kind: input, shape index: {}, may-alias: {2,6}]   ;;  %s647_s5 = inlined_call_operand.vmem [shape: f32[64,32], index: 5, kind: input, shape index: {}]   ;;  %s648_s4 = inlined_call_operand.vmem [shape: f32[1,64], index: 4, kind: input, shape index: {}]   ;;  %s649_s6 = inlined_call_operand.vmem [shape: f32[1,32], index: 6, kind: input, shape index: {}, may-alias: {2,6}]   ;;  %s650_s7 = inlined_call_operand.vmem [shape: f32[1,33,32], index: 7, kind: output, shape index: {}]  }
   0x1   :  { %v487_v0 = vld [vmem:[%s643_s0] sm:$0xff]  ;;  %v492_v1 = vld [vmem:[%s643_s0 + $0x10] sm:$0xff]  ;;  %v497_v2 = vld [vmem:[%s643_s0 + $0x8] sm:$0xff]  ;;  %374 = vmatprep.subr.bf16.mxu0 %v442_v38  ;;  %390 = vmatprep.subr.bf16.mxu1 %v442_v38  ;;  %vm267_vm3 = vcmask 523264  }
   0x2   :  { %v35_v3 = vsel %vm34_vm0, %v487_v0, 0.0  ;;  %v41_v4 = vsel %vm34_vm0, %v492_v1, 0.0  ;;  %v506_v5 = vld [vmem:[%s643_s0 + $0x18] sm:$0xff]  ;;  %v38_v6 = vsel %vm34_vm0, %v497_v2, 0.0  ;;  %v515_v8 = vld [vmem:[%s643_s0 + $0x20] sm:$0x1]  ;;  %378 = vmatprep.mubr.msk.bf16.mxu0 %vm443_vm2, %v442_v38  ;;  %398 = vmatprep.mubr.msk.bf16.mxu1 %vm443_vm2, %v442_v38 }
   0x3   :  { %36 = vadd.xlane.f32.xlu0 %v35_v3  ;;  %42 = vadd.xlane.f32.xlu1 %v41_v4  ;;  %v44_v7 = vsel %vm34_vm0, %v506_v5, 0.0  ;;  %v48_v9 = vsel %vm47_vm1, %v515_v8, 0.0  ;;  %v124_v35 = vld [vmem:[%s644_s3] sm:$0xff]  ;;  %v125_v36 = vld [vmem:[%s644_s3 + $0x8] sm:$0xff]  ;;  %v126_v39 = vld [vmem:[%s644_s3 + $0x10] sm:$0xff] }
   0x4   :  { %v132_v37 = vpack.c.bf16 %v125_v36, %v124_v35  ;;  %v127_v40 = vld [vmem:[%s644_s3 + $0x18] sm:$0xff]  ;;  %v347_v59 = vld [vmem:[%s645_s1] ss:$0 sm:$0xff] }
   0x5   :  { %v133_v41 = vpack.c.bf16 %v127_v40, %v126_v39  ;;  %v348_v3 = vld [vmem:[%s646_s2] ss:$0 sm:$0xff] }
   0x6   :  { %375 = vmatpush3.bf16.msra.mxu0 %v132_v37  ;;  %v349_v35 = vld [vmem:[%s648_s4] ss:$0 sm:$0xff] }
   0x7   :  { %39 = vadd.xlane.f32.xlu0 %v38_v6  ;;  %45 = vadd.xlane.f32.xlu1 %v44_v7 }
   0x8   :  { %376 = vmatprep.subr.bf16.mxu0 %v442_v38 }
   0xa   :  { %377 = vmatpush3.bf16.msra.mxu0 %v133_v41 }
   0xb   :  { %49 = vadd.xlane.f32.xlu0 %v48_v9 }
  0x90   :  { %v37_v10 = vpop.xlane.xlu0 %36  ;;  %v43_v11 = vpop.xlane.xlu1 %42 }
  0x91   :  { %v52_v12 = vmul.f32 0.03125, %v37_v10  ;;  %v54_v13 = vmul.f32 0.03125, %v43_v11 }
  0x93   :  { %v520_v14 = vsub.f32 %v487_v0, %v52_v12  ;;  %v523_v15 = vsub.f32 %v492_v1, %v54_v13 }
  0x94   :  { %v40_v16 = vpop.xlane.xlu0 %39  ;;  %v46_v17 = vpop.xlane.xlu1 %45 }
  0x95   :  { %v53_v18 = vmul.f32 0.03125, %v40_v16  ;;  %v55_v19 = vmul.f32 0.03125, %v46_v17  ;;  %v62_v20 = vmul.f32 %v520_v14, %v520_v14  ;;  %v64_v21 = vmul.f32 %v523_v15, %v523_v15 }
  0x97   :  { %v58_v22 = vsub.f32 %v497_v2, %v53_v18  ;;  %v531_v23 = vsub.f32 %v506_v5, %v55_v19  ;;  %v67_v24 = vsel %vm34_vm0, %v62_v20, 0.0  ;;  %v73_v27 = vsel %vm34_vm0, %v64_v21, 0.0 }
  0x98   :  { %68 = vadd.xlane.f32.xlu1 %v67_v24  ;;  %v50_v25 = vpop.xlane.xlu0 %49  ;;  %v246_v24 = vld [vmem:[%s647_s5 + $0x8] sm:$0xff] }
  0x99   :  { %v56_v26 = vmul.f32 0.03125, %v50_v25  ;;  %v63_v28 = vmul.f32 %v58_v22, %v58_v22  ;;  %v65_v29 = vmul.f32 %v531_v23, %v531_v23 }
  0x9b   :  { %v538_v30 = vsub.f32 %v515_v8, %v56_v26  ;;  %v70_v31 = vsel %vm34_vm0, %v63_v28, 0.0  ;;  %v76_v32 = vsel %vm34_vm0, %v65_v29, 0.0  ;;  %v247_v26 = vld [vmem:[%s647_s5 + $0x10] sm:$0xff]  ;;  %v249_v29 = vld [vmem:[%s647_s5 + $0x20] sm:$0xff] }
  0x9c   :  { %74 = vadd.xlane.f32.xlu1 %v73_v27  ;;  %71 = vadd.xlane.f32.xlu0 %v70_v31  ;;  %v248_v27 = vld [vmem:[%s647_s5 + $0x18] sm:$0xff] }
  0x9d   :  { %v66_v33 = vmul.f32 %v538_v30, %v538_v30  ;;  %v258_v28 = vpack.c.bf16 %v248_v27, %v247_v26 }
  0x9f   :  { %v79_v34 = vsel %vm47_vm1, %v66_v33, 0.0  ;;  %v252_v33 = vld [vmem:[%s647_s5 + $0x38] sm:$0xff] }
  0xa0   :  { %77 = vadd.xlane.f32.xlu0 %v76_v32  ;;  %80 = vadd.xlane.f32.xlu1 %v79_v34  ;;  %v251_v32 = vld [vmem:[%s647_s5 + $0x30] sm:$0xff] }
  0xa1   :  { %v260_v34 = vpack.c.bf16 %v252_v33, %v251_v32 }
 0x125   :  { %v69_v42 = vpop.xlane.xlu1 %68 }
 0x126   :  { %v82_v43 = vmul.f32 0.03125, %v69_v42 }
 0x128   :  { %v87_v44 = vadd.f32 1e-05, %v82_v43 }
 0x129   :  { %v75_v45 = vpop.xlane.xlu1 %74  ;;  %v72_v46 = vpop.xlane.xlu0 %71 }
 0x12a   :  { %412 = vrsqrt.f32 %v87_v44  ;;  %v84_v47 = vmul.f32 0.03125, %v75_v45  ;;  %v83_v48 = vmul.f32 0.03125, %v72_v46 }
 0x12c   :  { %v88_v49 = vadd.f32 1e-05, %v83_v48  ;;  %v89_v50 = vadd.f32 1e-05, %v84_v47 }
 0x12d   :  { %v81_v51 = vpop.xlane.xlu1 %80  ;;  %v78_v52 = vpop.xlane.xlu0 %77 }
 0x12e   :  { %v85_v53 = vmul.f32 0.03125, %v78_v52  ;;  %414 = vrsqrt.f32 %v88_v49  ;;  %v86_v54 = vmul.f32 0.03125, %v81_v51 }
 0x12f   :  { %416 = vrsqrt.f32 %v89_v50 }
 0x130   :  { %v90_v55 = vadd.f32 1e-05, %v85_v53  ;;  %v91_v56 = vadd.f32 1e-05, %v86_v54 }
 0x132   :  { %418 = vrsqrt.f32 %v90_v55 }
 0x133   :  { %420 = vrsqrt.f32 %v91_v56 }
 0x134   :  { %v413_v57 = vpop.eup %412 }
 0x135   :  { %v97_v58 = vmul.f32 %v413_v57, %v520_v14 }
 0x137   :  { %v108_v62 = vmul.f32 %v347_v59, %v97_v58 }
 0x138   :  { %v415_v60 = vpop.eup %414 }
 0x139   :  { %v98_v61 = vmul.f32 %v415_v60, %v58_v22  ;;  %v417_v63 = vpop.eup %416  ;;  %v119_v10 = vadd.f32 %v348_v3, %v108_v62 }
 0x13a   :  { %v99_v7 = vmul.f32 %v417_v63, %v523_v15 }
 0x13b   :  { %v109_v4 = vmul.f32 %v347_v59, %v98_v61 }
 0x13c   :  { %v419_v6 = vpop.eup %418  ;;  %v110_v16 = vmul.f32 %v347_v59, %v99_v7 }
 0x13d   :  { %v100_v9 = vmul.f32 %v419_v6, %v531_v23  ;;  %v120_v11 = vadd.f32 %v348_v3, %v109_v4  ;;  %v421_v14 = vpop.eup %420  ;;  %v245_v23 = vld [vmem:[%s647_s5] sm:$0xff] }
 0x13e   :  { %v101_v17 = vmul.f32 %v421_v14, %v538_v30  ;;  %v121_v19 = vadd.f32 %v348_v3, %v110_v16  ;;  %v257_v25 = vpack.c.bf16 %v246_v24, %v245_v23  ;;  %v250_v30 = vld [vmem:[%s647_s5 + $0x28] sm:$0xff] }
 0x13f   :  { %v129_v12 = vpack.c.bf16 %v120_v11, %v119_v10  ;;  %v111_v13 = vmul.f32 %v347_v59, %v100_v9  ;;  %v259_v31 = vpack.c.bf16 %v250_v30, %v249_v29 }
 0x140   :  { %v112_v21 = vmul.f32 %v347_v59, %v101_v17  ;;  %391 = vmatpush3.bf16.msra.mxu1 %v257_v25 }
 0x141   :  { %379 = vmatmul.mubr.msk.bf16.vlgmr.msra.gmra.mrb[0].mxu0 %vm34_vm0, %v129_v12  ;;  %v122_v18 = vadd.f32 %v348_v3, %v111_v13  ;;  %392 = vmatprep.subr.bf16.mxu1 %v442_v38 }
 0x142   :  { %382 = vmatprep.mubr.msk.bf16.mxu0 %vm443_vm2, %v442_v38  ;;  %v123_v15 = vadd.f32 %v348_v3, %v112_v21 }
 0x143   :  { %v130_v20 = vpack.c.bf16 %v122_v18, %v121_v19 }
 0x144   :  { %v131_v22 = vpack.c.bf16 %v123_v15, %v123_v15  ;;  %393 = vmatpush3.bf16.msra.mxu1 %v258_v28  ;;  %v358_v28 = vld [vmem:[%s649_s6] ss:$0 sm:$0xff] }
 0x145   :  { %394 = vmatprep.subr.bf16.mxu1 %v442_v38 }
 0x148   :  { %395 = vmatpush3.bf16.msra.mxu1 %v259_v31 }
 0x149   :  { %383 = vmatmul.mubr.msk.bf16.gmra.mrb[4].mxu0 %vm34_vm0, %v130_v20  ;;  %396 = vmatprep.subr.bf16.mxu1 %v442_v38 }
 0x14a   :  { %386 = vmatprep.mubr.msk.bf16.mxu0 %vm443_vm2, %v442_v38 }
 0x14c   :  { %397 = vmatpush3.bf16.msra.mxu1 %v260_v34 }
 0x151   :  { %387 = vmatmul.mubr.msk.bf16.gmra.mrb[8].mxu0 %vm34_vm0, %v131_v22 }
 0x214   :  { %v183_v36 = vpop.f32.mrb[0].mxu0 }
 0x215   :  { %v184_v37 = vadd.f32 %v349_v35, %v183_v36  ;;  %v380_v39 = vpop.f32.mrb[1].mxu0 }
 0x216   :  { %v186_v40 = vpop.f32.mrb[2].mxu0 }
 0x217   :  { %v353_v41 = vmul.f32 -1.702, %v184_v37  ;;  %v187_v42 = vadd.f32 %v349_v35, %v186_v40  ;;  %v381_v43 = vpop.f32.mrb[3].mxu0 }
 0x219   :  { %v215_v44 = vmul.f32 1.442695, %v353_v41  ;;  %v354_v45 = vmul.f32 -1.702, %v187_v42 }
 0x21b   :  { %422 = vpow2.f32 %v215_v44  ;;  %v217_v46 = vmul.f32 1.442695, %v354_v45 }
 0x21c   :  { %v191_v47 = vpop.f32.mrb[4].mxu0 }
 0x21d   :  { %424 = vpow2.f32 %v217_v46  ;;  %v192_v48 = vadd.f32 %v349_v35, %v191_v47  ;;  %v384_v49 = vpop.f32.mrb[5].mxu0 }
 0x21e   :  { %v194_v50 = vpop.f32.mrb[6].mxu0 }
 0x21f   :  { %v355_v51 = vmul.f32 -1.702, %v192_v48  ;;  %v195_v52 = vadd.f32 %v349_v35, %v194_v50  ;;  %v385_v53 = vpop.f32.mrb[7].mxu0 }
 0x221   :  { %v219_v54 = vmul.f32 1.442695, %v355_v51  ;;  %v356_v55 = vmul.f32 -1.702, %v195_v52 }
 0x223   :  { %426 = vpow2.f32 %v219_v54  ;;  %v221_v56 = vmul.f32 1.442695, %v356_v55 }
 0x224   :  { %v199_v57 = vpop.f32.mrb[8].mxu0 }
 0x225   :  { %v423_v58 = vpop.eup %422  ;;  %428 = vpow2.f32 %v221_v56  ;;  %v200_v59 = vadd.f32 %v349_v35, %v199_v57  ;;  %v388_v60 = vpop.f32.mrb[9].mxu0 }
 0x226   :  { %v225_v61 = vadd.f32 1.0, %v423_v58  ;;  %v202_v62 = vpop.f32.mrb[10].mxu0 }
 0x227   :  { %v425_v63 = vpop.eup %424  ;;  %v357_v3 = vmul.f32 -1.702, %v200_v59  ;;  %v389_v4 = vpop.f32.mrb[11].mxu0 }
 0x228   :  { %430 = vrcp.f32 %v225_v61  ;;  %v226_v6 = vadd.f32 1.0, %v425_v63 }
 0x229   :  { %v223_v7 = vmul.f32 1.442695, %v357_v3 }
 0x22a   :  { %432 = vrcp.f32 %v226_v6 }
 0x22b   :  { %434 = vpow2.f32 %v223_v7 }
 0x22d   :  { %v427_v9 = vpop.eup %426 }
 0x22e   :  { %v227_v10 = vadd.f32 1.0, %v427_v9 }
 0x22f   :  { %v429_v11 = vpop.eup %428 }
 0x230   :  { %436 = vrcp.f32 %v227_v10  ;;  %v228_v12 = vadd.f32 1.0, %v429_v11 }
 0x232   :  { %v431_v13 = vpop.eup %430  ;;  %438 = vrcp.f32 %v228_v12 }
 0x233   :  { %v240_v17 = vmul.f32 %v431_v13, %v184_v37 }
 0x234   :  { %v433_v14 = vpop.eup %432 }
 0x235   :  { %v435_v16 = vpop.eup %434  ;;  %v241_v18 = vmul.f32 %v433_v14, %v187_v42 }
 0x236   :  { %v229_v19 = vadd.f32 1.0, %v435_v16 }
 0x237   :  { %v254_v20 = vpack.c.bf16 %v241_v18, %v240_v17 }
 0x238   :  { %440 = vrcp.f32 %v229_v19 }
 0x239   :  { %399 = vmatmul.mubr.msk.bf16.vlgmr.msra.gmra.mrb[0].mxu1 %vm267_vm3, %v254_v20 }
 0x23a   :  { %v437_v21 = vpop.eup %436  ;;  %402 = vmatprep.mubr.msk.bf16.mxu1 %vm443_vm2, %v442_v38 }
 0x23b   :  { %v242_v22 = vmul.f32 %v437_v21, %v192_v48 }
 0x23c   :  { %v439_v15 = vpop.eup %438 }
 0x23d   :  { %v243_v23 = vmul.f32 %v439_v15, %v195_v52 }
 0x23f   :  { %v255_v24 = vpack.c.bf16 %v243_v23, %v242_v22 }
 0x241   :  { %403 = vmatmul.mubr.msk.bf16.gmra.mrb[4].mxu1 %vm267_vm3, %v255_v24 }
 0x242   :  { %v441_v25 = vpop.eup %440  ;;  %406 = vmatprep.mubr.msk.bf16.mxu1 %vm443_vm2, %v442_v38 }
 0x243   :  { %v244_v26 = vmul.f32 %v441_v25, %v200_v59 }
 0x245   :  { %v256_v27 = vpack.c.bf16 %v244_v26, %v244_v26 }
 0x249   :  { %407 = vmatmul.mubr.msk.bf16.gmra.mrb[8].mxu1 %vm267_vm3, %v256_v27 }
 0x30c   :  { %v311_v29 = vpop.f32.mrb[0].mxu1 }
 0x30d   :  { %v312_v30 = vadd.f32 %v358_v28, %v311_v29  ;;  %v400_v31 = vpop.f32.mrb[1].mxu1 }
 0x30e   :  { %v314_v32 = vpop.f32.mrb[2].mxu1 }
 0x30f   :  { %v333_v33 = vadd.f32 %v312_v30, %v487_v0  ;;  %v315_v34 = vadd.f32 %v358_v28, %v314_v32  ;;  %v401_v35 = vpop.f32.mrb[3].mxu1 }
 0x311   :  { %338 = vst.msk [vmem:[%s650_s7] sm:$0xff] %vm34_vm0, %v333_v33  ;;  %v334_v38 = vadd.f32 %v315_v34, %v497_v2 }
 0x313   :  { %339 = vst.msk [vmem:[%s650_s7 + $0x8] sm:$0xff] %vm34_vm0, %v334_v38 }
 0x314   :  { %v319_v36 = vpop.f32.mrb[4].mxu1 }
 0x315   :  { %v320_v37 = vadd.f32 %v358_v28, %v319_v36  ;;  %v404_v39 = vpop.f32.mrb[5].mxu1 }
 0x316   :  { %v322_v40 = vpop.f32.mrb[6].mxu1 }
 0x317   :  { %v335_v0 = vadd.f32 %v320_v37, %v492_v1  ;;  %v323_v41 = vadd.f32 %v358_v28, %v322_v40  ;;  %v405_v42 = vpop.f32.mrb[7].mxu1 }
 0x319   :  { %340 = vst.msk [vmem:[%s650_s7 + $0x10] sm:$0xff] %vm34_vm0, %v335_v0  ;;  %v336_v2 = vadd.f32 %v323_v41, %v506_v5 }
 0x31b   :  { %341 = vst.msk [vmem:[%s650_s7 + $0x18] sm:$0xff] %vm34_vm0, %v336_v2 }
 0x31c   :  { %v327_v43 = vpop.f32.mrb[8].mxu1 }
 0x31d   :  { %v328_v44 = vadd.f32 %v358_v28, %v327_v43  ;;  %v408_v45 = vpop.f32.mrb[9].mxu1 }
 0x31e   :  { %v330_v46 = vpop.f32.mrb[10].mxu1 }
 0x31f   :  { %v337_v1 = vadd.f32 %v328_v44, %v515_v8  ;;  %v409_v47 = vpop.f32.mrb[11].mxu1 }
 0x321   :  { %342 = vst.msk [vmem:[%s650_s7 + $0x20] sm:$0x1] %vm47_vm1, %v337_v1 }

// kernel: model_forward.39
= control target key start
LH: loop header
LB: loop body
LE: loop exit
PB: predicated region body
PF: predicated region fallthrough
CT: control target
= control target key end

     0   :  { %vm18_vm0 = vcmask 261120   ;;  %s136_s0 = inlined_call_operand.vmem [shape: f32[8,32], index: 0, kind: input, shape index: {}]   ;;  %s137_s1 = inlined_call_operand.vmem [shape: f32[1,32], index: 1, kind: input, shape index: {}]   ;;  %s138_s2 = inlined_call_operand.vmem [shape: f32[1,32], index: 2, kind: input, shape index: {}]   ;;  %s139_s3 = inlined_call_operand.hbm [shape: f32[8,32], index: 3, kind: output, shape index: {}]  }
   0x1   :  { %v15_v0 = vld [vmem:[%s136_s0] sm:$0xff] }
   0x2   :  { %8 = vsyncpa [#allocation3], 0  ;;  %v19_v1 = vsel %vm18_vm0, %v15_v0, 0.0  ;;  %v62_v11 = vld [vmem:[%s137_s1] ss:$0 sm:$0xff]  ;;  %s91_s17 = smov [#allocation2]  }
   0x3   :  { %20 = vadd.xlane.f32.xlu0 %v19_v1  ;;  %v63_v13 = vld [vmem:[%s138_s2] ss:$0 sm:$0xff]  ;;  %s54_s18 = sshll.u32 %s91_s17, 4  ;;  %s55_s18 = int_to_ptr.vmem [resolvable:$true] %s54_s18 }
   0x4   :  { %s67_s19 = scalar_lea.vmem %s55_s18, 128  ;;  %p72_p1 = scmp.lt.s32.totalorder %s55_s18, %s55_s18 }
   0x5   :  { %p68_p0 = scmp.ne.s32.totalorder %s55_s18, %s67_s19  ;;  %p73_p2 = scmp.lt.s32.totalorder %s67_s19, %s67_s19 }
   0x7   :  { %p74_p3 = por %p73_p2, %p72_p1 }
   0x9   :  { %p75_p4 = pnand %p74_p3, %p68_p0 }
  0x90   :  { %v21_v2 = vpop.xlane.xlu0 %20 }
  0x91   :  { %v23_v3 = vmul.f32 0.03125, %v21_v2 }
  0x93   :  { %v24_v4 = vsub.f32 %v15_v0, %v23_v3 }
  0x95   :  { %v25_v5 = vmul.f32 %v24_v4, %v24_v4 }
  0x97   :  { %v26_v6 = vsel %vm18_vm0, %v25_v5, 0.0 }
  0x98   :  { %27 = vadd.xlane.f32.xlu0 %v26_v6 }
 0x125   :  { %v28_v7 = vpop.xlane.xlu0 %27 }
 0x126   :  { %v29_v8 = vmul.f32 0.03125, %v28_v7 }
 0x128   :  { %v30_v9 = vadd.f32 1e-05, %v29_v8 }
 0x12a   :  { %65 = vrsqrt.f32 %v30_v9 }
 0x134   :  { %v66_v10 = vpop.eup %65 }
 0x135   :  { %v32_v12 = vmul.f32 %v66_v10, %v24_v4 }
 0x137   :  { %v39_v14 = vmul.f32 %v62_v11, %v32_v12 }
 0x139   :  { %v46_v15 = vadd.f32 %v63_v13, %v39_v14 }
 0x13b   :  { %47 = vst.msk [vmem:[#allocation2] sm:$0xff] %vm18_vm0, %v46_v15 }
 0x13c   :  { %78 = shalt.err (!%p75_p4)
}
 0x13d   :  { %s79_s21 = scalar_lea.hbm %s139_s3, 128 }
 0x13e   :  { %p80_p5 = scmp.ne.s32.totalorder %s139_s3, %s79_s21  ;;  %p83_p6 = scmp.lt.u32.totalorder %s79_s21, %s139_s3 }
 0x140   :  { %p85_p7 = pnand %p83_p6, %p80_p5 }
 0x142   :  { %88 = shalt.err (!%p85_p7)
}
 0x143   :  { %57 = dma.vmem_to_hbm [thread:$0]  %s55_s18, 128, %s139_s3, [#allocation3]  }
 0x144   :  { %89 = dma.done.wait [#allocation3], 128  }
 0x145   :  { %90 = vsyncadd [#allocation3], 4294967168 }
 0x146   :  { %61 = vsyncpa [#allocation3], 1 }

</bundles_post_ra>
